<compile_context>
chip_gen: v5e
topology: v5e:2x2
jax: 0.10.0
libtpu: 0.0.40
codegen_flags: <defaults>
</compile_context>

<pallas_src>
import functools

import jax
import jax.numpy as jnp
from jax.experimental import pallas as pl
from jax.experimental.pallas import tpu as pltpu


# ----------------------------------------------------------------------------
# Fused ResidualBlock kernel.
#
# Per-batch layout: flattened reflection-padded image [C, Qpad], Qpad = the
# padded-grid extent Hp*Wp rounded up to a multiple of 128 lanes.  A value at
# lane q lives at padded-grid position (q // Wp, q % Wp); lanes >= Hp*Wp and
# padded-grid border positions hold garbage and are cropped on the host.
# ----------------------------------------------------------------------------
def _residual_block_kernel(Hp, Wp, C,
                           xg_ref, w1_ref, b1_ref, w2_ref, b2_ref,
                           alpha_ref, rc_ref, o_ref, stk_ref):
    Qpad = o_ref.shape[-1]

    def shifted(act, off):
        # result[:, q] = act[:, q + off].  Roll wrap-around only affects
        # padded-grid border / lane-tail positions, which the host crops.
        if off == 0:
            return act
        return pltpu.roll(act, (-off) % Qpad, axis=1)

    def fill_taps(act_f32):
        # Stack the 9 shifted taps along the contraction dim (bf16), so each
        # conv is one K = 9*C MXU dot instead of 9 accumulating K = C dots.
        for dh in range(3):
            for dw in range(3):
                off = (dh - 1) * Wp + (dw - 1)
                t = dh * 3 + dw
                stk_ref[pl.ds(t * C, C), :] = (
                    shifted(act_f32, off).astype(jnp.bfloat16))

    def conv3x3(w_ref, b_ref):
        # [C, 9C] (bf16) @ [9C, Qpad] (bf16) -> f32 accum, plus bias [C, 1].
        return jnp.dot(w_ref[...], stk_ref[...],
                       preferred_element_type=jnp.float32) + b_ref[...]

    x = xg_ref[0]                               # [C, Qpad] f32 (padded input)

    # ---- conv1 + PReLU (single learned scalar alpha) ----
    fill_taps(x)
    y = conv3x3(w1_ref, b1_ref)
    alpha = alpha_ref[0, 0]                     # scalar read from SMEM
    y = jnp.where(y >= 0.0, y, alpha * y)

    # ---- ReflectionPad2d(1) of the intermediate, done on the padded grid in
    #      registers with XLU rolls.  Rows first, then columns reading the
    #      row-fixed values -> reproduces PyTorch corner semantics:
    #        padded[0,:]   := padded[2,:]    padded[Hp-1,:]  := padded[Hp-3,:]
    #        padded[:,0]   := padded[:,2]    padded[:,Wp-1]  := padded[:,Wp-3]
    row = rc_ref[0:1, :]                        # [1, Qpad] int32
    col = rc_ref[1:2, :]
    y = jnp.where(row == 0,      shifted(y,  2 * Wp), y)
    y = jnp.where(row == Hp - 1, shifted(y, -2 * Wp), y)
    y = jnp.where(col == 0,      shifted(y,  2), y)
    y = jnp.where(col == Wp - 1, shifted(y, -2), y)

    # ---- conv2 * 0.1 + residual ----
    fill_taps(y)
    y2 = conv3x3(w2_ref, b2_ref)
    o_ref[0] = y2 * 0.1 + x


def residual_block_forward(x_nchw, params):
    """x_nchw: [B, C, H, W] float32 -> [B, C, H, W] float32."""
    B, C, H, W = x_nchw.shape
    Hp, Wp = H + 2, W + 2
    Qb = Hp * Wp
    Qpad = ((Qb + 127) // 128) * 128            # lane-dense spatial extent

    # Host-side glue (tiny): reflection-pad input, flatten, pad lane tail.
    xp = jnp.pad(x_nchw.astype(jnp.float32),
                 ((0, 0), (0, 0), (1, 1), (1, 1)), mode="reflect")
    xg = jnp.pad(xp.reshape(B, C, Qb), ((0, 0), (0, 0), (0, Qpad - Qb)))

    # Weights stacked over the 9 taps along the contraction axis:
    # column k = (dh*3 + dw)*Cin + ci  — matches the stacked activation rows.
    def stack_w(w):
        return jnp.transpose(w, (0, 2, 3, 1)).reshape(C, 9 * C).astype(jnp.bfloat16)

    w1 = stack_w(params["w1"])
    w2 = stack_w(params["w2"])
    b1 = params["b1"].reshape(C, 1).astype(jnp.float32)
    b2 = params["b2"].reshape(C, 1).astype(jnp.float32)
    alpha = params["alpha"].reshape(1, 1).astype(jnp.float32)

    # Per-lane (row, col) indices on the padded grid (tail lanes are harmless).
    q = jnp.arange(Qpad, dtype=jnp.int32)
    rc = jnp.stack([q // Wp, q % Wp], axis=0)   # [2, Qpad] int32

    kernel = functools.partial(_residual_block_kernel, Hp, Wp, C)
    out_flat = pl.pallas_call(
        kernel,
        out_shape=jax.ShapeDtypeStruct((B, C, Qpad), jnp.float32),
        grid=(B,),
        in_specs=[
            pl.BlockSpec((1, C, Qpad), lambda b: (b, 0, 0)),        # x (padded)
            pl.BlockSpec((C, 9 * C), lambda b: (0, 0)),             # w1 stacked
            pl.BlockSpec((C, 1), lambda b: (0, 0)),                 # b1
            pl.BlockSpec((C, 9 * C), lambda b: (0, 0)),             # w2 stacked
            pl.BlockSpec((C, 1), lambda b: (0, 0)),                 # b2
            pl.BlockSpec(memory_space=pltpu.MemorySpace.SMEM),      # alpha
            pl.BlockSpec((2, Qpad), lambda b: (0, 0)),              # rc
        ],
        out_specs=pl.BlockSpec((1, C, Qpad), lambda b: (b, 0, 0)),
        scratch_shapes=[pltpu.VMEM((9 * C, Qpad), jnp.bfloat16)],   # stacked taps
        compiler_params=pltpu.CompilerParams(
            dimension_semantics=("parallel",)),
    )(xg, w1, b1, w2, b2, alpha, rc)

    # Crop the lane tail + padded-grid border (garbage) and restore NCHW.
    out = out_flat[:, :, :Qb].reshape(B, C, Hp, Wp)[:, :, 1:H + 1, 1:W + 1]
    return out


# ----------------------------------------------------------------------------
# Pure-JAX reference (for correctness check)
# ----------------------------------------------------------------------------
def _ref_conv3x3(x, w, b):
    xp = jnp.pad(x, ((0, 0), (0, 0), (1, 1), (1, 1)), mode="reflect")
    y = jax.lax.conv_general_dilated(
        xp, w, window_strides=(1, 1), padding="VALID",
        dimension_numbers=("NCHW", "OIHW", "NCHW"),
        precision=jax.lax.Precision.HIGHEST)
    return y + b[None, :, None, None]


def residual_block_reference(x, p):
    h = _ref_conv3x3(x, p["w1"], p["b1"])
    h = jnp.where(h >= 0, h, p["alpha"] * h)          # PReLU, scalar alpha
    return _ref_conv3x3(h, p["w2"], p["b2"]) * 0.1 + x


# ----------------------------------------------------------------------------
# Deterministic synthetic parameters (shapes match nn.Module.__init__)
# ----------------------------------------------------------------------------
def init_params(key, channels):
    ks = jax.random.split(key, 4)
    s = 0.05
    return {
        "w1": (s * jax.random.normal(ks[0], (channels, channels, 3, 3))).astype(jnp.float32),
        "b1": (s * jax.random.normal(ks[1], (channels,))).astype(jnp.float32),
        "w2": (s * jax.random.normal(ks[2], (channels, channels, 3, 3))).astype(jnp.float32),
        "b2": (s * jax.random.normal(ks[3], (channels,))).astype(jnp.float32),
        "alpha": jnp.full((1,), 0.25, jnp.float32),   # nn.PReLU() default init
    }


if __name__ == "__main__":
    key = jax.random.PRNGKey(0)
    k_x, k_p = jax.random.split(key)
    B, C, H, W = 2, 32, 16, 16
    x = jax.random.normal(k_x, (B, C, H, W), dtype=jnp.float32)
    params = init_params(k_p, C)

    fwd = jax.jit(residual_block_forward)
    out = fwd(x, params)
    jax.block_until_ready(out)

    assert out.shape == (B, C, H, W)

    ref = residual_block_reference(x, params)
    err = jnp.max(jnp.abs(out - ref))
    # bf16 MXU operands (f32 accumulation); the final 0.1 scale keeps the
    # rounding error well below this tolerance.
    if not bool(err < 2e-2):
        raise AssertionError(f"mismatch vs reference: max abs err {err}")

    print("KERNEL_OK")
</pallas_src>

<mosaic_0001>
module attributes {stable_mosaic.version = 11 : i64} {
  func.func @_residual_block_kernel(%arg0: i32, %arg1: memref<1x32x384xf32, #tpu.memory_space<vmem>>, %arg2: memref<32x288xbf16, #tpu.memory_space<vmem>>, %arg3: memref<32x1xf32, #tpu.memory_space<vmem>>, %arg4: memref<32x288xbf16, #tpu.memory_space<vmem>>, %arg5: memref<32x1xf32, #tpu.memory_space<vmem>>, %arg6: memref<1x1xf32, #tpu.memory_space<smem>>, %arg7: memref<2x384xi32, #tpu.memory_space<vmem>>, %arg8: memref<1x32x384xf32, #tpu.memory_space<vmem>>, %arg9: memref<288x384xbf16, #tpu.memory_space<vmem>>) attributes {dimension_semantics = [#tpu.dimension_semantics<parallel>], iteration_bounds = array<i64: 2>, scalar_prefetch = 0 : i64, scratch_operands = 1 : i64, tpu.core_type = #tpu.core_type<tc>, window_params = [{transform_indices = @transform_0, window_bounds = array<i64: 1, 32, 384>}, {pipeline_mode = #tpu.pipeline_mode<synchronous>, transform_indices = @transform_1, window_bounds = array<i64: 32, 288>}, {pipeline_mode = #tpu.pipeline_mode<synchronous>, transform_indices = @transform_2, window_bounds = array<i64: 32, 1>}, {pipeline_mode = #tpu.pipeline_mode<synchronous>, transform_indices = @transform_3, window_bounds = array<i64: 32, 288>}, {pipeline_mode = #tpu.pipeline_mode<synchronous>, transform_indices = @transform_4, window_bounds = array<i64: 32, 1>}, {transform_indices = @transform_5, window_bounds = array<i64: 1, 1>}, {pipeline_mode = #tpu.pipeline_mode<synchronous>, transform_indices = @transform_6, window_bounds = array<i64: 2, 384>}, {transform_indices = @transform_7, window_bounds = array<i64: 1, 32, 384>}]} {
    %c0 = arith.constant 0 : index
    %c0_0 = arith.constant 0 : index
    %c0_1 = arith.constant 0 : index
    %0 = vector.load %arg1[%c0, %c0_0, %c0_1] : memref<1x32x384xf32, #tpu.memory_space<vmem>>, vector<1x32x384xf32>
    %1 = vector.shape_cast %0 : vector<1x32x384xf32> to vector<32x384xf32>
    %c19_i32 = arith.constant 19 : i32
    %2 = tpu.dynamic_rotate %1 by %c19_i32 dim 1 : vector<32x384xf32>, i32 -> vector<32x384xf32>
    %3 = arith.truncf %2 : vector<32x384xf32> to vector<32x384xbf16>
    %c0_2 = arith.constant 0 : index
    %c0_3 = arith.constant 0 : index
    %4 = vector.load %arg9[%c0_2, %c0_3] : memref<288x384xbf16, #tpu.memory_space<vmem>>, vector<32x384xbf16>
    tpu.vector_store %arg9[%c0_2, %c0_3], %3 {strides = array<i32>} : memref<288x384xbf16, #tpu.memory_space<vmem>>, vector<32x384xbf16>,
    %c18_i32 = arith.constant 18 : i32
    %5 = tpu.dynamic_rotate %1 by %c18_i32 dim 1 : vector<32x384xf32>, i32 -> vector<32x384xf32>
    %6 = arith.truncf %5 : vector<32x384xf32> to vector<32x384xbf16>
    %c32 = arith.constant 32 : index
    %c0_4 = arith.constant 0 : index
    %7 = vector.load %arg9[%c32, %c0_4] : memref<288x384xbf16, #tpu.memory_space<vmem>>, vector<32x384xbf16>
    tpu.vector_store %arg9[%c32, %c0_4], %6 {strides = array<i32>} : memref<288x384xbf16, #tpu.memory_space<vmem>>, vector<32x384xbf16>,
    %c17_i32 = arith.constant 17 : i32
    %8 = tpu.dynamic_rotate %1 by %c17_i32 dim 1 : vector<32x384xf32>, i32 -> vector<32x384xf32>
    %9 = arith.truncf %8 : vector<32x384xf32> to vector<32x384xbf16>
    %c64 = arith.constant 64 : index
    %c0_5 = arith.constant 0 : index
    %10 = vector.load %arg9[%c64, %c0_5] : memref<288x384xbf16, #tpu.memory_space<vmem>>, vector<32x384xbf16>
    tpu.vector_store %arg9[%c64, %c0_5], %9 {strides = array<i32>} : memref<288x384xbf16, #tpu.memory_space<vmem>>, vector<32x384xbf16>,
    %c1_i32 = arith.constant 1 : i32
    %11 = tpu.dynamic_rotate %1 by %c1_i32 dim 1 : vector<32x384xf32>, i32 -> vector<32x384xf32>
    %12 = arith.truncf %11 : vector<32x384xf32> to vector<32x384xbf16>
    %c96 = arith.constant 96 : index
    %c0_6 = arith.constant 0 : index
    %13 = vector.load %arg9[%c96, %c0_6] : memref<288x384xbf16, #tpu.memory_space<vmem>>, vector<32x384xbf16>
    tpu.vector_store %arg9[%c96, %c0_6], %12 {strides = array<i32>} : memref<288x384xbf16, #tpu.memory_space<vmem>>, vector<32x384xbf16>,
    %14 = arith.truncf %1 : vector<32x384xf32> to vector<32x384xbf16>
    %c128 = arith.constant 128 : index
    %c0_7 = arith.constant 0 : index
    %15 = vector.load %arg9[%c128, %c0_7] : memref<288x384xbf16, #tpu.memory_space<vmem>>, vector<32x384xbf16>
    tpu.vector_store %arg9[%c128, %c0_7], %14 {strides = array<i32>} : memref<288x384xbf16, #tpu.memory_space<vmem>>, vector<32x384xbf16>,
    %c383_i32 = arith.constant 383 : i32
    %16 = tpu.dynamic_rotate %1 by %c383_i32 dim 1 : vector<32x384xf32>, i32 -> vector<32x384xf32>
    %17 = arith.truncf %16 : vector<32x384xf32> to vector<32x384xbf16>
    %c160 = arith.constant 160 : index
    %c0_8 = arith.constant 0 : index
    %18 = vector.load %arg9[%c160, %c0_8] : memref<288x384xbf16, #tpu.memory_space<vmem>>, vector<32x384xbf16>
    tpu.vector_store %arg9[%c160, %c0_8], %17 {strides = array<i32>} : memref<288x384xbf16, #tpu.memory_space<vmem>>, vector<32x384xbf16>,
    %c367_i32 = arith.constant 367 : i32
    %19 = tpu.dynamic_rotate %1 by %c367_i32 dim 1 : vector<32x384xf32>, i32 -> vector<32x384xf32>
    %20 = arith.truncf %19 : vector<32x384xf32> to vector<32x384xbf16>
    %c192 = arith.constant 192 : index
    %c0_9 = arith.constant 0 : index
    %21 = vector.load %arg9[%c192, %c0_9] : memref<288x384xbf16, #tpu.memory_space<vmem>>, vector<32x384xbf16>
    tpu.vector_store %arg9[%c192, %c0_9], %20 {strides = array<i32>} : memref<288x384xbf16, #tpu.memory_space<vmem>>, vector<32x384xbf16>,
    %c366_i32 = arith.constant 366 : i32
    %22 = tpu.dynamic_rotate %1 by %c366_i32 dim 1 : vector<32x384xf32>, i32 -> vector<32x384xf32>
    %23 = arith.truncf %22 : vector<32x384xf32> to vector<32x384xbf16>
    %c224 = arith.constant 224 : index
    %c0_10 = arith.constant 0 : index
    %24 = vector.load %arg9[%c224, %c0_10] : memref<288x384xbf16, #tpu.memory_space<vmem>>, vector<32x384xbf16>
    tpu.vector_store %arg9[%c224, %c0_10], %23 {strides = array<i32>} : memref<288x384xbf16, #tpu.memory_space<vmem>>, vector<32x384xbf16>,
    %c365_i32 = arith.constant 365 : i32
    %25 = tpu.dynamic_rotate %1 by %c365_i32 dim 1 : vector<32x384xf32>, i32 -> vector<32x384xf32>
    %26 = arith.truncf %25 : vector<32x384xf32> to vector<32x384xbf16>
    %c256 = arith.constant 256 : index
    %c0_11 = arith.constant 0 : index
    %27 = vector.load %arg9[%c256, %c0_11] : memref<288x384xbf16, #tpu.memory_space<vmem>>, vector<32x384xbf16>
    tpu.vector_store %arg9[%c256, %c0_11], %26 {strides = array<i32>} : memref<288x384xbf16, #tpu.memory_space<vmem>>, vector<32x384xbf16>,
    %c0_12 = arith.constant 0 : index
    %c0_13 = arith.constant 0 : index
    %28 = vector.load %arg2[%c0_12, %c0_13] : memref<32x288xbf16, #tpu.memory_space<vmem>>, vector<32x288xbf16>
    %c0_14 = arith.constant 0 : index
    %c0_15 = arith.constant 0 : index
    %29 = vector.load %arg9[%c0_14, %c0_15] : memref<288x384xbf16, #tpu.memory_space<vmem>>, vector<288x384xbf16>
    %cst = arith.constant dense<0.000000e+00> : vector<32x384xf32>
    %30 = tpu.matmul %28, %29, %cst {dimension_numbers = #tpu.dot_dimension_numbers<[1], [0], [0], [1], [0, 0, 1, 1], [], []>} : vector<32x288xbf16>, vector<288x384xbf16>, vector<32x384xf32> -> vector<32x384xf32>
    %c0_16 = arith.constant 0 : index
    %c0_17 = arith.constant 0 : index
    %31 = vector.load %arg3[%c0_16, %c0_17] : memref<32x1xf32, #tpu.memory_space<vmem>>, vector<32x1xf32>
    %32 = vector.broadcast %31 : vector<32x1xf32> to vector<32x384xf32>
    %33 = arith.addf %30, %32 : vector<32x384xf32>
    %c0_18 = arith.constant 0 : index
    %c0_19 = arith.constant 0 : index
    %34 = memref.load %arg6[%c0_18, %c0_19] : memref<1x1xf32, #tpu.memory_space<smem>>
    %cst_20 = arith.constant 0.000000e+00 : f32
    %35 = vector.broadcast %cst_20 : f32 to vector<32x384xf32>
    %36 = arith.cmpf oge, %33, %35 : vector<32x384xf32>
    %37 = vector.broadcast %34 : f32 to vector<32x384xf32>
    %38 = arith.mulf %37, %33 : vector<32x384xf32>
    %39 = arith.select %36, %33, %38 : vector<32x384xi1>, vector<32x384xf32>
    %c0_21 = arith.constant 0 : index
    %c0_22 = arith.constant 0 : index
    %40 = vector.load %arg7[%c0_21, %c0_22] : memref<2x384xi32, #tpu.memory_space<vmem>>, vector<1x384xi32>
    %c1 = arith.constant 1 : index
    %c0_23 = arith.constant 0 : index
    %41 = vector.load %arg7[%c1, %c0_23] : memref<2x384xi32, #tpu.memory_space<vmem>>, vector<1x384xi32>
    %c0_i32 = arith.constant 0 : i32
    %42 = vector.broadcast %c0_i32 : i32 to vector<1x384xi32>
    %43 = arith.cmpi eq, %40, %42 : vector<1x384xi32>
    %c348_i32 = arith.constant 348 : i32
    %44 = tpu.dynamic_rotate %39 by %c348_i32 dim 1 : vector<32x384xf32>, i32 -> vector<32x384xf32>
    %45 = vector.shape_cast %43 : vector<1x384xi1> to vector<1x384xi1>
    %46 = vector.broadcast %45 : vector<1x384xi1> to vector<32x384xi1>
    %47 = arith.select %46, %44, %39 : vector<32x384xi1>, vector<32x384xf32>
    %c17_i32_24 = arith.constant 17 : i32
    %48 = vector.broadcast %c17_i32_24 : i32 to vector<1x384xi32>
    %49 = arith.cmpi eq, %40, %48 : vector<1x384xi32>
    %c36_i32 = arith.constant 36 : i32
    %50 = tpu.dynamic_rotate %47 by %c36_i32 dim 1 : vector<32x384xf32>, i32 -> vector<32x384xf32>
    %51 = vector.shape_cast %49 : vector<1x384xi1> to vector<1x384xi1>
    %52 = vector.broadcast %51 : vector<1x384xi1> to vector<32x384xi1>
    %53 = arith.select %52, %50, %47 : vector<32x384xi1>, vector<32x384xf32>
    %c0_i32_25 = arith.constant 0 : i32
    %54 = vector.broadcast %c0_i32_25 : i32 to vector<1x384xi32>
    %55 = arith.cmpi eq, %41, %54 : vector<1x384xi32>
    %c382_i32 = arith.constant 382 : i32
    %56 = tpu.dynamic_rotate %53 by %c382_i32 dim 1 : vector<32x384xf32>, i32 -> vector<32x384xf32>
    %57 = vector.shape_cast %55 : vector<1x384xi1> to vector<1x384xi1>
    %58 = vector.broadcast %57 : vector<1x384xi1> to vector<32x384xi1>
    %59 = arith.select %58, %56, %53 : vector<32x384xi1>, vector<32x384xf32>
    %c17_i32_26 = arith.constant 17 : i32
    %60 = vector.broadcast %c17_i32_26 : i32 to vector<1x384xi32>
    %61 = arith.cmpi eq, %41, %60 : vector<1x384xi32>
    %c2_i32 = arith.constant 2 : i32
    %62 = tpu.dynamic_rotate %59 by %c2_i32 dim 1 : vector<32x384xf32>, i32 -> vector<32x384xf32>
    %63 = vector.shape_cast %61 : vector<1x384xi1> to vector<1x384xi1>
    %64 = vector.broadcast %63 : vector<1x384xi1> to vector<32x384xi1>
    %65 = arith.select %64, %62, %59 : vector<32x384xi1>, vector<32x384xf32>
    %c19_i32_27 = arith.constant 19 : i32
    %66 = tpu.dynamic_rotate %65 by %c19_i32_27 dim 1 : vector<32x384xf32>, i32 -> vector<32x384xf32>
    %67 = arith.truncf %66 : vector<32x384xf32> to vector<32x384xbf16>
    %c0_28 = arith.constant 0 : index
    %c0_29 = arith.constant 0 : index
    %68 = vector.load %arg9[%c0_28, %c0_29] : memref<288x384xbf16, #tpu.memory_space<vmem>>, vector<32x384xbf16>
    tpu.vector_store %arg9[%c0_28, %c0_29], %67 {strides = array<i32>} : memref<288x384xbf16, #tpu.memory_space<vmem>>, vector<32x384xbf16>,
    %c18_i32_30 = arith.constant 18 : i32
    %69 = tpu.dynamic_rotate %65 by %c18_i32_30 dim 1 : vector<32x384xf32>, i32 -> vector<32x384xf32>
    %70 = arith.truncf %69 : vector<32x384xf32> to vector<32x384xbf16>
    %c32_31 = arith.constant 32 : index
    %c0_32 = arith.constant 0 : index
    %71 = vector.load %arg9[%c32_31, %c0_32] : memref<288x384xbf16, #tpu.memory_space<vmem>>, vector<32x384xbf16>
    tpu.vector_store %arg9[%c32_31, %c0_32], %70 {strides = array<i32>} : memref<288x384xbf16, #tpu.memory_space<vmem>>, vector<32x384xbf16>,
    %c17_i32_33 = arith.constant 17 : i32
    %72 = tpu.dynamic_rotate %65 by %c17_i32_33 dim 1 : vector<32x384xf32>, i32 -> vector<32x384xf32>
    %73 = arith.truncf %72 : vector<32x384xf32> to vector<32x384xbf16>
    %c64_34 = arith.constant 64 : index
    %c0_35 = arith.constant 0 : index
    %74 = vector.load %arg9[%c64_34, %c0_35] : memref<288x384xbf16, #tpu.memory_space<vmem>>, vector<32x384xbf16>
    tpu.vector_store %arg9[%c64_34, %c0_35], %73 {strides = array<i32>} : memref<288x384xbf16, #tpu.memory_space<vmem>>, vector<32x384xbf16>,
    %c1_i32_36 = arith.constant 1 : i32
    %75 = tpu.dynamic_rotate %65 by %c1_i32_36 dim 1 : vector<32x384xf32>, i32 -> vector<32x384xf32>
    %76 = arith.truncf %75 : vector<32x384xf32> to vector<32x384xbf16>
    %c96_37 = arith.constant 96 : index
    %c0_38 = arith.constant 0 : index
    %77 = vector.load %arg9[%c96_37, %c0_38] : memref<288x384xbf16, #tpu.memory_space<vmem>>, vector<32x384xbf16>
    tpu.vector_store %arg9[%c96_37, %c0_38], %76 {strides = array<i32>} : memref<288x384xbf16, #tpu.memory_space<vmem>>, vector<32x384xbf16>,
    %78 = arith.truncf %65 : vector<32x384xf32> to vector<32x384xbf16>
    %c128_39 = arith.constant 128 : index
    %c0_40 = arith.constant 0 : index
    %79 = vector.load %arg9[%c128_39, %c0_40] : memref<288x384xbf16, #tpu.memory_space<vmem>>, vector<32x384xbf16>
    tpu.vector_store %arg9[%c128_39, %c0_40], %78 {strides = array<i32>} : memref<288x384xbf16, #tpu.memory_space<vmem>>, vector<32x384xbf16>,
    %c383_i32_41 = arith.constant 383 : i32
    %80 = tpu.dynamic_rotate %65 by %c383_i32_41 dim 1 : vector<32x384xf32>, i32 -> vector<32x384xf32>
    %81 = arith.truncf %80 : vector<32x384xf32> to vector<32x384xbf16>
    %c160_42 = arith.constant 160 : index
    %c0_43 = arith.constant 0 : index
    %82 = vector.load %arg9[%c160_42, %c0_43] : memref<288x384xbf16, #tpu.memory_space<vmem>>, vector<32x384xbf16>
    tpu.vector_store %arg9[%c160_42, %c0_43], %81 {strides = array<i32>} : memref<288x384xbf16, #tpu.memory_space<vmem>>, vector<32x384xbf16>,
    %c367_i32_44 = arith.constant 367 : i32
    %83 = tpu.dynamic_rotate %65 by %c367_i32_44 dim 1 : vector<32x384xf32>, i32 -> vector<32x384xf32>
    %84 = arith.truncf %83 : vector<32x384xf32> to vector<32x384xbf16>
    %c192_45 = arith.constant 192 : index
    %c0_46 = arith.constant 0 : index
    %85 = vector.load %arg9[%c192_45, %c0_46] : memref<288x384xbf16, #tpu.memory_space<vmem>>, vector<32x384xbf16>
    tpu.vector_store %arg9[%c192_45, %c0_46], %84 {strides = array<i32>} : memref<288x384xbf16, #tpu.memory_space<vmem>>, vector<32x384xbf16>,
    %c366_i32_47 = arith.constant 366 : i32
    %86 = tpu.dynamic_rotate %65 by %c366_i32_47 dim 1 : vector<32x384xf32>, i32 -> vector<32x384xf32>
    %87 = arith.truncf %86 : vector<32x384xf32> to vector<32x384xbf16>
    %c224_48 = arith.constant 224 : index
    %c0_49 = arith.constant 0 : index
    %88 = vector.load %arg9[%c224_48, %c0_49] : memref<288x384xbf16, #tpu.memory_space<vmem>>, vector<32x384xbf16>
    tpu.vector_store %arg9[%c224_48, %c0_49], %87 {strides = array<i32>} : memref<288x384xbf16, #tpu.memory_space<vmem>>, vector<32x384xbf16>,
    %c365_i32_50 = arith.constant 365 : i32
    %89 = tpu.dynamic_rotate %65 by %c365_i32_50 dim 1 : vector<32x384xf32>, i32 -> vector<32x384xf32>
    %90 = arith.truncf %89 : vector<32x384xf32> to vector<32x384xbf16>
    %c256_51 = arith.constant 256 : index
    %c0_52 = arith.constant 0 : index
    %91 = vector.load %arg9[%c256_51, %c0_52] : memref<288x384xbf16, #tpu.memory_space<vmem>>, vector<32x384xbf16>
    tpu.vector_store %arg9[%c256_51, %c0_52], %90 {strides = array<i32>} : memref<288x384xbf16, #tpu.memory_space<vmem>>, vector<32x384xbf16>,
    %c0_53 = arith.constant 0 : index
    %c0_54 = arith.constant 0 : index
    %92 = vector.load %arg4[%c0_53, %c0_54] : memref<32x288xbf16, #tpu.memory_space<vmem>>, vector<32x288xbf16>
    %c0_55 = arith.constant 0 : index
    %c0_56 = arith.constant 0 : index
    %93 = vector.load %arg9[%c0_55, %c0_56] : memref<288x384xbf16, #tpu.memory_space<vmem>>, vector<288x384xbf16>
    %cst_57 = arith.constant dense<0.000000e+00> : vector<32x384xf32>
    %94 = tpu.matmul %92, %93, %cst_57 {dimension_numbers = #tpu.dot_dimension_numbers<[1], [0], [0], [1], [0, 0, 1, 1], [], []>} : vector<32x288xbf16>, vector<288x384xbf16>, vector<32x384xf32> -> vector<32x384xf32>
    %c0_58 = arith.constant 0 : index
    %c0_59 = arith.constant 0 : index
    %95 = vector.load %arg5[%c0_58, %c0_59] : memref<32x1xf32, #tpu.memory_space<vmem>>, vector<32x1xf32>
    %96 = vector.broadcast %95 : vector<32x1xf32> to vector<32x384xf32>
    %97 = arith.addf %94, %96 : vector<32x384xf32>
    %cst_60 = arith.constant 1.000000e-01 : f32
    %98 = vector.broadcast %cst_60 : f32 to vector<32x384xf32>
    %99 = arith.mulf %97, %98 : vector<32x384xf32>
    %100 = arith.addf %99, %1 : vector<32x384xf32>
    %c0_61 = arith.constant 0 : index
    %c0_62 = arith.constant 0 : index
    %c0_63 = arith.constant 0 : index
    %101 = vector.load %arg8[%c0_61, %c0_62, %c0_63] : memref<1x32x384xf32, #tpu.memory_space<vmem>>, vector<1x32x384xf32>
    %102 = vector.shape_cast %101 : vector<1x32x384xf32> to vector<32x384xf32>
    %103 = vector.shape_cast %100 : vector<32x384xf32> to vector<1x32x384xf32>
    tpu.vector_store %arg8[%c0_61, %c0_62, %c0_63], %103 {strides = array<i32>} : memref<1x32x384xf32, #tpu.memory_space<vmem>>, vector<1x32x384xf32>,
    return
  }
  func.func @transform_0(%arg0: i32) -> (i32, i32, i32) {
    %c0_i32 = arith.constant 0 : i32
    %c0_i32_0 = arith.constant 0 : i32
    %c0_i32_1 = arith.constant 0 : i32
    return %arg0, %c0_i32, %c0_i32_0 : i32, i32, i32
  }
  func.func @transform_1(%arg0: i32) -> (i32, i32) {
    %c0_i32 = arith.constant 0 : i32
    %c0_i32_0 = arith.constant 0 : i32
    %c0_i32_1 = arith.constant 0 : i32
    return %c0_i32, %c0_i32_0 : i32, i32
  }
  func.func @transform_2(%arg0: i32) -> (i32, i32) {
    %c0_i32 = arith.constant 0 : i32
    %c0_i32_0 = arith.constant 0 : i32
    %c0_i32_1 = arith.constant 0 : i32
    return %c0_i32, %c0_i32_0 : i32, i32
  }
  func.func @transform_3(%arg0: i32) -> (i32, i32) {
    %c0_i32 = arith.constant 0 : i32
    %c0_i32_0 = arith.constant 0 : i32
    %c0_i32_1 = arith.constant 0 : i32
    return %c0_i32, %c0_i32_0 : i32, i32
  }
  func.func @transform_4(%arg0: i32) -> (i32, i32) {
    %c0_i32 = arith.constant 0 : i32
    %c0_i32_0 = arith.constant 0 : i32
    %c0_i32_1 = arith.constant 0 : i32
    return %c0_i32, %c0_i32_0 : i32, i32
  }
  func.func @transform_5(%arg0: i32) -> (i32, i32) {
    %c0_i32 = arith.constant 0 : i32
    %c0_i32_0 = arith.constant 0 : i32
    %c0_i32_1 = arith.constant 0 : i32
    return %c0_i32, %c0_i32_0 : i32, i32
  }
  func.func @transform_6(%arg0: i32) -> (i32, i32) {
    %c0_i32 = arith.constant 0 : i32
    %c0_i32_0 = arith.constant 0 : i32
    %c0_i32_1 = arith.constant 0 : i32
    return %c0_i32, %c0_i32_0 : i32, i32
  }
  func.func @transform_7(%arg0: i32) -> (i32, i32, i32) {
    %c0_i32 = arith.constant 0 : i32
    %c0_i32_0 = arith.constant 0 : i32
    %c0_i32_1 = arith.constant 0 : i32
    return %arg0, %c0_i32, %c0_i32_0 : i32, i32, i32
  }
}

</mosaic_0001>

<bundles_post_ra>
// kernel: residual_block_forward.1
= control target key start
LH: loop header
LB: loop body
LE: loop exit
PB: predicated region body
PF: predicated region fallthrough
CT: control target
= control target key end

     0   :  { %s4061_s26 = smov 0   ;;  %s5482_s0 = inlined_call_operand.vmem [shape: f32[2,32,384], index: 0, kind: input, shape index: {}]   ;;  %s5483_s1 = inlined_call_operand.vmem [shape: bf16[32,288], index: 1, kind: input, shape index: {}]   ;;  %s5484_s2 = inlined_call_operand.vmem [shape: f32[32,1], index: 2, kind: input, shape index: {}]   ;;  %s5485_s3 = inlined_call_operand.vmem [shape: bf16[32,288], index: 3, kind: input, shape index: {}]   ;;  %s5486_s4 = inlined_call_operand.vmem [shape: f32[32,1], index: 4, kind: input, shape index: {}]   ;;  %s5487_s5 = inlined_call_operand.<no memory space> [shape: f32[1,1], index: 5, kind: input, shape index: {}]   ;;  %s5488_s6 = inlined_call_operand.vmem [shape: s32[2,384], index: 6, kind: input, shape index: {}]   ;;  %s5489_s7 = inlined_call_operand.vmem [shape: f32[2,32,384], index: 7, kind: output, shape index: {}]  }
   0x1   :  { %12 = sst [smem:[#allocation3]] %s5487_s5 }
   0x2 LB: > { %s2726_s27 = sadd.s32 4294967295, %s4003_s26   ;;  %p2730_p0 = scmp.ge.s32.totalorder %s4003_s26, 1  ;;  %s4003_s26 = sphi %s4061_s26, %s18_s26  }
   0x3   : > { %p238_p1 = scmp.lt.s32.totalorder %s4003_s26, 3 }
   0x5   : > { %p239_p2 = pnand %p2730_p0, %p238_p1 }
   0x6   : > { %p270_p3 = scmp.lt.s32.totalorder (!%p239_p2), %s2726_s27, 1  ;;  %s4005_s8 = smov (!%p239_p2), 19  }
   0x7   : > { %242 = sbr.rel (%p239_p2) target bundleno = 1441 (0x5a1), region = 48  ;;  %s4006_s9 = smov (!%p239_p2), 109  }
   0x8   : > { %s4007_s10 = smov (!%p239_p2), 1   ;;  %s4008_s11 = smov (!%p239_p2), 110  }
   0x9   : > { %s4009_s12 = smov (!%p239_p2), 17   ;;  %s4010_s13 = smov (!%p239_p2), 111  }
   0xa   : > { %s4011_s14 = smov (!%p239_p2), 18   ;;  %s4012_s15 = smov (!%p239_p2), 127  }
   0xb   : > { %s1335_s24 = sld [smem:[#allocation3]] (!%p239_p2)  ;;  %s4014_s25 = smov (!%p239_p2), 92  }
   0xc   : > { %s5515_s27 = smov (!%p270_p3, %s2726_s27), 1  ;;  %v317_v20 = vlaneseq  ;;  %vm1157_vm6 = vcmask 261120   ;;  %s4015_s16 = smov 36  }
   0xd   : > { %s3356_s5 = smul.u32 96, %s5515_s27  ;;  %s4016_s17 = smov 126  }
   0xe   : > { %v4183_v22 = vand.u32 127, %v317_v20  ;;  %s4017_s20 = smov 2  }
   0xf   : > { %s4077_s30 = scalar_lea.vmem %s5482_s0, %s3356_s5  ;;  %s5437_s29 = scalar_lea.vmem %s5489_s7, %s3356_s5 }
  0x10   : > { %v4080_v0 = vld [vmem:[%s4077_s30 + $0x8] sm:$0xff]  ;;  %v4083_v1 = vld [vmem:[%s4077_s30 + $0x20] sm:$0xff]  ;;  %v4093_v4 = vld [vmem:[%s4077_s30 + $0x18] sm:$0xff]  ;;  %vm319_vm0 = vcmp.lt.s32.totalorder %v4183_v22, 19  ;;  %vm706_vm1 = vcmp.lt.s32.totalorder %v4183_v22, 109  ;;  %vm478_vm2 = vcmp.lt.s32.totalorder %v4183_v22, 1 }
  0x11   : > { %v4086_v2 = vld [vmem:[%s4077_s30] sm:$0xff]  ;;  %v4090_v3 = vpack.i.bf16 %v4083_v1, %v4080_v0  ;;  %v283_v6 = vld [vmem:[%s4077_s30 + $0x10] sm:$0xff]  ;;  %v286_v7 = vld [vmem:[%s4077_s30 + $0x28] sm:$0xff]  ;;  %vm653_vm3 = vcmp.lt.s32.totalorder %v4183_v22, 110  ;;  %vm425_vm4 = vcmp.lt.s32.totalorder %v4183_v22, 17  ;;  %vm600_vm5 = vcmp.lt.s32.totalorder %v4183_v22, 111 }
  0x12   : > { %v4097_v5 = vpack.i.bf16 %v4093_v4, %v4086_v2  ;;  %v4106_v8 = vld [vmem:[%s4077_s30 + $0x38] sm:$0xff]  ;;  %v4109_v9 = vld [vmem:[%s4077_s30 + $0x50] sm:$0xff]  ;;  %v4111_v10 = vpack.i.bf16 %v286_v7, %v283_v6  ;;  %v4117_v12 = vld [vmem:[%s4077_s30 + $0x48] sm:$0xff]  ;;  %vm372_vm7 = vcmp.lt.s32.totalorder %v4183_v22, 18  ;;  %vm547_vm8 = vcmp.lt.s32.totalorder %v4183_v22, 127 }
  0x13   : > { %3389 = vrot.lane.b32.xlu1 %v4090_v3, %s4005_s8  ;;  %v4114_v11 = vld [vmem:[%s4077_s30 + $0x30] sm:$0xff]  ;;  %v3393_v13 = vpack.i.bf16 %v4109_v9, %v4106_v8  ;;  %v289_v14 = vld [vmem:[%s4077_s30 + $0x40] sm:$0xff]  ;;  %v292_v15 = vld [vmem:[%s4077_s30 + $0x58] sm:$0xff] }
  0x14   : > { %3379 = vrot.lane.b32.xlu0 %v4097_v5, %s4005_s8  ;;  %3399 = vrot.lane.b32.xlu2 %v4111_v10, %s4005_s8  ;;  %v3383_v16 = vpack.i.bf16 %v4117_v12, %v4114_v11  ;;  %v3403_v17 = vpack.i.bf16 %v292_v15, %v289_v14 }
  0x1b   : > { %3394 = vrot.lane.b32.xlu1 %v3393_v13, %s4005_s8 }
  0x1c   : > { %3384 = vrot.lane.b32.xlu0 %v3383_v16, %s4005_s8  ;;  %3404 = vrot.lane.b32.xlu2 %v3403_v17, %s4005_s8 }
  0x23   : > { %3414 = vrot.lane.b32.xlu1 %v3393_v13, %s4006_s9 }
  0x24   : > { %3409 = vrot.lane.b32.xlu0 %v3383_v16, %s4006_s9  ;;  %3419 = vrot.lane.b32.xlu2 %v3403_v17, %s4006_s9 }
  0x2b   : > { %3429 = vrot.lane.b32.xlu1 %v4090_v3, %s4006_s9 }
  0x2c   : > { %3424 = vrot.lane.b32.xlu0 %v4097_v5, %s4006_s9  ;;  %3434 = vrot.lane.b32.xlu2 %v4111_v10, %s4006_s9 }
  0x33   : > { %3444 = vrot.lane.b32.xlu1 %v3393_v13, %s4007_s10 }
  0x34   : > { %3439 = vrot.lane.b32.xlu0 %v3383_v16, %s4007_s10  ;;  %3449 = vrot.lane.b32.xlu2 %v3403_v17, %s4007_s10 }
  0x3b   : > { %3459 = vrot.lane.b32.xlu1 %v3393_v13, %s4008_s11 }
  0x3c   : > { %3454 = vrot.lane.b32.xlu0 %v3383_v16, %s4008_s11  ;;  %3464 = vrot.lane.b32.xlu2 %v3403_v17, %s4008_s11 }
  0x43   : > { %3474 = vrot.lane.b32.xlu1 %v4090_v3, %s4007_s10 }
  0x44   : > { %3469 = vrot.lane.b32.xlu0 %v4097_v5, %s4007_s10  ;;  %3479 = vrot.lane.b32.xlu2 %v4111_v10, %s4007_s10 }
  0x4b   : > { %3489 = vrot.lane.b32.xlu1 %v4090_v3, %s4008_s11 }
  0x4c   : > { %3484 = vrot.lane.b32.xlu0 %v4097_v5, %s4008_s11  ;;  %3494 = vrot.lane.b32.xlu2 %v4111_v10, %s4008_s11 }
  0x53   : > { %3504 = vrot.lane.b32.xlu1 %v3393_v13, %s4009_s12 }
  0x54   : > { %3499 = vrot.lane.b32.xlu0 %v3383_v16, %s4009_s12  ;;  %3509 = vrot.lane.b32.xlu2 %v3403_v17, %s4009_s12 }
  0x5b   : > { %3519 = vrot.lane.b32.xlu1 %v3393_v13, %s4010_s13 }
  0x5c   : > { %3514 = vrot.lane.b32.xlu0 %v3383_v16, %s4010_s13  ;;  %3524 = vrot.lane.b32.xlu2 %v3403_v17, %s4010_s13 }
  0x63   : > { %3534 = vrot.lane.b32.xlu1 %v4090_v3, %s4009_s12 }
  0x64   : > { %3529 = vrot.lane.b32.xlu0 %v4097_v5, %s4009_s12  ;;  %3539 = vrot.lane.b32.xlu2 %v4111_v10, %s4009_s12 }
  0x6b   : > { %3549 = vrot.lane.b32.xlu1 %v4090_v3, %s4010_s13 }
  0x6c   : > { %3544 = vrot.lane.b32.xlu0 %v4097_v5, %s4010_s13  ;;  %3554 = vrot.lane.b32.xlu2 %v4111_v10, %s4010_s13 }
  0x6e   : > { %v3400_v18 = vpop.permute.xlu2 %3399 }
  0x6f   : > { %v3402_v23 = vunpack.i.h.bf16 %v3400_v18  ;;  %v3401_v24 = vunpack.i.l.bf16 %v3400_v18 }
  0x73   : > { %3564 = vrot.lane.b32.xlu1 %v3393_v13, %s4011_s14 }
  0x74   : > { %3559 = vrot.lane.b32.xlu0 %v3383_v16, %s4011_s14  ;;  %3569 = vrot.lane.b32.xlu2 %v3403_v17, %s4011_s14 }
  0x76   : > { %v3405_v19 = vpop.permute.xlu2 %3404 }
  0x77   : > { %v3407_v42 = vunpack.i.h.bf16 %v3405_v19  ;;  %v3406_v43 = vunpack.i.l.bf16 %v3405_v19 }
  0x7b   : > { %3579 = vrot.lane.b32.xlu1 %v3393_v13, %s4012_s15 }
  0x7c   : > { %3574 = vrot.lane.b32.xlu0 %v3383_v16, %s4012_s15  ;;  %3584 = vrot.lane.b32.xlu2 %v3403_v17, %s4012_s15 }
  0x7e   : > { %v4181_v21 = vpop.permute.xlu2 %3419 }
  0x7f   : > { %v3422_v61 = vunpack.i.h.bf16 %v4181_v21  ;;  %v3421_v62 = vunpack.i.l.bf16 %v4181_v21 }
  0x83   : > { %3594 = vrot.lane.b32.xlu1 %v4090_v3, %s4011_s14 }
  0x84   : > { %3589 = vrot.lane.b32.xlu0 %v4097_v5, %s4011_s14  ;;  %3599 = vrot.lane.b32.xlu2 %v4111_v10, %s4011_s14 }
  0x85   : > { %v3390_v25 = vpop.permute.xlu1 %3389 }
  0x86   : > { %v3392_v26 = vunpack.i.h.bf16 %v3390_v25  ;;  %v3391_v27 = vunpack.i.l.bf16 %v3390_v25  ;;  %v3380_v28 = vpop.permute.xlu0 %3379  ;;  %v4196_v33 = vpop.permute.xlu2 %3434 }
  0x87   : > { %v3382_v29 = vunpack.i.h.bf16 %v3380_v28  ;;  %v3381_v30 = vunpack.i.l.bf16 %v3380_v28  ;;  %v3437_v25 = vunpack.i.h.bf16 %v4196_v33 }
  0x88   : > { %v321_v31 = vsel %vm319_vm0, %v3392_v26, %v3402_v23  ;;  %v320_v32 = vsel %vm319_vm0, %v3391_v27, %v3401_v24 }
  0x89   : > { %v335_v34 = vpack.c.bf16 %v321_v31, %v321_v31  ;;  %v333_v35 = vpack.c.bf16 %v320_v32, %v320_v32  ;;  %v325_v36 = vsel %vm319_vm0, %v3382_v29, %v3392_v26  ;;  %v329_v37 = vsel %vm319_vm0, %v3402_v23, %v3382_v29 }
  0x8a   : > { %v334_v38 = vpack.c.bf16 %v325_v36, %v329_v37  ;;  %v324_v39 = vsel %vm319_vm0, %v3381_v30, %v3391_v27  ;;  %v328_v40 = vsel %vm319_vm0, %v3401_v24, %v3381_v30  ;;  %v3436_v26 = vunpack.i.l.bf16 %v4196_v33 }
  0x8b   : > { %343 = vst [vmem:[#allocation2 + $0x14] sm:$0xf] %v335_v34  ;;  %v332_v41 = vpack.c.bf16 %v324_v39, %v328_v40  ;;  %3609 = vrot.lane.b32.xlu1 %v4090_v3, %s4012_s15 }
  0x8c   : > { %341 = vst [vmem:[#allocation2 + $0x8] sm:$0xf] %v333_v35  ;;  %3604 = vrot.lane.b32.xlu0 %v4097_v5, %s4012_s15  ;;  %3614 = vrot.lane.b32.xlu2 %v4111_v10, %s4012_s15 }
  0x8d   : > { %342 = vst [vmem:[#allocation2 + $0xc] sm:$0xff] %v334_v38  ;;  %v3395_v44 = vpop.permute.xlu1 %3394 }
  0x8e   : > { %340 = vst [vmem:[#allocation2] sm:$0xff] %v332_v41  ;;  %v3397_v45 = vunpack.i.h.bf16 %v3395_v44  ;;  %v3396_v46 = vunpack.i.l.bf16 %v3395_v44  ;;  %v3385_v47 = vpop.permute.xlu0 %3384  ;;  %v4216_v52 = vpop.permute.xlu2 %3449 }
  0x8f   : > { %v3387_v48 = vunpack.i.h.bf16 %v3385_v47  ;;  %v3386_v49 = vunpack.i.l.bf16 %v3385_v47 }
  0x90   : > { %v323_v50 = vsel %vm319_vm0, %v3397_v45, %v3407_v42  ;;  %v322_v51 = vsel %vm319_vm0, %v3396_v46, %v3406_v43 }
  0x91   : > { %v339_v53 = vpack.c.bf16 %v323_v50, %v323_v50  ;;  %v337_v54 = vpack.c.bf16 %v322_v51, %v322_v51  ;;  %v327_v55 = vsel %vm319_vm0, %v3387_v48, %v3397_v45  ;;  %v331_v56 = vsel %vm319_vm0, %v3407_v42, %v3387_v48 }
  0x92   : > { %v338_v57 = vpack.c.bf16 %v327_v55, %v331_v56  ;;  %v326_v58 = vsel %vm319_vm0, %v3386_v49, %v3396_v46  ;;  %v330_v59 = vsel %vm319_vm0, %v3406_v43, %v3386_v49  ;;  %v3452_v45 = vunpack.i.h.bf16 %v4216_v52 }
  0x93   : > { %347 = vst [vmem:[#allocation2 + $0x2c] sm:$0xf] %v339_v53  ;;  %v336_v60 = vpack.c.bf16 %v326_v58, %v330_v59  ;;  %v3451_v46 = vunpack.i.l.bf16 %v4216_v52 }
  0x94   : > { %345 = vst [vmem:[#allocation2 + $0x20] sm:$0xf] %v337_v54 }
  0x95   : > { %346 = vst [vmem:[#allocation2 + $0x24] sm:$0xff] %v338_v57  ;;  %v3415_v63 = vpop.permute.xlu1 %3414 }
  0x96   : > { %344 = vst [vmem:[#allocation2 + $0x18] sm:$0xff] %v336_v60  ;;  %v3417_v3 = vunpack.i.h.bf16 %v3415_v63  ;;  %v3416_v5 = vunpack.i.l.bf16 %v3415_v63  ;;  %v3410_v6 = vpop.permute.xlu0 %3409  ;;  %v4233_v15 = vpop.permute.xlu2 %3464 }
  0x97   : > { %v3412_v7 = vunpack.i.h.bf16 %v3410_v6  ;;  %v3411_v10 = vunpack.i.l.bf16 %v3410_v6 }
  0x98   : > { %v710_v13 = vsel %vm706_vm1, %v3417_v3, %v3422_v61  ;;  %v709_v14 = vsel %vm706_vm1, %v3416_v5, %v3421_v62 }
  0x99   : > { %v714_v16 = vsel %vm706_vm1, %v3412_v7, %v3417_v3  ;;  %v718_v17 = vsel %vm706_vm1, %v3422_v61, %v3412_v7  ;;  %v713_v18 = vsel %vm706_vm1, %v3411_v10, %v3416_v5  ;;  %v717_v19 = vsel %vm706_vm1, %v3421_v62, %v3411_v10 }
  0x9a   : > { %v725_v20 = vpack.c.bf16 %v710_v13, %v714_v16  ;;  %v726_v21 = vpack.c.bf16 %v718_v17, %v718_v17  ;;  %v723_v23 = vpack.c.bf16 %v709_v14, %v713_v18  ;;  %v724_v24 = vpack.c.bf16 %v717_v19, %v717_v19 }
  0x9b   : > { %v3467_v7 = vunpack.i.h.bf16 %v4233_v15  ;;  %v3466_v10 = vunpack.i.l.bf16 %v4233_v15 }
  0x9c   : > { %733 = vst [vmem:[#allocation2 + $0x1a4] sm:$0xff] %v725_v20 }
  0x9d   : > { %734 = vst [vmem:[#allocation2 + $0x1ac] sm:$0xf] %v726_v21  ;;  %v3430_v27 = vpop.permute.xlu1 %3429 }
  0x9e   : > { %731 = vst [vmem:[#allocation2 + $0x198] sm:$0xff] %v723_v23  ;;  %v3432_v28 = vunpack.i.h.bf16 %v3430_v27  ;;  %v3431_v29 = vunpack.i.l.bf16 %v3430_v27  ;;  %v3425_v30 = vpop.permute.xlu0 %3424  ;;  %v4249_v36 = vpop.permute.xlu2 %3479 }
  0x9f   : > { %732 = vst [vmem:[#allocation2 + $0x1a0] sm:$0xf] %v724_v24  ;;  %v3427_v31 = vunpack.i.h.bf16 %v3425_v30  ;;  %v3426_v32 = vunpack.i.l.bf16 %v3425_v30 }
  0xa0   : > { %v708_v34 = vsel %vm706_vm1, %v3432_v28, %v3437_v25  ;;  %v707_v35 = vsel %vm706_vm1, %v3431_v29, %v3436_v26 }
  0xa1   : > { %v712_v33 = vsel %vm706_vm1, %v3427_v31, %v3432_v28  ;;  %v716_v37 = vsel %vm706_vm1, %v3437_v25, %v3427_v31  ;;  %v711_v38 = vsel %vm706_vm1, %v3426_v32, %v3431_v29  ;;  %v715_v39 = vsel %vm706_vm1, %v3436_v26, %v3426_v32 }
  0xa2   : > { %v721_v40 = vpack.c.bf16 %v708_v34, %v712_v33  ;;  %v722_v41 = vpack.c.bf16 %v716_v37, %v716_v37  ;;  %v719_v42 = vpack.c.bf16 %v707_v35, %v711_v38  ;;  %v720_v43 = vpack.c.bf16 %v715_v39, %v715_v39 }
  0xa3   : > { %v3286_v44 = vld [vmem:[#allocation2 + $0x1a0] sm:$0xf0]  ;;  %v3482_v34 = vunpack.i.h.bf16 %v4249_v36  ;;  %v3481_v35 = vunpack.i.l.bf16 %v4249_v36 }
  0xa4   : > { %729 = vst [vmem:[#allocation2 + $0x18c] sm:$0xff] %v721_v40 }
  0xa5   : > { %730 = vst [vmem:[#allocation2 + $0x194] sm:$0xf] %v722_v41  ;;  %v3445_v47 = vpop.permute.xlu1 %3444  ;;  %v2963_v48 = vld [vmem:[#allocation2 + $0x198] sm:$0xf] }
  0xa6   : > { %727 = vst [vmem:[#allocation2 + $0x180] sm:$0xff] %v719_v42  ;;  %v3447_v49 = vunpack.i.h.bf16 %v3445_v47  ;;  %v3446_v50 = vunpack.i.l.bf16 %v3445_v47  ;;  %v3440_v51 = vpop.permute.xlu0 %3439  ;;  %v2964_v53 = vor.u32 %v3286_v44, %v2963_v48  ;;  %v4270_v61 = vpop.permute.xlu2 %3494 }
  0xa7   : > { %728 = vst [vmem:[#allocation2 + $0x188] sm:$0xf] %v720_v43  ;;  %v3442_v54 = vunpack.i.h.bf16 %v3440_v51  ;;  %v3441_v55 = vunpack.i.l.bf16 %v3440_v51 }
  0xa8   : > { %v482_v56 = vsel %vm478_vm2, %v3447_v49, %v3452_v45  ;;  %v481_v57 = vsel %vm478_vm2, %v3446_v50, %v3451_v46  ;;  %1208 = vmatpush.bf16.msra.mxu2 %v2964_v53 }
  0xa9   : > { %v498_v52 = vpack.c.bf16 %v482_v56, %v482_v56  ;;  %v496_v58 = vpack.c.bf16 %v481_v57, %v481_v57  ;;  %v486_v59 = vsel %vm478_vm2, %v3442_v54, %v3447_v49  ;;  %v490_v60 = vsel %vm478_vm2, %v3452_v45, %v3442_v54 }
  0xaa   : > { %v497_v62 = vpack.c.bf16 %v486_v59, %v490_v60  ;;  %v485_v63 = vsel %vm478_vm2, %v3441_v55, %v3446_v50  ;;  %v489_v3 = vsel %vm478_vm2, %v3451_v46, %v3441_v55  ;;  %v3497_v59 = vunpack.i.h.bf16 %v4270_v61 }
  0xab   : > { %506 = vst [vmem:[#allocation2 + $0xbc] sm:$0xf] %v498_v52  ;;  %v495_v5 = vpack.c.bf16 %v485_v63, %v489_v3  ;;  %v3283_v6 = vld [vmem:[#allocation2 + $0x188] sm:$0xf0]  ;;  %v3496_v60 = vunpack.i.l.bf16 %v4270_v61 }
  0xac   : > { %504 = vst [vmem:[#allocation2 + $0xb0] sm:$0xf] %v496_v58 }
  0xad   : > { %505 = vst [vmem:[#allocation2 + $0xb4] sm:$0xff] %v497_v62  ;;  %v3460_v13 = vpop.permute.xlu1 %3459  ;;  %v2951_v14 = vld [vmem:[#allocation2 + $0x180] sm:$0xf] }
  0xae   : > { %503 = vst [vmem:[#allocation2 + $0xa8] sm:$0xff] %v495_v5  ;;  %v3462_v16 = vunpack.i.h.bf16 %v3460_v13  ;;  %v3461_v17 = vunpack.i.l.bf16 %v3460_v13  ;;  %v3455_v18 = vpop.permute.xlu0 %3454  ;;  %v2952_v19 = vor.u32 %v3283_v6, %v2951_v14  ;;  %v4291_v32 = vpop.permute.xlu2 %3509 }
  0xaf   : > { %v3457_v20 = vunpack.i.h.bf16 %v3455_v18  ;;  %v3456_v21 = vunpack.i.l.bf16 %v3455_v18 }
  0xb0   : > { %v657_v23 = vsel %vm653_vm3, %v3462_v16, %v3467_v7  ;;  %v656_v24 = vsel %vm653_vm3, %v3461_v17, %v3466_v10  ;;  %1209 = vmatpush.bf16.msra.mxu2 %v2952_v19 }
  0xb1   : > { %v661_v15 = vsel %vm653_vm3, %v3457_v20, %v3462_v16  ;;  %v665_v25 = vsel %vm653_vm3, %v3467_v7, %v3457_v20  ;;  %v660_v26 = vsel %vm653_vm3, %v3456_v21, %v3461_v17  ;;  %v664_v27 = vsel %vm653_vm3, %v3466_v10, %v3456_v21 }
  0xb2   : > { %v672_v28 = vpack.c.bf16 %v657_v23, %v661_v15  ;;  %v673_v29 = vpack.c.bf16 %v665_v25, %v665_v25  ;;  %v670_v30 = vpack.c.bf16 %v656_v24, %v660_v26  ;;  %v671_v31 = vpack.c.bf16 %v664_v27, %v664_v27 }
  0xb3   : > { %v3512_v27 = vunpack.i.h.bf16 %v4291_v32 }
  0xb4   : > { %680 = vst [vmem:[#allocation2 + $0x174] sm:$0xff] %v672_v28  ;;  %v3256_v33 = vld [vmem:[#allocation2 + $0xb0] sm:$0xf0]  ;;  %v2845_v37 = vld [vmem:[#allocation2 + $0xb4] sm:$0xf0]  ;;  %v3511_v28 = vunpack.i.l.bf16 %v4291_v32 }
  0xb5   : > { %681 = vst [vmem:[#allocation2 + $0x17c] sm:$0xf] %v673_v29  ;;  %v3475_v38 = vpop.permute.xlu1 %3474  ;;  %v2843_v39 = vld [vmem:[#allocation2 + $0xa8] sm:$0xf]  ;;  %v3255_v40 = vld [vmem:[#allocation2 + $0xac] sm:$0xf] }
  0xb6   : > { %678 = vst [vmem:[#allocation2 + $0x168] sm:$0xff] %v670_v30  ;;  %v3477_v41 = vunpack.i.h.bf16 %v3475_v38  ;;  %v3476_v42 = vunpack.i.l.bf16 %v3475_v38  ;;  %v3470_v43 = vpop.permute.xlu0 %3469  ;;  %v2844_v44 = vor.u32 %v3256_v33, %v2843_v39  ;;  %v2848_v45 = vor.u32 %v3255_v40, %v2845_v37  ;;  %v4309_v5 = vpop.permute.xlu2 %3524 }
  0xb7   : > { %679 = vst [vmem:[#allocation2 + $0x170] sm:$0xf] %v671_v31  ;;  %v3472_v46 = vunpack.i.h.bf16 %v3470_v43  ;;  %v3471_v47 = vunpack.i.l.bf16 %v3470_v43 }
  0xb8   : > { %v480_v48 = vsel %vm478_vm2, %v3477_v41, %v3482_v34  ;;  %v479_v36 = vsel %vm478_vm2, %v3476_v42, %v3481_v35  ;;  %1164 = vmatpush.bf16.msra.mxu0 %v2844_v44  ;;  %1221 = vmatpush.bf16.msra.mxu3 %v2848_v45 }
  0xb9   : > { %v494_v49 = vpack.c.bf16 %v480_v48, %v480_v48  ;;  %v492_v50 = vpack.c.bf16 %v479_v36, %v479_v36  ;;  %v484_v51 = vsel %vm478_vm2, %v3472_v46, %v3477_v41  ;;  %v488_v53 = vsel %vm478_vm2, %v3482_v34, %v3472_v46 }
  0xba   : > { %v493_v54 = vpack.c.bf16 %v484_v51, %v488_v53  ;;  %v483_v55 = vsel %vm478_vm2, %v3471_v47, %v3476_v42  ;;  %v487_v56 = vsel %vm478_vm2, %v3481_v35, %v3471_v47 }
  0xbb   : > { %502 = vst [vmem:[#allocation2 + $0xa4] sm:$0xf] %v494_v49  ;;  %v491_v57 = vpack.c.bf16 %v483_v55, %v487_v56  ;;  %v3280_v52 = vld [vmem:[#allocation2 + $0x170] sm:$0xf0]  ;;  %v2941_v58 = vld [vmem:[#allocation2 + $0x174] sm:$0xf0]  ;;  %v3527_v55 = vunpack.i.h.bf16 %v4309_v5  ;;  %v3526_v56 = vunpack.i.l.bf16 %v4309_v5 }
  0xbc   : > { %500 = vst [vmem:[#allocation2 + $0x98] sm:$0xf] %v492_v50 }
  0xbd   : > { %501 = vst [vmem:[#allocation2 + $0x9c] sm:$0xff] %v493_v54  ;;  %v3490_v62 = vpop.permute.xlu1 %3489  ;;  %v2939_v63 = vld [vmem:[#allocation2 + $0x168] sm:$0xf]  ;;  %v3279_v3 = vld [vmem:[#allocation2 + $0x16c] sm:$0xf] }
  0xbe   : > { %499 = vst [vmem:[#allocation2 + $0x90] sm:$0xff] %v491_v57  ;;  %v3492_v6 = vunpack.i.h.bf16 %v3490_v62  ;;  %v3491_v7 = vunpack.i.l.bf16 %v3490_v62  ;;  %v3485_v10 = vpop.permute.xlu0 %3484  ;;  %v2940_v13 = vor.u32 %v3280_v52, %v2939_v63  ;;  %v2944_v14 = vor.u32 %v3279_v3, %v2941_v58  ;;  %v4326_v43 = vpop.permute.xlu2 %3539 }
  0xbf   : > { %v3487_v16 = vunpack.i.h.bf16 %v3485_v10  ;;  %v3486_v17 = vunpack.i.l.bf16 %v3485_v10 }
  0xc0   : > { %v655_v18 = vsel %vm653_vm3, %v3492_v6, %v3497_v59  ;;  %v654_v61 = vsel %vm653_vm3, %v3491_v7, %v3496_v60  ;;  %1183 = vmatpush.bf16.msra.mxu1 %v2940_v13  ;;  %1240 = vmatpush.bf16.msrb.mxu2 %v2944_v14 }
  0xc1   : > { %v659_v19 = vsel %vm653_vm3, %v3487_v16, %v3492_v6  ;;  %v663_v20 = vsel %vm653_vm3, %v3497_v59, %v3487_v16  ;;  %v658_v21 = vsel %vm653_vm3, %v3486_v17, %v3491_v7  ;;  %v662_v23 = vsel %vm653_vm3, %v3496_v60, %v3486_v17 }
  0xc2   : > { %v668_v24 = vpack.c.bf16 %v655_v18, %v659_v19  ;;  %v669_v15 = vpack.c.bf16 %v663_v20, %v663_v20  ;;  %v666_v25 = vpack.c.bf16 %v654_v61, %v658_v21  ;;  %v667_v26 = vpack.c.bf16 %v662_v23, %v662_v23 }
  0xc3   : > { %v3542_v23 = vunpack.i.h.bf16 %v4326_v43 }
  0xc4   : > { %676 = vst [vmem:[#allocation2 + $0x15c] sm:$0xff] %v668_v24  ;;  %v3253_v29 = vld [vmem:[#allocation2 + $0x98] sm:$0xf0]  ;;  %v2833_v30 = vld [vmem:[#allocation2 + $0x9c] sm:$0xf0]  ;;  %v3541_v24 = vunpack.i.l.bf16 %v4326_v43 }
  0xc5   : > { %677 = vst [vmem:[#allocation2 + $0x164] sm:$0xf] %v669_v15  ;;  %v3505_v31 = vpop.permute.xlu1 %3504  ;;  %v2831_v34 = vld [vmem:[#allocation2 + $0x90] sm:$0xf]  ;;  %v3252_v35 = vld [vmem:[#allocation2 + $0x94] sm:$0xf] }
  0xc6   : > { %674 = vst [vmem:[#allocation2 + $0x150] sm:$0xff] %v666_v25  ;;  %v3507_v33 = vunpack.i.h.bf16 %v3505_v31  ;;  %v3506_v37 = vunpack.i.l.bf16 %v3505_v31  ;;  %v3500_v38 = vpop.permute.xlu0 %3499  ;;  %v2832_v39 = vor.u32 %v3253_v29, %v2831_v34  ;;  %v2836_v40 = vor.u32 %v3252_v35, %v2833_v30  ;;  %v4355_v18 = vpop.permute.xlu2 %3554 }
  0xc7   : > { %675 = vst [vmem:[#allocation2 + $0x158] sm:$0xf] %v667_v26  ;;  %v3502_v41 = vunpack.i.h.bf16 %v3500_v38  ;;  %v3501_v42 = vunpack.i.l.bf16 %v3500_v38 }
  0xc8   : > { %v429_v32 = vsel %vm425_vm4, %v3507_v33, %v3512_v27  ;;  %v428_v44 = vsel %vm425_vm4, %v3506_v37, %v3511_v28  ;;  %1165 = vmatpush.bf16.msra.mxu0 %v2832_v39  ;;  %1222 = vmatpush.bf16.msra.mxu3 %v2836_v40 }
  0xc9   : > { %v445_v45 = vpack.c.bf16 %v429_v32, %v429_v32  ;;  %v443_v46 = vpack.c.bf16 %v428_v44, %v428_v44  ;;  %v433_v47 = vsel %vm425_vm4, %v3502_v41, %v3507_v33  ;;  %v437_v48 = vsel %vm425_vm4, %v3512_v27, %v3502_v41  ;;  %v2743_v32 = vld [vmem:[%s5483_s1 + $0x8] sm:$0xf]  ;;  %v3230_v44 = vld [vmem:[%s5483_s1 + $0x10] sm:$0xf0] }
  0xca   : > { %v444_v36 = vpack.c.bf16 %v433_v47, %v437_v48  ;;  %v432_v49 = vsel %vm425_vm4, %v3501_v42, %v3506_v37  ;;  %v436_v50 = vsel %vm425_vm4, %v3511_v28, %v3501_v42 }
  0xcb   : > { %453 = vst [vmem:[#allocation2 + $0x8c] sm:$0xf] %v445_v45  ;;  %v442_v51 = vpack.c.bf16 %v432_v49, %v436_v50  ;;  %v3277_v53 = vld [vmem:[#allocation2 + $0x158] sm:$0xf0]  ;;  %v2929_v54 = vld [vmem:[#allocation2 + $0x15c] sm:$0xf0] }
  0xcc   : > { %451 = vst [vmem:[#allocation2 + $0x80] sm:$0xf] %v443_v46 }
  0xcd   : > { %452 = vst [vmem:[#allocation2 + $0x84] sm:$0xff] %v444_v36  ;;  %v3520_v57 = vpop.permute.xlu1 %3519  ;;  %v2927_v52 = vld [vmem:[#allocation2 + $0x150] sm:$0xf]  ;;  %v3276_v58 = vld [vmem:[#allocation2 + $0x154] sm:$0xf] }
  0xce   : > { %450 = vst [vmem:[#allocation2 + $0x78] sm:$0xff] %v442_v51  ;;  %v3522_v59 = vunpack.i.h.bf16 %v3520_v57  ;;  %v3521_v60 = vunpack.i.l.bf16 %v3520_v57  ;;  %v3515_v62 = vpop.permute.xlu0 %3514  ;;  %v2928_v63 = vor.u32 %v3277_v53, %v2927_v52  ;;  %v2932_v3 = vor.u32 %v3276_v58, %v2929_v54  ;;  %v4377_v50 = vpop.permute.xlu2 %3569 }
  0xcf   : > { %v3517_v6 = vunpack.i.h.bf16 %v3515_v62  ;;  %v3516_v7 = vunpack.i.l.bf16 %v3515_v62  ;;  %v4379_v51 = vor.u32 %v3230_v44, %v2743_v32  ;;  %v3557_v53 = vunpack.i.h.bf16 %v4355_v18 }
  0xd0   : > { %v604_v10 = vsel %vm600_vm5, %v3522_v59, %v3527_v55  ;;  %v603_v5 = vsel %vm600_vm5, %v3521_v60, %v3526_v56  ;;  %1184 = vmatpush.bf16.msra.mxu1 %v2928_v63  ;;  %1241 = vmatpush.bf16.msrb.mxu2 %v2932_v3  ;;  %v3556_v54 = vunpack.i.l.bf16 %v4355_v18 }
  0xd1   : > { %v608_v13 = vsel %vm600_vm5, %v3517_v6, %v3522_v59  ;;  %v612_v14 = vsel %vm600_vm5, %v3527_v55, %v3517_v6  ;;  %v607_v16 = vsel %vm600_vm5, %v3516_v7, %v3521_v60  ;;  %v611_v17 = vsel %vm600_vm5, %v3526_v56, %v3516_v7  ;;  %2973 = vmatmul.msk.bf16.vlgmr.msra.gmra.mxu2 %vm1157_vm6, %v4379_v51 }
  0xd2   : > { %v619_v61 = vpack.c.bf16 %v604_v10, %v608_v13  ;;  %v620_v19 = vpack.c.bf16 %v612_v14, %v612_v14  ;;  %v617_v20 = vpack.c.bf16 %v603_v5, %v607_v16  ;;  %v618_v21 = vpack.c.bf16 %v611_v17, %v611_v17 }
  0xd4   : > { %627 = vst [vmem:[#allocation2 + $0x144] sm:$0xff] %v619_v61  ;;  %v3250_v15 = vld [vmem:[#allocation2 + $0x80] sm:$0xf0]  ;;  %v2821_v25 = vld [vmem:[#allocation2 + $0x84] sm:$0xf0] }
  0xd5   : > { %628 = vst [vmem:[#allocation2 + $0x14c] sm:$0xf] %v620_v19  ;;  %v3535_v26 = vpop.permute.xlu1 %3534  ;;  %v2819_v27 = vld [vmem:[#allocation2 + $0x78] sm:$0xf]  ;;  %v3249_v28 = vld [vmem:[#allocation2 + $0x7c] sm:$0xf]  ;;  %v3572_v19 = vunpack.i.h.bf16 %v4377_v50 }
  0xd6   : > { %625 = vst [vmem:[#allocation2 + $0x138] sm:$0xff] %v617_v20  ;;  %v3537_v29 = vunpack.i.h.bf16 %v3535_v26  ;;  %v3536_v30 = vunpack.i.l.bf16 %v3535_v26  ;;  %v3530_v31 = vpop.permute.xlu0 %3529  ;;  %v2820_v34 = vor.u32 %v3250_v15, %v2819_v27  ;;  %v2824_v35 = vor.u32 %v3249_v28, %v2821_v25  ;;  %v3585_v26 = vpop.permute.xlu2 %3584 }
  0xd7   : > { %626 = vst [vmem:[#allocation2 + $0x140] sm:$0xf] %v618_v21  ;;  %v3532_v33 = vunpack.i.h.bf16 %v3530_v31  ;;  %v3531_v37 = vunpack.i.l.bf16 %v3530_v31  ;;  %v3571_v20 = vunpack.i.l.bf16 %v4377_v50  ;;  %v3587_v50 = vunpack.i.h.bf16 %v3585_v26 }
  0xd8   : > { %v427_v38 = vsel %vm425_vm4, %v3537_v29, %v3542_v23  ;;  %v426_v39 = vsel %vm425_vm4, %v3536_v30, %v3541_v24  ;;  %1166 = vmatpush.bf16.msra.mxu0 %v2820_v34  ;;  %1223 = vmatpush.bf16.msra.mxu3 %v2824_v35 }
  0xd9   : > { %v441_v40 = vpack.c.bf16 %v427_v38, %v427_v38  ;;  %v439_v41 = vpack.c.bf16 %v426_v39, %v426_v39  ;;  %v431_v42 = vsel %vm425_vm4, %v3532_v33, %v3537_v29  ;;  %v435_v43 = vsel %vm425_vm4, %v3542_v23, %v3532_v33  ;;  %v2755_v38 = vld [vmem:[%s5483_s1 + $0x20] sm:$0xf]  ;;  %v3233_v39 = vld [vmem:[%s5483_s1 + $0x28] sm:$0xf0] }
  0xda   : > { %v440_v45 = vpack.c.bf16 %v431_v42, %v435_v43  ;;  %v430_v46 = vsel %vm425_vm4, %v3531_v37, %v3536_v30  ;;  %v434_v47 = vsel %vm425_vm4, %v3541_v24, %v3531_v37 }
  0xdb   : > { %449 = vst [vmem:[#allocation2 + $0x74] sm:$0xf] %v441_v40  ;;  %v438_v48 = vpack.c.bf16 %v430_v46, %v434_v47  ;;  %v3274_v36 = vld [vmem:[#allocation2 + $0x140] sm:$0xf0]  ;;  %v2917_v49 = vld [vmem:[#allocation2 + $0x144] sm:$0xf0] }
  0xdc   : > { %447 = vst [vmem:[#allocation2 + $0x68] sm:$0xf] %v439_v41 }
  0xdd   : > { %448 = vst [vmem:[#allocation2 + $0x6c] sm:$0xff] %v440_v45  ;;  %v3550_v55 = vpop.permute.xlu1 %3549  ;;  %v2915_v56 = vld [vmem:[#allocation2 + $0x138] sm:$0xf]  ;;  %v3273_v57 = vld [vmem:[#allocation2 + $0x13c] sm:$0xf] }
  0xde   : > { %446 = vst [vmem:[#allocation2 + $0x60] sm:$0xff] %v438_v48  ;;  %v3552_v52 = vunpack.i.h.bf16 %v3550_v55  ;;  %v3551_v58 = vunpack.i.l.bf16 %v3550_v55  ;;  %v3545_v59 = vpop.permute.xlu0 %3544  ;;  %v2916_v60 = vor.u32 %v3274_v36, %v2915_v56  ;;  %v2920_v62 = vor.u32 %v3273_v57, %v2917_v49 }
  0xdf   : > { %v3547_v63 = vunpack.i.h.bf16 %v3545_v59  ;;  %v3546_v3 = vunpack.i.l.bf16 %v3545_v59  ;;  %v4418_v36 = vor.u32 %v3233_v39, %v2755_v38  ;;  %v511_v49 = vpack.c.bf16 %v4106_v8, %v4114_v11 }
  0xe0   : > { %v602_v6 = vsel %vm600_vm5, %v3552_v52, %v3557_v53  ;;  %v601_v7 = vsel %vm600_vm5, %v3551_v58, %v3556_v54  ;;  %1185 = vmatpush.bf16.msra.mxu1 %v2916_v60  ;;  %1242 = vmatpush.bf16.msrb.mxu2 %v2920_v62  ;;  %v509_v8 = vpack.c.bf16 %v4083_v1, %v4093_v4 }
  0xe1   : > { %v606_v10 = vsel %vm600_vm5, %v3547_v63, %v3552_v52  ;;  %v610_v5 = vsel %vm600_vm5, %v3557_v53, %v3547_v63  ;;  %v605_v13 = vsel %vm600_vm5, %v3546_v3, %v3551_v58  ;;  %v609_v14 = vsel %vm600_vm5, %v3556_v54, %v3546_v3  ;;  %2974 = vmatmul.msk.bf16.gmra.mxu2 %vm1157_vm6, %v4418_v36  ;;  %v3600_v63 = vpop.permute.xlu2 %3599 }
  0xe2   : > { %v615_v16 = vpack.c.bf16 %v602_v6, %v606_v10  ;;  %v616_v17 = vpack.c.bf16 %v610_v5, %v610_v5  ;;  %v613_v18 = vpack.c.bf16 %v601_v7, %v605_v13  ;;  %v614_v61 = vpack.c.bf16 %v609_v14, %v609_v14  ;;  %519 = vst [vmem:[#allocation2 + $0xd8] sm:$0xff] %v511_v49 }
  0xe3   : > { %v3586_v53 = vunpack.i.l.bf16 %v3585_v26  ;;  %v513_v54 = vpack.c.bf16 %v4109_v9, %v4117_v12  ;;  %v507_v52 = vpack.c.bf16 %v4080_v0, %v4086_v2  ;;  %517 = vst [vmem:[#allocation2 + $0xcc] sm:$0xff] %v509_v8  ;;  %v3602_v14 = vunpack.i.h.bf16 %v3600_v63 }
  0xe4   : > { %623 = vst [vmem:[#allocation2 + $0x12c] sm:$0xff] %v615_v16  ;;  %v3247_v21 = vld [vmem:[#allocation2 + $0x68] sm:$0xf0]  ;;  %v2809_v23 = vld [vmem:[#allocation2 + $0x6c] sm:$0xf0]  ;;  %v3601_v16 = vunpack.i.l.bf16 %v3600_v63 }
  0xe5   : > { %624 = vst [vmem:[#allocation2 + $0x134] sm:$0xf] %v616_v17  ;;  %v3565_v24 = vpop.permute.xlu1 %3564  ;;  %v2807_v15 = vld [vmem:[#allocation2 + $0x60] sm:$0xf]  ;;  %v3246_v25 = vld [vmem:[#allocation2 + $0x64] sm:$0xf] }
  0xe6   : > { %621 = vst [vmem:[#allocation2 + $0x120] sm:$0xff] %v613_v18  ;;  %v3567_v27 = vunpack.i.h.bf16 %v3565_v24  ;;  %v3566_v28 = vunpack.i.l.bf16 %v3565_v24  ;;  %v3560_v29 = vpop.permute.xlu0 %3559  ;;  %v2808_v30 = vor.u32 %v3247_v21, %v2807_v15  ;;  %v2812_v31 = vor.u32 %v3246_v25, %v2809_v23 }
  0xe7   : > { %622 = vst [vmem:[#allocation2 + $0x128] sm:$0xf] %v614_v61  ;;  %v3562_v34 = vunpack.i.h.bf16 %v3560_v29  ;;  %v3561_v35 = vunpack.i.l.bf16 %v3560_v29 }
  0xe8   : > { %v376_v33 = vsel %vm372_vm7, %v3567_v27, %v3572_v19  ;;  %v375_v37 = vsel %vm372_vm7, %v3566_v28, %v3571_v20  ;;  %1167 = vmatpush.bf16.msra.mxu0 %v2808_v30  ;;  %1224 = vmatpush.bf16.msra.mxu3 %v2812_v31  ;;  %521 = vst [vmem:[#allocation2 + $0xe4] sm:$0xff] %v513_v54 }
  0xe9   : > { %v392_v40 = vpack.c.bf16 %v376_v33, %v376_v33  ;;  %v390_v41 = vpack.c.bf16 %v375_v37, %v375_v37  ;;  %v380_v42 = vsel %vm372_vm7, %v3562_v34, %v3567_v27  ;;  %v384_v43 = vsel %vm372_vm7, %v3572_v19, %v3562_v34  ;;  %515 = vst [vmem:[#allocation2 + $0xc0] sm:$0xff] %v507_v52  ;;  %v3615_v33 = vpop.permute.xlu2 %3614 }
  0xea   : > { %v391_v32 = vpack.c.bf16 %v380_v42, %v384_v43  ;;  %v379_v44 = vsel %vm372_vm7, %v3561_v35, %v3566_v28  ;;  %v383_v45 = vsel %vm372_vm7, %v3571_v20, %v3561_v35  ;;  %v3617_v43 = vunpack.i.h.bf16 %v3615_v33 }
  0xeb   : > { %400 = vst [vmem:[#allocation2 + $0x5c] sm:$0xf] %v392_v40  ;;  %v389_v46 = vpack.c.bf16 %v379_v44, %v383_v45  ;;  %v3271_v47 = vld [vmem:[#allocation2 + $0x128] sm:$0xf0]  ;;  %v2905_v48 = vld [vmem:[#allocation2 + $0x12c] sm:$0xf0] }
  0xec   : > { %398 = vst [vmem:[#allocation2 + $0x50] sm:$0xf] %v390_v41 }
  0xed   : > { %399 = vst [vmem:[#allocation2 + $0x54] sm:$0xff] %v391_v32  ;;  %v3580_v55 = vpop.permute.xlu1 %3579  ;;  %v2903_v56 = vld [vmem:[#allocation2 + $0x120] sm:$0xf]  ;;  %v3270_v57 = vld [vmem:[#allocation2 + $0x124] sm:$0xf]  ;;  %v3616_v32 = vunpack.i.l.bf16 %v3615_v33 }
  0xee   : > { %397 = vst [vmem:[#allocation2 + $0x48] sm:$0xff] %v389_v46  ;;  %v3582_v11 = vunpack.i.h.bf16 %v3580_v55  ;;  %v3581_v58 = vunpack.i.l.bf16 %v3580_v55  ;;  %v3575_v59 = vpop.permute.xlu0 %3574  ;;  %v2904_v9 = vor.u32 %v3271_v47, %v2903_v56  ;;  %v2908_v12 = vor.u32 %v3270_v57, %v2905_v48  ;;  %v818_v55 = vld [vmem:[%s5484_s2 + $0x18] sm:$0xff]  ;;  %v2965_v33 = vld [vmem:[#allocation2 + $0x1a4] sm:$0xf0] }
  0xef   : > { %v3577_v60 = vunpack.i.h.bf16 %v3575_v59  ;;  %v3576_v62 = vunpack.i.l.bf16 %v3575_v59  ;;  %v4013_v47 = vmov 0  }
  0xf0   : > { %v551_v3 = vsel %vm547_vm8, %v3582_v11, %v3587_v50  ;;  %v550_v6 = vsel %vm547_vm8, %v3581_v58, %v3586_v53  ;;  %1186 = vmatpush.bf16.msra.mxu1 %v2904_v9  ;;  %1243 = vmatpush.bf16.msrb.mxu2 %v2908_v12 }
  0xf1   : > { %v555_v0 = vsel %vm547_vm8, %v3577_v60, %v3582_v11  ;;  %v559_v1 = vsel %vm547_vm8, %v3587_v50, %v3577_v60  ;;  %v554_v2 = vsel %vm547_vm8, %v3576_v62, %v3581_v58  ;;  %v558_v4 = vsel %vm547_vm8, %v3586_v53, %v3576_v62  ;;  %3619 = vset.pattern.permute.xlu1 %v4013_v47 }
  0xf2   : > { %v566_v7 = vpack.c.bf16 %v551_v3, %v555_v0  ;;  %v567_v10 = vpack.c.bf16 %v559_v1, %v559_v1  ;;  %v564_v5 = vpack.c.bf16 %v550_v6, %v554_v2  ;;  %v565_v13 = vpack.c.bf16 %v558_v4, %v558_v4  ;;  %3618 = vset.pattern.permute.xlu0 %v4013_v47  ;;  %v3981_v2 = vld [vmem:[%s4077_s30 + $0x40] sm:$0xff] }
  0xf3   : > { %3620 = vset.pattern.permute.xlu2 %v4013_v47  ;;  %836 = vperm.xlu1 %3619, %v818_v55   ;;  %v512_v4 = vpack.c.bf16 %v3981_v2, %v3981_v2  ;;  %v3228_v2 = vld [vmem:[%s5483_s1 + $0x4] sm:$0xf] }
  0xf4   : > { %574 = vst [vmem:[#allocation2 + $0x114] sm:$0xff] %v566_v7  ;;  %v3244_v17 = vld [vmem:[#allocation2 + $0x50] sm:$0xf0]  ;;  %v2797_v18 = vld [vmem:[#allocation2 + $0x54] sm:$0xf0] }
  0xf5   : > { %575 = vst [vmem:[#allocation2 + $0x11c] sm:$0xf] %v567_v10  ;;  %v3595_v61 = vpop.permute.xlu1 %3594  ;;  %v2795_v19 = vld [vmem:[#allocation2 + $0x48] sm:$0xf]  ;;  %v3243_v20 = vld [vmem:[#allocation2 + $0x4c] sm:$0xf] }
  0xf6   : > { %572 = vst [vmem:[#allocation2 + $0x108] sm:$0xff] %v564_v5  ;;  %v3597_v21 = vunpack.i.h.bf16 %v3595_v61  ;;  %v3596_v23 = vunpack.i.l.bf16 %v3595_v61  ;;  %v3590_v24 = vpop.permute.xlu0 %3589  ;;  %v2796_v15 = vor.u32 %v3244_v17, %v2795_v19  ;;  %v2800_v25 = vor.u32 %v3243_v20, %v2797_v18  ;;  %v3982_v7 = vld [vmem:[%s4077_s30 + $0x58] sm:$0xff]  ;;  %v816_v17 = vld [vmem:[%s5484_s2 + $0x8] sm:$0xff]  ;;  %v2759_v19 = vld [vmem:[#allocation2] sm:$0xf] }
  0xf7   : > { %573 = vst [vmem:[#allocation2 + $0x110] sm:$0xf] %v565_v13  ;;  %v3592_v26 = vunpack.i.h.bf16 %v3590_v24  ;;  %v3591_v27 = vunpack.i.l.bf16 %v3590_v24  ;;  %v514_v10 = vpack.c.bf16 %v3982_v7, %v3982_v7  ;;  %v2771_v18 = vld [vmem:[#allocation2 + $0x18] sm:$0xf]  ;;  %v3237_v61 = vld [vmem:[#allocation2 + $0x1c] sm:$0xf] }
  0xf8   : > { %v374_v28 = vsel %vm372_vm7, %v3597_v21, %v3602_v14  ;;  %v373_v29 = vsel %vm372_vm7, %v3596_v23, %v3601_v16  ;;  %1168 = vmatpush.bf16.msra.mxu0 %v2796_v15  ;;  %1225 = vmatpush.bf16.msra.mxu3 %v2800_v25  ;;  %520 = vst [vmem:[#allocation2 + $0xe0] sm:$0xf] %v512_v4  ;;  %v3235_v20 = vld [vmem:[#allocation2 + $0x8] sm:$0xf0]  ;;  %v2737_v4 = vld [vmem:[%s5483_s1 + $0xc] sm:$0xf0] }
  0xf9   : > { %v388_v30 = vpack.c.bf16 %v374_v28, %v374_v28  ;;  %v386_v31 = vpack.c.bf16 %v373_v29, %v373_v29  ;;  %v378_v34 = vsel %vm372_vm7, %v3592_v26, %v3597_v21  ;;  %v382_v35 = vsel %vm372_vm7, %v3602_v14, %v3592_v26  ;;  %v3238_v14 = vld [vmem:[#allocation2 + $0x20] sm:$0xf0]  ;;  %522 = vst [vmem:[#allocation2 + $0xec] sm:$0xf] %v514_v10  ;;  %v3983_v21 = vld [vmem:[%s4077_s30 + $0x10] sm:$0xff]  ;;  %v3984_v24 = vld [vmem:[%s4077_s30 + $0x28] sm:$0xff] }
  0xfa   : > { %v387_v37 = vpack.c.bf16 %v378_v34, %v382_v35  ;;  %v377_v38 = vsel %vm372_vm7, %v3591_v27, %v3596_v23  ;;  %v381_v39 = vsel %vm372_vm7, %v3601_v16, %v3591_v27  ;;  %v2773_v16 = vld [vmem:[#allocation2 + $0x24] sm:$0xf0]  ;;  %v508_v23 = vpack.c.bf16 %v3983_v21, %v3983_v21  ;;  %v3234_v27 = vld [vmem:[#allocation2 + $0x4] sm:$0xf]  ;;  %v2761_v28 = vld [vmem:[#allocation2 + $0xc] sm:$0xf0] }
  0xfb   : > { %396 = vst [vmem:[#allocation2 + $0x44] sm:$0xf] %v388_v30  ;;  %v385_v40 = vpack.c.bf16 %v377_v38, %v381_v39  ;;  %v3268_v41 = vld [vmem:[#allocation2 + $0x110] sm:$0xf0]  ;;  %v2893_v42 = vld [vmem:[#allocation2 + $0x114] sm:$0xf0]  ;;  %826 = vperm.xlu1 %3619, %v816_v17   ;;  %v510_v15 = vpack.c.bf16 %v3984_v24, %v3984_v24  ;;  %v2772_v25 = vor.u32 %v3238_v14, %v2771_v18 }
  0xfc   : > { %394 = vst [vmem:[#allocation2 + $0x38] sm:$0xf] %v386_v31  ;;  %v2776_v26 = vor.u32 %v3237_v61, %v2773_v16  ;;  %v2735_v29 = vld [vmem:[%s5483_s1] sm:$0xf]  ;;  %v3229_v30 = vld [vmem:[%s5483_s1 + $0x8] sm:$0xf0]  ;;  %v4502_v16 = vor.u32 %v3228_v2, %v2737_v4 }
  0xfd   : > { %395 = vst [vmem:[#allocation2 + $0x3c] sm:$0xff] %v387_v37  ;;  %v3610_v44 = vpop.permute.xlu1 %3609  ;;  %v2891_v45 = vld [vmem:[#allocation2 + $0x108] sm:$0xf]  ;;  %v3267_v46 = vld [vmem:[#allocation2 + $0x10c] sm:$0xf] }
  0xfe   : > { %393 = vst [vmem:[#allocation2 + $0x30] sm:$0xff] %v385_v40  ;;  %v3612_v48 = vunpack.i.h.bf16 %v3610_v44  ;;  %v3611_v49 = vunpack.i.l.bf16 %v3610_v44  ;;  %v3605_v50 = vpop.permute.xlu0 %3604  ;;  %v2892_v53 = vor.u32 %v3268_v41, %v2891_v45  ;;  %v2896_v54 = vor.u32 %v3267_v46, %v2893_v42  ;;  %v3285_v35 = vld [vmem:[#allocation2 + $0x19c] sm:$0xf]  ;;  %v2947_v37 = vld [vmem:[#allocation2 + $0x170] sm:$0xf] }
  0xff   : > { %v3607_v56 = vunpack.i.h.bf16 %v3605_v50  ;;  %v3606_v57 = vunpack.i.l.bf16 %v3605_v50  ;;  %v3281_v38 = vld [vmem:[#allocation2 + $0x178] sm:$0xf0]  ;;  %516 = vst [vmem:[#allocation2 + $0xc8] sm:$0xf] %v508_v23  ;;  %v2867_v39 = vld [vmem:[#allocation2 + $0xd8] sm:$0xf]  ;;  %v4489_v50 = vor.u32 %v3229_v30, %v2735_v29 }
 0x100   : > { %v549_v52 = vsel %vm547_vm8, %v3612_v48, %v3617_v43  ;;  %v548_v8 = vsel %vm547_vm8, %v3611_v49, %v3616_v32  ;;  %1187 = vmatpush.bf16.msra.mxu1 %v2892_v53  ;;  %1244 = vmatpush.bf16.msrb.mxu2 %v2896_v54  ;;  %v3262_v40 = vld [vmem:[#allocation2 + $0xe0] sm:$0xf0]  ;;  %518 = vst [vmem:[#allocation2 + $0xd4] sm:$0xf] %v510_v15  ;;  %v3261_v46 = vld [vmem:[#allocation2 + $0xdc] sm:$0xf] }
 0x101   : > { %v553_v11 = vsel %vm547_vm8, %v3607_v56, %v3612_v48  ;;  %v557_v58 = vsel %vm547_vm8, %v3617_v43, %v3607_v56  ;;  %v552_v59 = vsel %vm547_vm8, %v3606_v57, %v3611_v49  ;;  %v556_v9 = vsel %vm547_vm8, %v3616_v32, %v3606_v57  ;;  %v817_v43 = vld [vmem:[%s5484_s2 + $0x10] sm:$0xff]  ;;  %v2869_v48 = vld [vmem:[#allocation2 + $0xe4] sm:$0xf0]  ;;  %v3282_v56 = vld [vmem:[#allocation2 + $0x184] sm:$0xf] }
 0x102   : > { %v562_v12 = vpack.c.bf16 %v549_v52, %v553_v11  ;;  %v563_v60 = vpack.c.bf16 %v557_v58, %v557_v58  ;;  %v560_v62 = vpack.c.bf16 %v548_v8, %v552_v59  ;;  %v561_v63 = vpack.c.bf16 %v556_v9, %v556_v9  ;;  %831 = vperm.xlu0 %3618, %v817_v43   ;;  %v2953_v57 = vld [vmem:[#allocation2 + $0x18c] sm:$0xf0]  ;;  %v3278_v52 = vld [vmem:[#allocation2 + $0x160] sm:$0xf0]  ;;  %v2935_v11 = vld [vmem:[#allocation2 + $0x158] sm:$0xf] }
 0x103   : > { %v2760_v32 = vor.u32 %v3235_v20, %v2759_v19  ;;  %v2764_v49 = vor.u32 %v3234_v27, %v2761_v28  ;;  %v2968_v53 = vor.u32 %v3285_v35, %v2965_v33  ;;  %v2948_v54 = vor.u32 %v3281_v38, %v2947_v37  ;;  %v2855_v58 = vld [vmem:[#allocation2 + $0xc0] sm:$0xf]  ;;  %v3259_v59 = vld [vmem:[#allocation2 + $0xc8] sm:$0xf0]  ;;  %v3258_v9 = vld [vmem:[#allocation2 + $0xc4] sm:$0xf] }
 0x104   : > { %570 = vst [vmem:[#allocation2 + $0xfc] sm:$0xff] %v562_v12  ;;  %v3241_v3 = vld [vmem:[#allocation2 + $0x38] sm:$0xf0]  ;;  %v2785_v6 = vld [vmem:[#allocation2 + $0x3c] sm:$0xf0]  ;;  %v2868_v55 = vor.u32 %v3262_v40, %v2867_v39  ;;  %v2872_v8 = vor.u32 %v3261_v46, %v2869_v48 }
 0x105   : > { %571 = vst [vmem:[#allocation2 + $0x104] sm:$0xf] %v563_v60  ;;  %v2783_v0 = vld [vmem:[#allocation2 + $0x30] sm:$0xf]  ;;  %v3240_v1 = vld [vmem:[#allocation2 + $0x34] sm:$0xf] }
 0x106   : > { %568 = vst [vmem:[#allocation2 + $0xf0] sm:$0xff] %v560_v62  ;;  %v2784_v5 = vor.u32 %v3241_v3, %v2783_v0  ;;  %v2788_v13 = vor.u32 %v3240_v1, %v2785_v6  ;;  %v2857_v12 = vld [vmem:[#allocation2 + $0xcc] sm:$0xf0]  ;;  %v3257_v60 = vld [vmem:[#allocation2 + $0xb8] sm:$0xf0]  ;;  %v2956_v3 = vor.u32 %v3282_v56, %v2953_v57  ;;  %v2936_v6 = vor.u32 %v3278_v52, %v2935_v11 }
 0x107   : > { %569 = vst [vmem:[#allocation2 + $0xf8] sm:$0xf] %v561_v63  ;;  %v2971_v62 = vld [vmem:[#allocation2 + $0x1a0] sm:$0xf]  ;;  %v3287_v63 = vld [vmem:[#allocation2 + $0x1a8] sm:$0xf0]  ;;  %v2856_v0 = vor.u32 %v3259_v59, %v2855_v58  ;;  %v2860_v7 = vor.u32 %v3258_v9, %v2857_v12 }
 0x108   : > { %1169 = vmatpush.bf16.msra.mxu0 %v2784_v5  ;;  %1226 = vmatpush.bf16.msra.mxu3 %v2788_v13  ;;  %v2851_v1 = vld [vmem:[#allocation2 + $0xb0] sm:$0xf]  ;;  %v2923_v10 = vld [vmem:[#allocation2 + $0x140] sm:$0xf]  ;;  %v3275_v5 = vld [vmem:[#allocation2 + $0x148] sm:$0xf0]  ;;  %v2972_v18 = vor.u32 %v3287_v63, %v2971_v62 }
 0x109   : > { %v815_v13 = vld [vmem:[%s5484_s2] sm:$0xff]  ;;  %v2852_v14 = vor.u32 %v3257_v60, %v2851_v1  ;;  %v2924_v17 = vor.u32 %v3275_v5, %v2923_v10  ;;  %v2839_v61 = vld [vmem:[#allocation2 + $0x98] sm:$0xf]  ;;  %v3284_v20 = vld [vmem:[#allocation2 + $0x190] sm:$0xf0] }
 0x10a   : > { %821 = vperm.xlu2 %3620, %v815_v13   ;;  %v3254_v19 = vld [vmem:[#allocation2 + $0xa0] sm:$0xf0]  ;;  %v2911_v21 = vld [vmem:[#allocation2 + $0x128] sm:$0xf]  ;;  %v3272_v23 = vld [vmem:[#allocation2 + $0x130] sm:$0xf0] }
 0x10b   : > { %v3265_v31 = vld [vmem:[#allocation2 + $0xf8] sm:$0xf0]  ;;  %v2881_v34 = vld [vmem:[#allocation2 + $0xfc] sm:$0xf0]  ;;  %v2959_v24 = vld [vmem:[#allocation2 + $0x188] sm:$0xf]  ;;  %v2840_v15 = vor.u32 %v3254_v19, %v2839_v61  ;;  %v4536_v61 = vstv %s1335_s24 }
 0x10c   : > { %1170 = vmatpush.bf16.msra.mxu0 %v2772_v25  ;;  %1227 = vmatpush.bf16.msra.mxu3 %v2776_v26  ;;  %v3251_v25 = vld [vmem:[#allocation2 + $0x88] sm:$0xf0]  ;;  %v2912_v26 = vor.u32 %v3272_v23, %v2911_v21  ;;  %v2960_v27 = vor.u32 %v3284_v20, %v2959_v24  ;;  %v2827_v28 = vld [vmem:[#allocation2 + $0x80] sm:$0xf]  ;;  %v2747_v29 = vld [vmem:[%s5483_s1 + $0x18] sm:$0xf] }
 0x10d   : > { %v2879_v41 = vld [vmem:[#allocation2 + $0xf0] sm:$0xf]  ;;  %v3264_v42 = vld [vmem:[#allocation2 + $0xf4] sm:$0xf]  ;;  %v3232_v30 = vld [vmem:[%s5483_s1 + $0x20] sm:$0xf0]  ;;  %v2828_v35 = vor.u32 %v3251_v25, %v2827_v28 }
 0x10e   : > { %v2880_v44 = vor.u32 %v3265_v31, %v2879_v41  ;;  %v2884_v45 = vor.u32 %v3264_v42, %v2881_v34  ;;  %v2899_v31 = vld [vmem:[#allocation2 + $0x110] sm:$0xf]  ;;  %v3269_v34 = vld [vmem:[#allocation2 + $0x118] sm:$0xf0]  ;;  %v2748_v33 = vor.u32 %v3232_v30, %v2747_v29  ;;  %v2815_v38 = vld [vmem:[#allocation2 + $0x68] sm:$0xf] }
 0x10f   : > { %v2900_v37 = vor.u32 %v3269_v34, %v2899_v31  ;;  %v3248_v39 = vld [vmem:[#allocation2 + $0x70] sm:$0xf0]  ;;  %v2887_v40 = vld [vmem:[#allocation2 + $0xf8] sm:$0xf]  ;;  %v3266_v41 = vld [vmem:[#allocation2 + $0x100] sm:$0xf0] }
 0x110   : > { %1171 = vmatpush.bf16.msra.mxu0 %v2760_v32  ;;  %1188 = vmatpush.bf16.msra.mxu1 %v2880_v44  ;;  %v2816_v42 = vor.u32 %v3248_v39, %v2815_v38  ;;  %v3245_v43 = vld [vmem:[#allocation2 + $0x58] sm:$0xf0]  ;;  %v2875_v32 = vld [vmem:[#allocation2 + $0xe0] sm:$0xf]  ;;  %v3263_v44 = vld [vmem:[#allocation2 + $0xe8] sm:$0xf0] }
 0x111   : > { %1228 = vmatpush.bf16.msra.mxu3 %v2764_v49  ;;  %1245 = vmatpush.bf16.msrb.mxu2 %v2884_v45  ;;  %v2888_v45 = vor.u32 %v3266_v41, %v2887_v40  ;;  %v2803_v46 = vld [vmem:[#allocation2 + $0x50] sm:$0xf]  ;;  %v3231_v48 = vld [vmem:[%s5483_s1 + $0x1c] sm:$0xf]  ;;  %v2749_v49 = vld [vmem:[%s5483_s1 + $0x24] sm:$0xf0] }
 0x112   : > { %v2863_v56 = vld [vmem:[#allocation2 + $0xc8] sm:$0xf]  ;;  %v3260_v57 = vld [vmem:[#allocation2 + $0xd0] sm:$0xf0]  ;;  %v2791_v52 = vld [vmem:[#allocation2 + $0x38] sm:$0xf] }
 0x113   : > { %1172 = vmatmul.bf16.vlgmr.msra.gmra.mxu0 %v4489_v50  ;;  %v2864_v11 = vor.u32 %v3260_v57, %v2863_v56  ;;  %v2779_v59 = vld [vmem:[#allocation2 + $0x20] sm:$0xf]  ;;  %v3239_v9 = vld [vmem:[#allocation2 + $0x28] sm:$0xf0]  ;;  %v2767_v60 = vld [vmem:[#allocation2 + $0x8] sm:$0xf] }
 0x114   : > { %1265 = vmatpush.bf16.msrb.mxu0 %v2968_v53  ;;  %1189 = vmatpush.bf16.msra.mxu1 %v2868_v55  ;;  %v2876_v53 = vor.u32 %v3263_v44, %v2875_v32  ;;  %v2752_v55 = vor.u32 %v3231_v48, %v2749_v49  ;;  %v2780_v12 = vor.u32 %v3239_v9, %v2779_v59  ;;  %v3236_v62 = vld [vmem:[#allocation2 + $0x10] sm:$0xf0] }
 0x115   : > { %1297 = vmatpush.bf16.msrb.mxu3 %v2948_v54  ;;  %1246 = vmatpush.bf16.msrb.mxu2 %v2872_v8  ;;  %v2804_v54 = vor.u32 %v3245_v43, %v2803_v46  ;;  %v3242_v8 = vld [vmem:[#allocation2 + $0x40] sm:$0xf0]  ;;  %v2768_v63 = vor.u32 %v3236_v62, %v2767_v60 }
 0x116   : > { %1229 = vmatmul.bf16.vlgmr.msra.gmra.mxu3 %v4489_v50  ;;  %v2792_v58 = vor.u32 %v3242_v8, %v2791_v52 }
 0x118   : > { %1266 = vmatpush.bf16.msrb.mxu0 %v2956_v3  ;;  %1190 = vmatpush.bf16.msra.mxu1 %v2856_v0 }
 0x119   : > { %1298 = vmatpush.bf16.msrb.mxu3 %v2936_v6  ;;  %1247 = vmatpush.bf16.msrb.mxu2 %v2860_v7 }
 0x11b   : > { %1191 = vmatmul.bf16.vlgmr.msra.gmra.mxu1 %v4502_v16 }
 0x11c   : > { %1278 = vmatpush.bf16.msrb.mxu1 %v2852_v14  ;;  %1248 = vmatmul.bf16.vlgmr.msrb.gmra.mxu2 %v4502_v16 }
 0x11d   : > { %1299 = vmatpush.bf16.msrb.mxu3 %v2924_v17  ;;  %1322 = vmatpush.bf16.msra.mxu2 %v2972_v18 }
 0x120   : > { %1279 = vmatpush.bf16.msrb.mxu1 %v2840_v15 }
 0x121   : > { %1300 = vmatpush.bf16.msrb.mxu3 %v2912_v26  ;;  %1323 = vmatpush.bf16.msra.mxu2 %v2960_v27 }
 0x123   : > { %1177 = vmatmul.bf16.gmra.mxu0 %v2748_v33 }
 0x124   : > { %1280 = vmatpush.bf16.msrb.mxu1 %v2828_v35 }
 0x125   : > { %1301 = vmatpush.bf16.msrb.mxu3 %v2900_v37 }
 0x126   : > { %1234 = vmatmul.bf16.gmra.mxu3 %v2748_v33 }
 0x128   : > { %1281 = vmatpush.bf16.msrb.mxu1 %v2816_v42 }
 0x129   : > { %1302 = vmatpush.bf16.msrb.mxu3 %v2888_v45 }
 0x12b   : > { %1196 = vmatmul.bf16.gmra.mxu1 %v2752_v55 }
 0x12c   : > { %1282 = vmatpush.bf16.msrb.mxu1 %v2804_v54  ;;  %1253 = vmatmul.bf16.gmra.mxu2 %v2752_v55 }
 0x12d   : > { %1303 = vmatpush.bf16.msrb.mxu3 %v2876_v53 }
 0x130   : > { %1283 = vmatpush.bf16.msrb.mxu1 %v2792_v58 }
 0x131   : > { %1304 = vmatpush.bf16.msrb.mxu3 %v2864_v11 }
 0x133   : > { %2975 = vmatmul.msk.bf16.vlgmr.msrb.gmra.mxu0 %vm1157_vm6, %v4379_v51 }
 0x134   : > { %1284 = vmatpush.bf16.msrb.mxu1 %v2780_v12 }
 0x136   : > { %1305 = vmatmul.bf16.vlgmr.msrb.gmra.mxu3 %v4502_v16 }
 0x138   : > { %1285 = vmatpush.bf16.msrb.mxu1 %v2768_v63 }
 0x13b   : > { %1286 = vmatmul.bf16.vlgmr.msrb.gmra.mxu1 %v4489_v50 }
 0x13c   : > { %2977 = vmatmul.msk.bf16.vlgmr.msra.gmra.mxu2 %vm1157_vm6, %v4379_v51 }
 0x143   : > { %2976 = vmatmul.msk.bf16.gmra.mxu0 %vm1157_vm6, %v4418_v36 }
 0x146   : > { %1310 = vmatmul.bf16.gmra.mxu3 %v2752_v55 }
 0x14b   : > { %1291 = vmatmul.bf16.gmra.mxu1 %v2748_v33 }
 0x14c   : > { %2978 = vmatmul.msk.bf16.gmra.mxu2 %vm1157_vm6, %v4418_v36 }
 0x154   : > { %v1211_v3 = vpop.f32.mrf.mxu2 }
 0x15c   : > { %v1213_v6 = vpop.f32.mrf.mxu2 }
 0x164   : > { %v1216_v0 = vpop.f32.mrf.mxu2  ;;  %v4530_v7 = vpop.permute.xlu2 %821 }
 0x165   : > { %v4528_v2 = vpop.permute.xlu1 %836 }
 0x16c   : > { %v1218_v4 = vpop.f32.mrf.mxu2 }
 0x16d   : > { %v4533_v14 = vpop.permute.xlu1 %826 }
 0x174   : > { %v4540_v25 = vpop.permute.xlu0 %831 }
 0x190   : > { %v1173_v1 = vpop.f32.mrf.mxu0 }
 0x191   : > { %v1174_v5 = vadd.f32 %v1173_v1, %v4530_v7 }
 0x198   : > { %v1175_v10 = vpop.f32.mrf.mxu0  ;;  %v1192_v51 = vpop.f32.mrf.mxu1 }
 0x199   : > { %v1230_v50 = vpop.f32.mrf.mxu3  ;;  %v1193_v13 = vadd.f32 %v1192_v51, %v1174_v5  ;;  %v1176_v36 = vadd.f32 %v1175_v10, %v4533_v14 }
 0x19a   : > { %v1231_v43 = vadd.f32 %v1230_v50, %v4530_v7 }
 0x19b   : > { %v1212_v16 = vadd.f32 %v1211_v3, %v1193_v13 }
 0x19d   : > { %v1349_v23 = vmul.f32 %v4536_v61, %v1212_v16  ;;  %vm1336_vm9 = vcmp.ge.f32.partialorder %v1212_v16, 0.0 }
 0x19f   : > { %v1249_v17 = vpop.f32.mrf.mxu2  ;;  %v4542_v28 = vsel %vm1336_vm9, %v1212_v16, %v1349_v23 }
 0x1a0   : > { %v1178_v19 = vpop.f32.mrf.mxu0  ;;  %v1194_v20 = vpop.f32.mrf.mxu1  ;;  %v1250_v48 = vadd.f32 %v1249_v17, %v1231_v43 }
 0x1a1   : > { %v1232_v18 = vpop.f32.mrf.mxu3  ;;  %v1195_v21 = vadd.f32 %v1194_v20, %v1176_v36  ;;  %v1179_v35 = vadd.f32 %v1178_v19, %v4540_v25 }
 0x1a2   : > { %v1233_v44 = vadd.f32 %v1232_v18, %v4533_v14 }
 0x1a3   : > { %v1214_v24 = vadd.f32 %v1213_v6, %v1195_v21 }
 0x1a5   : > { %vm1339_vm10 = vcmp.ge.f32.partialorder %v1214_v24, 0.0  ;;  %v1352_v15 = vmul.f32 %v4536_v61, %v1214_v24 }
 0x1a7   : > { %v1251_v26 = vpop.f32.mrf.mxu2  ;;  %v4544_v29 = vsel %vm1339_vm10, %v1214_v24, %v1352_v15 }
 0x1a8   : > { %v1180_v30 = vpop.f32.mrf.mxu0  ;;  %v1197_v31 = vpop.f32.mrf.mxu1  ;;  %v3621_v34 = vpack.i.bf16 %v4544_v29, %v4542_v28  ;;  %v1252_v53 = vadd.f32 %v1251_v26, %v1233_v44 }
 0x1a9   : > { %v1235_v27 = vpop.f32.mrf.mxu3  ;;  %v1198_v33 = vadd.f32 %v1197_v31, %v1179_v35  ;;  %v1181_v37 = vadd.f32 %v1180_v30, %v4528_v2 }
 0x1aa   : > { %3622 = vrot.lane.b32.xlu2 %v3621_v34, %s4014_s25  ;;  %v1236_v62 = vadd.f32 %v1235_v27, %v4540_v25 }
 0x1ab   : > { %v1217_v38 = vadd.f32 %v1216_v0, %v1198_v33 }
 0x1ad   : > { %v1355_v45 = vmul.f32 %v4536_v61, %v1217_v38  ;;  %vm1342_vm11 = vcmp.ge.f32.partialorder %v1217_v38, 0.0 }
 0x1af   : > { %v1254_v39 = vpop.f32.mrf.mxu2  ;;  %v4555_v57 = vsel %vm1342_vm11, %v1217_v38, %v1355_v45 }
 0x1b0   : > { %v1199_v41 = vpop.f32.mrf.mxu1  ;;  %v1268_v42 = vpop.f32.mrf.mxu0  ;;  %v1255_v50 = vadd.f32 %v1254_v39, %v1236_v62 }
 0x1b1   : > { %v1237_v40 = vpop.f32.mrf.mxu3  ;;  %v1200_v32 = vadd.f32 %v1199_v41, %v1181_v37  ;;  %v1269_v54 = vadd.f32 %v1268_v42, %v1250_v48 }
 0x1b2   : > { %v1238_v10 = vadd.f32 %v1237_v40, %v4528_v2 }
 0x1b3   : > { %v1219_v46 = vadd.f32 %v1218_v4, %v1200_v32  ;;  %v1350_v9 = vmul.f32 %v4536_v61, %v1269_v54  ;;  %vm1337_vm14 = vcmp.ge.f32.partialorder %v1269_v54, 0.0 }
 0x1b5   : > { %vm1345_vm12 = vcmp.ge.f32.partialorder %v1219_v46, 0.0  ;;  %v1358_v49 = vmul.f32 %v4536_v61, %v1219_v46  ;;  %v4567_v6 = vsel %vm1337_vm14, %v1269_v54, %v1350_v9 }
 0x1b7   : > { %v1256_v55 = vpop.f32.mrf.mxu2  ;;  %v4557_v52 = vsel %vm1345_vm12, %v1219_v46, %v1358_v49 }
 0x1b8   : > { %v1270_v8 = vpop.f32.mrf.mxu0  ;;  %v1287_v11 = vpop.f32.mrf.mxu1  ;;  %v3626_v58 = vpack.i.bf16 %v4557_v52, %v4555_v57  ;;  %v1257_v36 = vadd.f32 %v1256_v55, %v1238_v10 }
 0x1b9   : > { %v1306_v56 = vpop.f32.mrf.mxu3  ;;  %v1271_v59 = vadd.f32 %v1270_v8, %v1252_v53  ;;  %v1288_v51 = vadd.f32 %v1287_v11, %v4530_v7 }
 0x1ba   : > { %3627 = vrot.lane.b32.xlu0 %v3626_v58, %s4014_s25 }
 0x1bb   : > { %vm1340_vm13 = vcmp.ge.f32.partialorder %v1271_v59, 0.0  ;;  %v1353_v12 = vmul.f32 %v4536_v61, %v1271_v59  ;;  %v1307_v16 = vadd.f32 %v1306_v56, %v1288_v51 }
 0x1bd   : > { %v4564_v60 = vsel %vm1340_vm13, %v1271_v59, %v1353_v12 }
 0x1be   : > { %v3641_v4 = vpack.i.bf16 %v4564_v60, %v4567_v6 }
 0x1bf   : > { %v1325_v63 = vpop.f32.mrf.mxu2 }
 0x1c0   : > { %v1273_v0 = vpop.f32.mrf.mxu0  ;;  %v1289_v1 = vpop.f32.mrf.mxu1  ;;  %v1326_v15 = vadd.f32 %v1325_v63, %v1307_v16 }
 0x1c1   : > { %v1308_v3 = vpop.f32.mrf.mxu3  ;;  %v1290_v5 = vadd.f32 %v1289_v1, %v4533_v14  ;;  %v1274_v13 = vadd.f32 %v1273_v0, %v1255_v50 }
 0x1c2   : > { %3642 = vrot.lane.b32.xlu0 %v3641_v4, %s4014_s25  ;;  %v1351_v34 = vmul.f32 %v4536_v61, %v1326_v15  ;;  %vm1338_vm10 = vcmp.ge.f32.partialorder %v1326_v15, 0.0 }
 0x1c3   : > { %v1309_v17 = vadd.f32 %v1308_v3, %v1290_v5  ;;  %v1356_v21 = vmul.f32 %v4536_v61, %v1274_v13  ;;  %vm1343_vm15 = vcmp.ge.f32.partialorder %v1274_v13, 0.0 }
 0x1c4   : > { %v1363_v41 = vsel %vm1338_vm10, %v1326_v15, %v1351_v34 }
 0x1c5   : > { %v4577_v7 = vsel %vm1343_vm15, %v1274_v13, %v1356_v21  ;;  %vm1401_vm15 = vcmp.lt.s32.totalorder %v4183_v22, 92 }
 0x1c7   : > { %v1327_v18 = vpop.f32.mrf.mxu2 }
 0x1c8   : > { %v1275_v19 = vpop.f32.mrf.mxu0  ;;  %v1292_v20 = vpop.f32.mrf.mxu1  ;;  %v1328_v26 = vadd.f32 %v1327_v18, %v1309_v17 }
 0x1c9   : > { %v1276_v23 = vadd.f32 %v1275_v19, %v1257_v36  ;;  %v1311_v24 = vpop.f32.mrf.mxu3  ;;  %v1293_v30 = vadd.f32 %v1292_v20, %v4540_v25 }
 0x1ca   : > { %v1354_v35 = vmul.f32 %v4536_v61, %v1328_v26  ;;  %vm1341_vm11 = vcmp.ge.f32.partialorder %v1328_v26, 0.0 }
 0x1cb   : > { %vm1346_vm9 = vcmp.ge.f32.partialorder %v1276_v23, 0.0  ;;  %v1359_v27 = vmul.f32 %v4536_v61, %v1276_v23  ;;  %v1312_v38 = vadd.f32 %v1311_v24, %v1293_v30 }
 0x1cc   : > { %v1366_v42 = vsel %vm1341_vm11, %v1328_v26, %v1354_v35 }
 0x1cd   : > { %v4579_v14 = vsel %vm1346_vm9, %v1276_v23, %v1359_v27  ;;  %v3646_v32 = vpack.i.bf16 %v1366_v42, %v1363_v41 }
 0x1ce   : > { %v3631_v31 = vpack.i.bf16 %v4579_v14, %v4577_v7 }
 0x1cf   : > { %v1330_v33 = vpop.f32.mrf.mxu2 }
 0x1d0   : > { %v1294_v37 = vpop.f32.mrf.mxu1  ;;  %3632 = vrot.lane.b32.xlu1 %v3631_v31, %s4014_s25  ;;  %v1331_v25 = vadd.f32 %v1330_v33, %v1312_v38 }
 0x1d1   : > { %v1295_v39 = vadd.f32 %v1294_v37, %v4528_v2  ;;  %v1313_v40 = vpop.f32.mrf.mxu3  ;;  %v4595_v2 = vld [vmem:[%s5488_s6] ss:$2 sm:$0x7] }
 0x1d2   : > { %v1357_v45 = vmul.f32 %v4536_v61, %v1331_v25  ;;  %vm1344_vm12 = vcmp.ge.f32.partialorder %v1331_v25, 0.0  ;;  %vm1376_vm14 = vcmp.eq.s32.totalorder %v4595_v2, 0 }
 0x1d3   : > { %v1314_v43 = vadd.f32 %v1313_v40, %v1295_v39  ;;  %v1414_v56 = vsel %vm1376_vm14, 1, %v4013_v47 }
 0x1d4   : > { %v1369_v49 = vsel %vm1344_vm12, %v1331_v25, %v1357_v45  ;;  %v1415_v11 = vperm.slane %v1414_v56, 0  ;;  %v1417_v0 = vperm.slane %v1414_v56, 2  ;;  %v1416_v21 = vperm.slane %v1414_v56, 1 }
 0x1d5   : > { %vm1433_vm12 = vcmp.eq.s32.totalorder %v4595_v2, 17 }
 0x1d6   : > { %vm4600_vm9 = vcmp.eq.s32.totalorder %v1415_v11, 1  ;;  %vm4621_vm10 = vcmp.eq.s32.totalorder %v1417_v0, 1  ;;  %vm4640_vm11 = vcmp.eq.s32.totalorder %v1416_v21, 1 }
 0x1d7   : > { %v1332_v44 = vpop.f32.mrf.mxu2 }
 0x1d8   : > { %v1333_v46 = vadd.f32 %v1332_v44, %v1314_v43  ;;  %3647 = vrot.lane.b32.xlu1 %v3646_v32, %s4014_s25 }
 0x1da   : > { %vm1347_vm13 = vcmp.ge.f32.partialorder %v1333_v46, 0.0  ;;  %v1360_v48 = vmul.f32 %v4536_v61, %v1333_v46 }
 0x1dc   : > { %v1372_v53 = vsel %vm1347_vm13, %v1333_v46, %v1360_v48  ;;  %vm1458_vm13 = vcmp.lt.s32.totalorder %v4183_v22, 36 }
 0x1dd   : > { %v3636_v54 = vpack.i.bf16 %v1372_v53, %v1369_v49 }
 0x1df   : > { %3637 = vrot.lane.b32.xlu2 %v3636_v54, %s4014_s25 }
 0x204   : > { %v3623_v8 = vpop.permute.xlu2 %3622 }
 0x205   : > { %v3625_v58 = vunpack.i.h.bf16 %v3623_v8  ;;  %v3624_v59 = vunpack.i.l.bf16 %v3623_v8 }
 0x22c   : > { %v3628_v55 = vpop.permute.xlu0 %3627 }
 0x22d   : > { %v3630_v51 = vunpack.i.h.bf16 %v3628_v55  ;;  %v3629_v5 = vunpack.i.l.bf16 %v3628_v55 }
 0x234   : > { %v3643_v61 = vpop.permute.xlu0 %3642 }
 0x235   : > { %v3645_v9 = vunpack.i.h.bf16 %v3643_v61  ;;  %v3644_v12 = vunpack.i.l.bf16 %v3643_v61 }
 0x237   : > { %v1407_v63 = vsel %vm1401_vm15, %v3625_v58, %v3645_v9  ;;  %v1406_v3 = vsel %vm1401_vm15, %v3624_v59, %v3644_v12 }
 0x238   : > { %v4611_v1 = vsel %vm4600_vm9, %v1406_v3, %v4542_v28  ;;  %v4616_v4 = vsel %vm4600_vm9, %v1407_v63, %v4544_v29 }
 0x239   : > { %v3638_v50 = vpop.permute.xlu2 %3637  ;;  %v3651_v10 = vpack.i.bf16 %v4616_v4, %v4611_v1 }
 0x23a   : > { %v3640_v13 = vunpack.i.h.bf16 %v3638_v50  ;;  %v3639_v36 = vunpack.i.l.bf16 %v3638_v50 }
 0x23b   : > { %3652 = vrot.lane.b32.xlu2 %v3651_v10, %s4015_s16 }
 0x23c   : > { %v1413_v28 = vsel %vm1401_vm15, %v3640_v13, %v3630_v51  ;;  %v1412_v29 = vsel %vm1401_vm15, %v3639_v36, %v3629_v5 }
 0x23d   : > { %v4631_v17 = vsel %vm4621_vm10, %v1412_v29, %v1369_v49  ;;  %v4635_v18 = vsel %vm4621_vm10, %v1413_v28, %v1372_v53 }
 0x23e   : > { %v3676_v19 = vpack.i.bf16 %v4635_v18, %v4631_v17 }
 0x242   : > { %v3633_v20 = vpop.permute.xlu1 %3632 }
 0x243   : > { %3677 = vrot.lane.b32.xlu2 %v3676_v19, %s4015_s16  ;;  %v3635_v26 = vunpack.i.h.bf16 %v3633_v20  ;;  %v3634_v27 = vunpack.i.l.bf16 %v3633_v20 }
 0x245   : > { %v1404_v32 = vsel %vm1401_vm15, %v3634_v27, %v3639_v36 }
 0x24a   : > { %v3648_v23 = vpop.permute.xlu1 %3647 }
 0x24b   : > { %v3650_v24 = vunpack.i.h.bf16 %v3648_v23  ;;  %v3649_v15 = vunpack.i.l.bf16 %v3648_v23 }
 0x24d   : > { %v1411_v31 = vsel %vm1401_vm15, %v3650_v24, %v3625_v58  ;;  %v1402_v34 = vsel %vm1401_vm15, %v3644_v12, %v3649_v15  ;;  %v1403_v35 = vsel %vm1401_vm15, %v3645_v9, %v3650_v24  ;;  %v1410_v33 = vsel %vm1401_vm15, %v3649_v15, %v3624_v59 }
 0x24e   : > { %v1423_v37 = vsel %vm4621_vm10, %v1410_v33, %v1363_v41  ;;  %v1426_v38 = vsel %vm4621_vm10, %v1411_v31, %v1366_v42  ;;  %v4659_v39 = vsel %vm4640_vm11, %v1402_v34, %v4567_v6  ;;  %v4664_v40 = vsel %vm4640_vm11, %v1403_v35, %v4564_v60 }
 0x24f   : > { %v3661_v25 = vpack.i.bf16 %v1426_v38, %v1423_v37  ;;  %v3656_v43 = vpack.i.bf16 %v4664_v40, %v4659_v39  ;;  %v1405_v41 = vsel %vm1401_vm15, %v3635_v26, %v3640_v13  ;;  %v1409_v42 = vsel %vm1401_vm15, %v3630_v51, %v3635_v26 }
 0x250   : > { %v1408_v6 = vsel %vm1401_vm15, %v3629_v5, %v3634_v27  ;;  %v1428_v60 = vsel %vm4640_vm11, %v1404_v32, %v4577_v7  ;;  %v1431_v44 = vsel %vm4640_vm11, %v1405_v41, %v4579_v14  ;;  %v1430_v46 = vsel %vm4600_vm9, %v1409_v42, %v4557_v52 }
 0x251   : > { %3662 = vrot.lane.b32.xlu1 %v3661_v25, %s4015_s16  ;;  %3657 = vrot.lane.b32.xlu0 %v3656_v43, %s4015_s16  ;;  %v1427_v45 = vsel %vm4600_vm9, %v1408_v6, %v4555_v57  ;;  %v3671_v48 = vpack.i.bf16 %v1431_v44, %v1428_v60  ;;  %v1471_v7 = vsel %vm1433_vm12, 1, %v4013_v47  ;;  %vm1515_vm12 = vcmp.lt.s32.totalorder %v4183_v22, 126 }
 0x252   : > { %v3666_v49 = vpack.i.bf16 %v1430_v46, %v1427_v45  ;;  %v1472_v14 = vperm.slane %v1471_v7, 0  ;;  %v1474_v54 = vperm.slane %v1471_v7, 2  ;;  %v1473_v50 = vperm.slane %v1471_v7, 1 }
 0x254   : > { %vm4695_vm14 = vcmp.eq.s32.totalorder %v1472_v14, 1  ;;  %vm4699_vm15 = vcmp.eq.s32.totalorder %v1474_v54, 1  ;;  %vm4737_vm9 = vcmp.eq.s32.totalorder %v1473_v50, 1 }
 0x259   : > { %3672 = vrot.lane.b32.xlu1 %v3671_v48, %s4015_s16  ;;  %3667 = vrot.lane.b32.xlu0 %v3666_v49, %s4015_s16 }
 0x295   : > { %v3653_v53 = vpop.permute.xlu2 %3652 }
 0x296   : > { %v3655_v55 = vunpack.i.h.bf16 %v3653_v53  ;;  %v3654_v56 = vunpack.i.l.bf16 %v3653_v53 }
 0x29d   : > { %v3678_v10 = vpop.permute.xlu2 %3677 }
 0x29e   : > { %v3679_v36 = vunpack.i.l.bf16 %v3678_v10 }
 0x2c3   : > { %v3663_v57 = vpop.permute.xlu1 %3662  ;;  %v3658_v8 = vpop.permute.xlu0 %3657 }
 0x2c4   : > { %v3665_v11 = vunpack.i.h.bf16 %v3663_v57  ;;  %v3664_v58 = vunpack.i.l.bf16 %v3663_v57  ;;  %v3660_v61 = vunpack.i.h.bf16 %v3658_v8  ;;  %v3659_v59 = vunpack.i.l.bf16 %v3658_v8 }
 0x2c6   : > { %v1467_v9 = vsel %vm1458_vm13, %v3664_v58, %v3654_v56  ;;  %v1468_v12 = vsel %vm1458_vm13, %v3665_v11, %v3655_v55  ;;  %v1460_v62 = vsel %vm1458_vm13, %v3660_v61, %v3665_v11  ;;  %v1459_v63 = vsel %vm1458_vm13, %v3659_v59, %v3664_v58 }
 0x2c7   : > { %v4714_v3 = vsel %vm4695_vm14, %v1467_v9, %v4611_v1  ;;  %v4719_v0 = vsel %vm4695_vm14, %v1468_v12, %v4616_v4  ;;  %v4725_v5 = vsel %vm4699_vm15, %v1459_v63, %v1423_v37  ;;  %v4729_v13 = vsel %vm4699_vm15, %v1460_v62, %v1426_v38 }
 0x2c8   : > { %v3681_v51 = vpack.i.bf16 %v4719_v0, %v4714_v3  ;;  %v3686_v1 = vpack.i.bf16 %v4729_v13, %v4725_v5  ;;  %v3680_v4 = vunpack.i.h.bf16 %v3678_v10  ;;  %v1463_v16 = vsel %vm1458_vm13, %v3654_v56, %v3659_v59 }
 0x2c9   : > { %v4750_v30 = vsel %vm4737_vm9, %v1463_v16, %v4659_v39  ;;  %v1464_v42 = vsel %vm1458_vm13, %v3655_v55, %v3660_v61 }
 0x2ca   : > { %3682 = vrot.lane.b32.xlu2 %v3681_v51, %s4016_s17  ;;  %3687 = vrot.lane.b32.xlu1 %v3686_v1, %s4016_s17  ;;  %v1482_v6 = vsel %vm4737_vm9, %v1464_v42, %v4664_v40 }
 0x2cb   : > { %v3673_v28 = vpop.permute.xlu1 %3672  ;;  %v3668_v29 = vpop.permute.xlu0 %3667 }
 0x2cc   : > { %v3675_v20 = vunpack.i.h.bf16 %v3673_v28  ;;  %v3674_v21 = vunpack.i.l.bf16 %v3673_v28  ;;  %v3670_v23 = vunpack.i.h.bf16 %v3668_v29  ;;  %v3669_v24 = vunpack.i.l.bf16 %v3668_v29 }
 0x2ce   : > { %v1461_v15 = vsel %vm1458_vm13, %v3674_v21, %v3679_v36  ;;  %v1466_v26 = vsel %vm1458_vm13, %v3670_v23, %v3675_v20  ;;  %v1470_v27 = vsel %vm1458_vm13, %v3680_v4, %v3670_v23  ;;  %v1465_v31 = vsel %vm1458_vm13, %v3669_v24, %v3674_v21 }
 0x2cf   : > { %v1469_v34 = vsel %vm1458_vm13, %v3679_v36, %v3669_v24  ;;  %v1486_v35 = vsel %vm4699_vm15, %v1461_v15, %v4631_v17  ;;  %v4761_v33 = vsel %vm4737_vm9, %v1466_v26, %v1431_v44  ;;  %v1487_v39 = vsel %vm4695_vm14, %v1470_v27, %v1430_v46 }
 0x2d0   : > { %v3701_v37 = vpack.i.bf16 %v1486_v35, %v4761_v33  ;;  %v1484_v38 = vsel %vm4695_vm14, %v1469_v34, %v1427_v45  ;;  %v4770_v25 = vsel %vm4737_vm9, %v1465_v31, %v1428_v60  ;;  %v1462_v41 = vsel %vm1458_vm13, %v3675_v20, %v3680_v4  ;;  %v4791_v45 = vld [vmem:[%s5488_s6 + $0x1] ss:$2 sm:$0x7] }
 0x2d1   : > { %v3696_v43 = vpack.i.bf16 %v1487_v39, %v1484_v38  ;;  %v3691_v17 = vpack.i.bf16 %v4770_v25, %v4750_v30  ;;  %v1489_v32 = vsel %vm4699_vm15, %v1462_v41, %v4635_v18  ;;  %vm1490_vm10 = vcmp.eq.s32.totalorder %v4791_v45, 0 }
 0x2d2   : > { %3702 = vrot.lane.b32.xlu2 %v3701_v37, %s4016_s17  ;;  %v3706_v60 = vpack.i.bf16 %v1482_v6, %v1489_v32  ;;  %v1528_v48 = vsel %vm1490_vm10, 1, %v4013_v47  ;;  %vm1547_vm15 = vcmp.eq.s32.totalorder %v4791_v45, 17  ;;  %vm1572_vm9 = vcmp.lt.s32.totalorder %v4183_v22, 2 }
 0x2d3   : > { %3697 = vrot.lane.b32.xlu0 %v3696_v43, %s4016_s17  ;;  %3692 = vrot.lane.b32.xlu1 %v3691_v17, %s4016_s17  ;;  %v1529_v49 = vperm.slane %v1528_v48, 0  ;;  %v1531_v52 = vperm.slane %v1528_v48, 2  ;;  %v1530_v59 = vperm.slane %v1528_v48, 1 }
 0x2d5   : > { %vm4795_vm11 = vcmp.eq.s32.totalorder %v1529_v49, 1  ;;  %vm4819_vm13 = vcmp.eq.s32.totalorder %v1531_v52, 1  ;;  %vm4823_vm14 = vcmp.eq.s32.totalorder %v1530_v59, 1 }
 0x2db   : > { %3707 = vrot.lane.b32.xlu0 %v3706_v60, %s4016_s17 }
 0x324   : > { %v3683_v44 = vpop.permute.xlu2 %3682 }
 0x325   : > { %v3684_v12 = vunpack.i.l.bf16 %v3683_v44  ;;  %v3685_v50 = vunpack.i.h.bf16 %v3683_v44 }
 0x32c   : > { %v3703_v18 = vpop.permute.xlu2 %3702 }
 0x32d   : > { %v3704_v14 = vunpack.i.l.bf16 %v3703_v18  ;;  %v3705_v2 = vunpack.i.h.bf16 %v3703_v18 }
 0x33c   : > { %v3688_v46 = vpop.permute.xlu1 %3687 }
 0x33d   : > { %v3689_v62 = vunpack.i.l.bf16 %v3688_v46  ;;  %v3690_v36 = vunpack.i.h.bf16 %v3688_v46 }
 0x33f   : > { %v1524_v37 = vsel %vm1515_vm12, %v3689_v62, %v3684_v12 }
 0x340   : > { %v4879_v43 = vsel %vm4819_vm13, %v1524_v37, %v4725_v5  ;;  %v1585_v5 = vsel %vm1547_vm15, 1, %v4013_v47 }
 0x341   : > { %v1588_v40 = vperm.slane %v1585_v5, 2 }
 0x345   : > { %v3698_v7 = vpop.permute.xlu0 %3697  ;;  %v3693_v53 = vpop.permute.xlu1 %3692 }
 0x346   : > { %v3700_v54 = vunpack.i.h.bf16 %v3698_v7  ;;  %v3699_v55 = vunpack.i.l.bf16 %v3698_v7  ;;  %v3695_v56 = vunpack.i.h.bf16 %v3693_v53  ;;  %v3694_v11 = vunpack.i.l.bf16 %v3693_v53 }
 0x347   : > { %v1586_v53 = vperm.slane %v1585_v5, 0 }
 0x348   : > { %v1523_v57 = vsel %vm1515_vm12, %v3700_v54, %v3704_v14  ;;  %v1522_v8 = vsel %vm1515_vm12, %v3699_v55, %v3695_v56  ;;  %v1526_v63 = vsel %vm1515_vm12, %v3705_v2, %v3699_v55  ;;  %v1520_v10 = vsel %vm1515_vm12, %v3684_v12, %v3694_v11 }
 0x349   : > { %v4806_v58 = vsel %vm4795_vm11, %v1522_v8, %v1484_v38  ;;  %v4810_v61 = vsel %vm4795_vm11, %v1523_v57, %v1487_v39  ;;  %v1516_v16 = vsel %vm1515_vm12, %v3694_v11, %v3689_v62  ;;  %v1543_v19 = vsel %vm4819_vm13, %v1526_v63, %v1486_v35 }
 0x34a   : > { %v3726_v9 = vpack.i.bf16 %v4810_v61, %v4806_v58  ;;  %v4840_v24 = vsel %vm4795_vm11, %v1520_v10, %v4714_v3  ;;  %v4852_v27 = vsel %vm4823_vm14, %v1516_v16, %v4750_v30  ;;  %v1525_v30 = vsel %vm1515_vm12, %v3690_v36, %v3685_v50 }
 0x34b   : > { %v1518_v38 = vsel %vm1515_vm12, %v3695_v56, %v3705_v2  ;;  %v4884_v17 = vsel %vm4819_vm13, %v1525_v30, %v4729_v13 }
 0x34c   : > { %3727 = vrot.lane.b32.xlu0 %v3726_v9, %s4017_s20  ;;  %v1542_v41 = vsel %vm4823_vm14, %v1518_v38, %v4770_v25 }
 0x34d   : > { %v3708_v51 = vpop.permute.xlu0 %3707 }
 0x34e   : > { %v3710_v28 = vunpack.i.h.bf16 %v3708_v51  ;;  %v3709_v29 = vunpack.i.l.bf16 %v3708_v51 }
 0x350   : > { %v1521_v20 = vsel %vm1515_vm12, %v3685_v50, %v3710_v28  ;;  %v1517_v21 = vsel %vm1515_vm12, %v3710_v28, %v3690_v36  ;;  %v1527_v23 = vsel %vm1515_vm12, %v3709_v29, %v3700_v54 }
 0x351   : > { %v1546_v15 = vsel %vm4819_vm13, %v1527_v23, %v1489_v32  ;;  %v4847_v26 = vsel %vm4795_vm11, %v1521_v20, %v4719_v0  ;;  %v4856_v31 = vsel %vm4823_vm14, %v1517_v21, %v1482_v6  ;;  %v1519_v0 = vsel %vm1515_vm12, %v3704_v14, %v3709_v29 }
 0x352   : > { %v3736_v34 = vpack.i.bf16 %v1546_v15, %v1543_v19  ;;  %v3711_v3 = vpack.i.bf16 %v4847_v26, %v4840_v24  ;;  %v3716_v35 = vpack.i.bf16 %v4856_v31, %v4852_v27  ;;  %v1545_v39 = vsel %vm4823_vm14, %v1519_v0, %v4761_v33 }
 0x353   : > { %v3731_v42 = vpack.i.bf16 %v1545_v39, %v1542_v41  ;;  %v3721_v32 = vpack.i.bf16 %v4884_v17, %v4879_v43  ;;  %v1587_v6 = vperm.slane %v1585_v5, 1  ;;  %vm4910_vm11 = vcmp.eq.s32.totalorder %v1586_v53, 1 }
 0x354   : > { %3737 = vrot.lane.b32.xlu0 %v3736_v34, %s4017_s20  ;;  %3712 = vrot.lane.b32.xlu2 %v3711_v3, %s4017_s20  ;;  %vm4914_vm12 = vcmp.eq.s32.totalorder %v1588_v40, 1 }
 0x355   : > { %3717 = vrot.lane.b32.xlu1 %v3716_v35, %s4017_s20  ;;  %vm4896_vm10 = vcmp.eq.s32.totalorder %v1587_v6, 1 }
 0x35c   : > { %3732 = vrot.lane.b32.xlu2 %v3731_v42, %s4017_s20 }
 0x35d   : > { %3722 = vrot.lane.b32.xlu1 %v3721_v32, %s4017_s20 }
 0x3ae   : > { %v3713_v33 = vpop.permute.xlu2 %3712 }
 0x3af   : > { %v3715_v11 = vunpack.i.h.bf16 %v3713_v33  ;;  %v3714_v59 = vunpack.i.l.bf16 %v3713_v33 }
 0x3b6   : > { %v3733_v13 = vpop.permute.xlu2 %3732 }
 0x3b7   : > { %v3735_v44 = vunpack.i.h.bf16 %v3733_v13  ;;  %v3734_v46 = vunpack.i.l.bf16 %v3733_v13 }
 0x3be   : > { %v3728_v25 = vpop.permute.xlu0 %3727 }
 0x3bf   : > { %v3730_v48 = vunpack.i.h.bf16 %v3728_v25  ;;  %v3729_v49 = vunpack.i.l.bf16 %v3728_v25 }
 0x3c1   : > { %v1579_v18 = vsel %vm1572_vm9, %v3729_v49, %v3734_v46  ;;  %v1580_v45 = vsel %vm1572_vm9, %v3730_v48, %v3735_v44 }
 0x3c2   : > { %v1599_v47 = vsel %vm4896_vm10, %v1579_v18, %v1542_v41  ;;  %v1602_v7 = vsel %vm4896_vm10, %v1580_v45, %v1545_v39 }
 0x3c3   : > { %v4908_v14 = vpack.i.bf16 %v1602_v7, %v1599_v47 }
 0x3c6   : > { %v3738_v54 = vpop.permute.xlu0 %3737 }
 0x3c7   : > { %v3740_v57 = vunpack.i.h.bf16 %v3738_v54  ;;  %v3739_v8 = vunpack.i.l.bf16 %v3738_v54  ;;  %v3718_v52 = vpop.permute.xlu1 %3717 }
 0x3c8   : > { %v3720_v2 = vunpack.i.h.bf16 %v3718_v52  ;;  %v3719_v9 = vunpack.i.l.bf16 %v3718_v52 }
 0x3c9   : > { %v1575_v12 = vsel %vm1572_vm9, %v3734_v46, %v3739_v8  ;;  %v1576_v62 = vsel %vm1572_vm9, %v3735_v44, %v3740_v57  ;;  %v1583_v63 = vsel %vm1572_vm9, %v3739_v8, %v3729_v49  ;;  %v1584_v50 = vsel %vm1572_vm9, %v3740_v57, %v3730_v48 }
 0x3ca   : > { %v1598_v10 = vsel %vm4910_vm11, %v1583_v63, %v4806_v58  ;;  %v1600_v51 = vsel %vm4914_vm12, %v1575_v12, %v1543_v19  ;;  %v1601_v1 = vsel %vm4910_vm11, %v1584_v50, %v4810_v61  ;;  %v4936_v4 = vsel %vm4914_vm12, %v1576_v62, %v1546_v15 }
 0x3cb   : > { %v1816_v36 = vpack.c.bf16 %v1599_v47, %v1598_v10  ;;  %v1817_v16 = vpack.c.bf16 %v1600_v51, %v1600_v51  ;;  %v1818_v28 = vpack.c.bf16 %v1602_v7, %v1601_v1  ;;  %v1819_v29 = vpack.c.bf16 %v4936_v4, %v4936_v4 }
 0x3cc   : > { %v1578_v58 = vsel %vm1572_vm9, %v3715_v11, %v3720_v2  ;;  %v1577_v19 = vsel %vm1572_vm9, %v3714_v59, %v3719_v9  ;;  %v4950_v21 = vpack.i.bf16 %v1601_v1, %v1598_v10  ;;  %v4953_v23 = vpack.i.bf16 %v4936_v4, %v1600_v51 }
 0x3cd   : > { %1824 = vst [vmem:[#allocation2 + $0xd8] sm:$0xff] %v1816_v36  ;;  %v1596_v61 = vsel %vm4896_vm10, %v1578_v58, %v4856_v31  ;;  %v1593_v20 = vsel %vm4896_vm10, %v1577_v19, %v4852_v27  ;;  %v2116_v19 = vld [vmem:[%s5486_s4] sm:$0xff] }
 0x3ce   : > { %1825 = vst [vmem:[#allocation2 + $0xe0] sm:$0xf] %v1817_v16  ;;  %v4955_v15 = vpack.i.bf16 %v1596_v61, %v1593_v20 }
 0x3cf   : > { %1826 = vst [vmem:[#allocation2 + $0xe4] sm:$0xff] %v1818_v28  ;;  %v3723_v34 = vpop.permute.xlu1 %3722 }
 0x3d0   : > { %1827 = vst [vmem:[#allocation2 + $0xec] sm:$0xf] %v1819_v29  ;;  %3747 = vrot.lane.b32.xlu1 %v4955_v15, %s4005_s8  ;;  %v3725_v3 = vunpack.i.h.bf16 %v3723_v34  ;;  %v3724_v31 = vunpack.i.l.bf16 %v3723_v34 }
 0x3d2   : > { %v1582_v35 = vsel %vm1572_vm9, %v3725_v3, %v3715_v11  ;;  %v1573_v27 = vsel %vm1572_vm9, %v3719_v9, %v3724_v31  ;;  %v1574_v0 = vsel %vm1572_vm9, %v3720_v2, %v3725_v3  ;;  %v1581_v30 = vsel %vm1572_vm9, %v3724_v31, %v3714_v59  ;;  %v2118_v59 = vld [vmem:[%s5486_s4 + $0x10] sm:$0xff] }
 0x3d3   : > { %v1595_v37 = vsel %vm4910_vm11, %v1582_v35, %v4847_v26  ;;  %v1592_v38 = vsel %vm4910_vm11, %v1581_v30, %v4840_v24  ;;  %v1594_v39 = vsel %vm4914_vm12, %v1573_v27, %v4879_v43  ;;  %v1597_v41 = vsel %vm4914_vm12, %v1574_v0, %v4884_v17 }
 0x3d4   : > { %v1812_v42 = vpack.c.bf16 %v1593_v20, %v1592_v38  ;;  %v1813_v32 = vpack.c.bf16 %v1594_v39, %v1594_v39  ;;  %v1814_v33 = vpack.c.bf16 %v1596_v61, %v1595_v37  ;;  %v1815_v5 = vpack.c.bf16 %v1597_v41, %v1597_v41  ;;  %v2117_v61 = vld [vmem:[%s5486_s4 + $0x8] sm:$0xff] }
 0x3d5   : > { %v4979_v6 = vpack.i.bf16 %v1595_v37, %v1592_v38  ;;  %v3761_v13 = vpack.i.bf16 %v1597_v41, %v1594_v39  ;;  %v3946_v24 = vpack.i.bf16 %v1597_v41, %v4936_v4  ;;  %v3831_v26 = vpack.i.bf16 %v1600_v51, %v1594_v39 }
 0x3d6   : > { %1820 = vst [vmem:[#allocation2 + $0xc0] sm:$0xff] %v1812_v42 }
 0x3d7   : > { %1821 = vst [vmem:[#allocation2 + $0xc8] sm:$0xf] %v1813_v32  ;;  %3742 = vrot.lane.b32.xlu2 %v4979_v6, %s4005_s8  ;;  %3762 = vrot.lane.b32.xlu0 %v3761_v13, %s4007_s10 }
 0x3d8   : > { %1822 = vst [vmem:[#allocation2 + $0xcc] sm:$0xff] %v1814_v33  ;;  %3752 = vrot.lane.b32.xlu1 %v4979_v6, %s4007_s10 }
 0x3d9   : > { %1823 = vst [vmem:[#allocation2 + $0xd4] sm:$0xf] %v1815_v5 }
 0x3df   : > { %3757 = vrot.lane.b32.xlu2 %v4955_v15, %s4007_s10  ;;  %3777 = vrot.lane.b32.xlu0 %v3761_v13, %s4008_s11 }
 0x3e0   : > { %3767 = vrot.lane.b32.xlu1 %v4979_v6, %s4008_s11 }
 0x3e7   : > { %3772 = vrot.lane.b32.xlu2 %v4955_v15, %s4008_s11  ;;  %3792 = vrot.lane.b32.xlu0 %v3761_v13, %s4009_s12 }
 0x3e8   : > { %3782 = vrot.lane.b32.xlu1 %v4979_v6, %s4009_s12 }
 0x3ef   : > { %3787 = vrot.lane.b32.xlu2 %v4955_v15, %s4009_s12  ;;  %3807 = vrot.lane.b32.xlu0 %v3761_v13, %s4010_s13 }
 0x3f0   : > { %3797 = vrot.lane.b32.xlu1 %v4979_v6, %s4010_s13 }
 0x3f7   : > { %3802 = vrot.lane.b32.xlu2 %v4955_v15, %s4010_s13  ;;  %3822 = vrot.lane.b32.xlu0 %v3761_v13, %s4011_s14 }
 0x3f8   : > { %3812 = vrot.lane.b32.xlu1 %v4979_v6, %s4011_s14 }
 0x3ff   : > { %3817 = vrot.lane.b32.xlu2 %v4955_v15, %s4011_s14  ;;  %3832 = vrot.lane.b32.xlu0 %v3831_v26, %s4005_s8 }
 0x400   : > { %3827 = vrot.lane.b32.xlu1 %v4979_v6, %s4012_s15 }
 0x407   : > { %3842 = vrot.lane.b32.xlu2 %v4908_v14, %s4005_s8  ;;  %3837 = vrot.lane.b32.xlu0 %v4950_v21, %s4005_s8 }
 0x408   : > { %3847 = vrot.lane.b32.xlu1 %v4950_v21, %s4007_s10 }
 0x40f   : > { %3852 = vrot.lane.b32.xlu2 %v4908_v14, %s4007_s10  ;;  %3857 = vrot.lane.b32.xlu0 %v4953_v23, %s4007_s10 }
 0x410   : > { %3862 = vrot.lane.b32.xlu1 %v4950_v21, %s4008_s11 }
 0x417   : > { %3867 = vrot.lane.b32.xlu2 %v4908_v14, %s4008_s11  ;;  %3872 = vrot.lane.b32.xlu0 %v4953_v23, %s4008_s11 }
 0x418   : > { %3877 = vrot.lane.b32.xlu1 %v4950_v21, %s4009_s12 }
 0x41f   : > { %3882 = vrot.lane.b32.xlu2 %v4908_v14, %s4009_s12  ;;  %3887 = vrot.lane.b32.xlu0 %v4953_v23, %s4009_s12 }
 0x420   : > { %3892 = vrot.lane.b32.xlu1 %v4950_v21, %s4010_s13 }
 0x427   : > { %3897 = vrot.lane.b32.xlu2 %v4908_v14, %s4010_s13  ;;  %3902 = vrot.lane.b32.xlu0 %v4953_v23, %s4010_s13 }
 0x428   : > { %3907 = vrot.lane.b32.xlu1 %v4950_v21, %s4011_s14 }
 0x42f   : > { %3912 = vrot.lane.b32.xlu2 %v4908_v14, %s4011_s14  ;;  %3917 = vrot.lane.b32.xlu0 %v4953_v23, %s4011_s14 }
 0x430   : > { %3922 = vrot.lane.b32.xlu1 %v4950_v21, %s4012_s15 }
 0x431   : > { %v5048_v43 = vpop.permute.xlu2 %3742 }
 0x432   : > { %v3745_v44 = vunpack.i.h.bf16 %v5048_v43 }
 0x437   : > { %3927 = vrot.lane.b32.xlu2 %v4908_v14, %s4012_s15  ;;  %3937 = vrot.lane.b32.xlu0 %v4953_v23, %s4012_s15 }
 0x438   : > { %3947 = vrot.lane.b32.xlu1 %v3946_v24, %s4005_s8 }
 0x439   : > { %v3758_v17 = vpop.permute.xlu2 %3757 }
 0x43a   : > { %v3760_v45 = vunpack.i.h.bf16 %v3758_v17  ;;  %v3759_v47 = vunpack.i.l.bf16 %v3758_v17 }
 0x43f   : > { %3932 = vrot.lane.b32.xlu2 %v4955_v15, %s4012_s15  ;;  %3942 = vrot.lane.b32.xlu0 %v3761_v13, %s4012_s15 }
 0x440   : > { %3972 = vrot.lane.b32.xlu1 %v4953_v23, %s4006_s9 }
 0x441   : > { %v3773_v60 = vpop.permute.xlu2 %3772 }
 0x442   : > { %v5060_v25 = vpop.permute.xlu1 %3747  ;;  %v3775_v10 = vunpack.i.h.bf16 %v3773_v60  ;;  %v3774_v51 = vunpack.i.l.bf16 %v3773_v60 }
 0x443   : > { %v3750_v46 = vunpack.i.h.bf16 %v5060_v25 }
 0x445   : > { %v5070_v48 = vsel %vm319_vm0, %v3745_v44, %v3750_v46 }
 0x447   : > { %3952 = vrot.lane.b32.xlu2 %v4950_v21, %s4006_s9  ;;  %3962 = vrot.lane.b32.xlu0 %v4908_v14, %s4006_s9 }
 0x448   : > { %3977 = vrot.lane.b32.xlu1 %v3761_v13, %s4006_s9 }
 0x449   : > { %v5077_v49 = vpop.permute.xlu2 %3787  ;;  %v3763_v18 = vpop.permute.xlu0 %3762 }
 0x44a   : > { %v3753_v7 = vpop.permute.xlu1 %3752  ;;  %v3765_v53 = vunpack.i.h.bf16 %v3763_v18  ;;  %v3764_v40 = vunpack.i.l.bf16 %v3763_v18  ;;  %v3790_v30 = vunpack.i.h.bf16 %v5077_v49  ;;  %v3789_v37 = vunpack.i.l.bf16 %v5077_v49 }
 0x44b   : > { %v3755_v54 = vunpack.i.h.bf16 %v3753_v7  ;;  %v3754_v55 = vunpack.i.l.bf16 %v3753_v7 }
 0x44c   : > { %v1785_v56 = vsel %vm478_vm2, %v3760_v45, %v3765_v53  ;;  %v1784_v57 = vsel %vm478_vm2, %v3759_v47, %v3764_v40 }
 0x44d   : > { %v1789_v14 = vsel %vm478_vm2, %v3755_v54, %v3760_v45  ;;  %v1788_v8 = vsel %vm478_vm2, %v3754_v55, %v3759_v47  ;;  %v1793_v52 = vsel %vm478_vm2, %v3765_v53, %v3755_v54  ;;  %v1799_v11 = vpack.c.bf16 %v1785_v56, %v1785_v56 }
 0x44e   : > { %v1798_v2 = vpack.c.bf16 %v1789_v14, %v1793_v52  ;;  %v1792_v9 = vsel %vm478_vm2, %v3764_v40, %v3754_v55  ;;  %v1797_v12 = vpack.c.bf16 %v1784_v57, %v1784_v57 }
 0x44f   : > { %1807 = vst [vmem:[#allocation2 + $0xa4] sm:$0xf] %v1799_v11  ;;  %v1796_v62 = vpack.c.bf16 %v1788_v8, %v1792_v9  ;;  %3957 = vrot.lane.b32.xlu2 %v4979_v6, %s4006_s9  ;;  %3967 = vrot.lane.b32.xlu0 %v4955_v15, %s4006_s9  ;;  %v2119_v6 = vld [vmem:[%s5486_s4 + $0x18] sm:$0xff] }
 0x450   : > { %1806 = vst [vmem:[#allocation2 + $0x9c] sm:$0xff] %v1798_v2  ;;  %2132 = vperm.xlu1 %3619, %v2118_v59  }
 0x451   : > { %1804 = vst [vmem:[#allocation2 + $0x90] sm:$0xff] %v1796_v62  ;;  %v5098_v63 = vpop.permute.xlu2 %3802  ;;  %v3778_v50 = vpop.permute.xlu0 %3777 }
 0x452   : > { %1805 = vst [vmem:[#allocation2 + $0x98] sm:$0xf] %v1797_v12  ;;  %v3768_v1 = vpop.permute.xlu1 %3767  ;;  %v3780_v4 = vunpack.i.h.bf16 %v3778_v50  ;;  %v3779_v36 = vunpack.i.l.bf16 %v3778_v50  ;;  %v3805_v53 = vunpack.i.h.bf16 %v5098_v63  ;;  %v3804_v40 = vunpack.i.l.bf16 %v5098_v63 }
 0x453   : > { %v3770_v16 = vunpack.i.h.bf16 %v3768_v1  ;;  %v3769_v28 = vunpack.i.l.bf16 %v3768_v1 }
 0x454   : > { %v1957_v29 = vsel %vm653_vm3, %v3775_v10, %v3780_v4  ;;  %v1956_v58 = vsel %vm653_vm3, %v3774_v51, %v3779_v36 }
 0x455   : > { %v1961_v20 = vsel %vm653_vm3, %v3770_v16, %v3775_v10  ;;  %v1960_v21 = vsel %vm653_vm3, %v3769_v28, %v3774_v51  ;;  %v1965_v23 = vsel %vm653_vm3, %v3780_v4, %v3770_v16  ;;  %v1964_v15 = vsel %vm653_vm3, %v3779_v36, %v3769_v28 }
 0x456   : > { %v1970_v34 = vpack.c.bf16 %v1957_v29, %v1961_v20  ;;  %v1971_v3 = vpack.c.bf16 %v1965_v23, %v1965_v23  ;;  %v1968_v31 = vpack.c.bf16 %v1956_v58, %v1960_v21  ;;  %v1969_v35 = vpack.c.bf16 %v1964_v15, %v1964_v15 }
 0x457   : > { %2122 = vperm.xlu2 %3620, %v2116_v19   ;;  %2127 = vperm.xlu0 %3618, %v2117_v61  }
 0x458   : > { %1978 = vst [vmem:[#allocation2 + $0x15c] sm:$0xff] %v1970_v34 }
 0x459   : > { %1979 = vst [vmem:[#allocation2 + $0x164] sm:$0xf] %v1971_v3  ;;  %v5118_v27 = vpop.permute.xlu2 %3817  ;;  %v3793_v0 = vpop.permute.xlu0 %3792 }
 0x45a   : > { %1976 = vst [vmem:[#allocation2 + $0x150] sm:$0xff] %v1968_v31  ;;  %v3783_v38 = vpop.permute.xlu1 %3782  ;;  %v3795_v39 = vunpack.i.h.bf16 %v3793_v0  ;;  %v3794_v41 = vunpack.i.l.bf16 %v3793_v0  ;;  %v3820_v1 = vunpack.i.h.bf16 %v5118_v27  ;;  %v3819_v4 = vunpack.i.l.bf16 %v5118_v27 }
 0x45b   : > { %1977 = vst [vmem:[#allocation2 + $0x158] sm:$0xf] %v1969_v35  ;;  %v3785_v42 = vunpack.i.h.bf16 %v3783_v38  ;;  %v3784_v32 = vunpack.i.l.bf16 %v3783_v38  ;;  %v3749_v27 = vunpack.i.l.bf16 %v5060_v25 }
 0x45c   : > { %v1733_v33 = vsel %vm425_vm4, %v3790_v30, %v3795_v39  ;;  %v1732_v5 = vsel %vm425_vm4, %v3789_v37, %v3794_v41 }
 0x45d   : > { %v1737_v13 = vsel %vm425_vm4, %v3785_v42, %v3790_v30  ;;  %v1736_v24 = vsel %vm425_vm4, %v3784_v32, %v3789_v37  ;;  %v1741_v26 = vsel %vm425_vm4, %v3795_v39, %v3785_v42  ;;  %v1747_v17 = vpack.c.bf16 %v1733_v33, %v1733_v33 }
 0x45e   : > { %v1746_v60 = vpack.c.bf16 %v1737_v13, %v1741_v26  ;;  %v1740_v49 = vsel %vm425_vm4, %v3794_v41, %v3784_v32  ;;  %v1745_v18 = vpack.c.bf16 %v1732_v5, %v1732_v5  ;;  %v3744_v30 = vunpack.i.l.bf16 %v5048_v43 }
 0x45f   : > { %1755 = vst [vmem:[#allocation2 + $0x74] sm:$0xf] %v1747_v17  ;;  %v1744_v45 = vpack.c.bf16 %v1736_v24, %v1740_v49  ;;  %2137 = vperm.xlu2 %3620, %v2119_v6  }
 0x460   : > { %1754 = vst [vmem:[#allocation2 + $0x6c] sm:$0xff] %v1746_v60  ;;  %v1632_v32 = vsel %vm319_vm0, %v3744_v30, %v3749_v27 }
 0x461   : > { %1752 = vst [vmem:[#allocation2 + $0x60] sm:$0xff] %v1744_v45  ;;  %v5137_v47 = vpop.permute.xlu2 %3842  ;;  %v3808_v7 = vpop.permute.xlu0 %3807 }
 0x462   : > { %1753 = vst [vmem:[#allocation2 + $0x68] sm:$0xf] %v1745_v18  ;;  %v3798_v54 = vpop.permute.xlu1 %3797  ;;  %v3810_v55 = vunpack.i.h.bf16 %v3808_v7  ;;  %v3809_v56 = vunpack.i.l.bf16 %v3808_v7  ;;  %v3844_v37 = vunpack.i.l.bf16 %v5137_v47 }
 0x463   : > { %v3800_v57 = vunpack.i.h.bf16 %v3798_v54  ;;  %v3799_v14 = vunpack.i.l.bf16 %v3798_v54 }
 0x464   : > { %v1905_v8 = vsel %vm600_vm5, %v3805_v53, %v3810_v55  ;;  %v1904_v52 = vsel %vm600_vm5, %v3804_v40, %v3809_v56 }
 0x465   : > { %v1909_v11 = vsel %vm600_vm5, %v3800_v57, %v3805_v53  ;;  %v1908_v59 = vsel %vm600_vm5, %v3799_v14, %v3804_v40  ;;  %v1913_v2 = vsel %vm600_vm5, %v3810_v55, %v3800_v57  ;;  %v1912_v9 = vsel %vm600_vm5, %v3809_v56, %v3799_v14 }
 0x466   : > { %v1918_v12 = vpack.c.bf16 %v1905_v8, %v1909_v11  ;;  %v1919_v62 = vpack.c.bf16 %v1913_v2, %v1913_v2  ;;  %v1916_v63 = vpack.c.bf16 %v1904_v52, %v1908_v59  ;;  %v1917_v50 = vpack.c.bf16 %v1912_v9, %v1912_v9 }
 0x468   : > { %1926 = vst [vmem:[#allocation2 + $0x12c] sm:$0xff] %v1918_v12 }
 0x469   : > { %1927 = vst [vmem:[#allocation2 + $0x134] sm:$0xf] %v1919_v62  ;;  %v5153_v10 = vpop.permute.xlu2 %3852  ;;  %v3823_v51 = vpop.permute.xlu0 %3822 }
 0x46a   : > { %1924 = vst [vmem:[#allocation2 + $0x120] sm:$0xff] %v1916_v63  ;;  %v3813_v36 = vpop.permute.xlu1 %3812  ;;  %v3825_v16 = vunpack.i.h.bf16 %v3823_v51  ;;  %v3824_v28 = vunpack.i.l.bf16 %v3823_v51  ;;  %v3855_v54 = vunpack.i.h.bf16 %v5153_v10  ;;  %v3854_v57 = vunpack.i.l.bf16 %v5153_v10 }
 0x46b   : > { %1925 = vst [vmem:[#allocation2 + $0x128] sm:$0xf] %v1917_v50  ;;  %v3815_v29 = vunpack.i.h.bf16 %v3813_v36  ;;  %v3814_v58 = vunpack.i.l.bf16 %v3813_v36 }
 0x46c   : > { %v1681_v19 = vsel %vm372_vm7, %v3820_v1, %v3825_v16  ;;  %v1680_v61 = vsel %vm372_vm7, %v3819_v4, %v3824_v28 }
 0x46d   : > { %v1685_v20 = vsel %vm372_vm7, %v3815_v29, %v3820_v1  ;;  %v1684_v21 = vsel %vm372_vm7, %v3814_v58, %v3819_v4  ;;  %v1689_v23 = vsel %vm372_vm7, %v3825_v16, %v3815_v29  ;;  %v1695_v15 = vpack.c.bf16 %v1681_v19, %v1681_v19 }
 0x46e   : > { %v1694_v34 = vpack.c.bf16 %v1685_v20, %v1689_v23  ;;  %v1688_v3 = vsel %vm372_vm7, %v3824_v28, %v3814_v58  ;;  %v1693_v31 = vpack.c.bf16 %v1680_v61, %v1680_v61 }
 0x46f   : > { %1703 = vst [vmem:[#allocation2 + $0x44] sm:$0xf] %v1695_v15  ;;  %v1692_v35 = vpack.c.bf16 %v1684_v21, %v1688_v3 }
 0x470   : > { %1702 = vst [vmem:[#allocation2 + $0x3c] sm:$0xff] %v1694_v34 }
 0x471   : > { %1700 = vst [vmem:[#allocation2 + $0x30] sm:$0xff] %v1692_v35  ;;  %v3833_v0 = vpop.permute.xlu0 %3832  ;;  %v3868_v38 = vpop.permute.xlu2 %3867 }
 0x472   : > { %1701 = vst [vmem:[#allocation2 + $0x38] sm:$0xf] %v1693_v31  ;;  %v5172_v39 = vpop.permute.xlu1 %3827  ;;  %v3835_v41 = vunpack.i.h.bf16 %v3833_v0  ;;  %v3834_v42 = vunpack.i.l.bf16 %v3833_v0  ;;  %v3870_v36 = vunpack.i.h.bf16 %v3868_v38  ;;  %v3869_v29 = vunpack.i.l.bf16 %v3868_v38 }
 0x474   : > { %v1630_v33 = vsel %vm319_vm0, %v3844_v37, %v3835_v41  ;;  %v1628_v5 = vsel %vm319_vm0, %v3749_v27, %v3834_v42  ;;  %v1636_v6 = vsel %vm319_vm0, %v3834_v42, %v3744_v30  ;;  %v3313_v42 = vld [vmem:[#allocation2 + $0x98] sm:$0xf0] }
 0x475   : > { %v1645_v13 = vpack.c.bf16 %v1630_v33, %v1630_v33  ;;  %v1640_v24 = vpack.c.bf16 %v1632_v32, %v1636_v6  ;;  %v1641_v26 = vpack.c.bf16 %v1628_v5, %v1628_v5 }
 0x477   : > { %1653 = vst [vmem:[#allocation2 + $0x20] sm:$0xf] %v1645_v13 }
 0x478   : > { %1648 = vst [vmem:[#allocation2] sm:$0xff] %v1640_v24 }
 0x479   : > { %1649 = vst [vmem:[#allocation2 + $0x8] sm:$0xf] %v1641_v26  ;;  %v5182_v17 = vpop.permute.xlu0 %3837  ;;  %v5185_v18 = vpop.permute.xlu2 %3882 }
 0x47a   : > { %v3848_v60 = vpop.permute.xlu1 %3847  ;;  %v3839_v49 = vunpack.i.l.bf16 %v5182_v17  ;;  %v3885_v6 = vunpack.i.h.bf16 %v5185_v18 }
 0x47b   : > { %v3850_v40 = vunpack.i.h.bf16 %v3848_v60  ;;  %v3849_v55 = vunpack.i.l.bf16 %v3848_v60 }
 0x47c   : > { %v1634_v45 = vsel %vm319_vm0, %v3839_v49, %v3844_v37  ;;  %v1638_v7 = vsel %vm319_vm0, %v3835_v41, %v3839_v49  ;;  %v3078_v41 = vld [vmem:[#allocation2 + $0x90] sm:$0xf]  ;;  %v3884_v49 = vunpack.i.l.bf16 %v5185_v18 }
 0x47d   : > { %v1644_v53 = vpack.c.bf16 %v1634_v45, %v1638_v7  ;;  %v1791_v11 = vsel %vm478_vm2, %v3850_v40, %v3855_v54  ;;  %v1790_v62 = vsel %vm478_vm2, %v3849_v55, %v3854_v57 }
 0x47f   : > { %1652 = vst [vmem:[#allocation2 + $0x18] sm:$0xff] %v1644_v53 }
 0x481   : > { %v3858_v56 = vpop.permute.xlu0 %3857  ;;  %v5205_v10 = vpop.permute.xlu2 %3897 }
 0x482   : > { %v3863_v14 = vpop.permute.xlu1 %3862  ;;  %v3860_v8 = vunpack.i.h.bf16 %v3858_v56  ;;  %v3859_v52 = vunpack.i.l.bf16 %v3858_v56  ;;  %v3079_v56 = vor.u32 %v3313_v42, %v3078_v41  ;;  %v3054_v42 = vld [vmem:[#allocation2 + $0x60] sm:$0xf] }
 0x483   : > { %v3865_v4 = vunpack.i.h.bf16 %v3863_v14  ;;  %v3864_v16 = vunpack.i.l.bf16 %v3863_v14 }
 0x484   : > { %v1787_v59 = vsel %vm478_vm2, %v3855_v54, %v3860_v8  ;;  %v1795_v2 = vsel %vm478_vm2, %v3860_v8, %v3850_v40  ;;  %v1786_v9 = vsel %vm478_vm2, %v3854_v57, %v3859_v52  ;;  %v1794_v12 = vsel %vm478_vm2, %v3859_v52, %v3849_v55  ;;  %v3312_v40 = vld [vmem:[#allocation2 + $0x94] sm:$0xf]  ;;  %v3080_v54 = vld [vmem:[#allocation2 + $0x9c] sm:$0xf0] }
 0x485   : > { %v1802_v63 = vpack.c.bf16 %v1791_v11, %v1795_v2  ;;  %v1803_v50 = vpack.c.bf16 %v1787_v59, %v1787_v59  ;;  %v1800_v51 = vpack.c.bf16 %v1790_v62, %v1794_v12  ;;  %v1801_v1 = vpack.c.bf16 %v1786_v9, %v1786_v9 }
 0x486   : > { %v1963_v20 = vsel %vm653_vm3, %v3865_v4, %v3870_v36  ;;  %v1962_v3 = vsel %vm653_vm3, %v3864_v16, %v3869_v29  ;;  %v3083_v2 = vor.u32 %v3312_v40, %v3080_v54  ;;  %v3306_v54 = vld [vmem:[#allocation2 + $0x64] sm:$0xf] }
 0x487   : > { %1810 = vst [vmem:[#allocation2 + $0xb4] sm:$0xff] %v1802_v63 }
 0x488   : > { %1811 = vst [vmem:[#allocation2 + $0xbc] sm:$0xf] %v1803_v50 }
 0x489   : > { %1808 = vst [vmem:[#allocation2 + $0xa8] sm:$0xff] %v1800_v51  ;;  %v3873_v28 = vpop.permute.xlu0 %3872  ;;  %v5219_v32 = vpop.permute.xlu2 %3912 }
 0x48a   : > { %1809 = vst [vmem:[#allocation2 + $0xb0] sm:$0xf] %v1801_v1  ;;  %v3878_v58 = vpop.permute.xlu1 %3877  ;;  %v3875_v19 = vunpack.i.h.bf16 %v3873_v28  ;;  %v3874_v61 = vunpack.i.l.bf16 %v3873_v28 }
 0x48b   : > { %v3880_v38 = vunpack.i.h.bf16 %v3878_v58  ;;  %v3879_v13 = vunpack.i.l.bf16 %v3878_v58 }
 0x48c   : > { %v1959_v21 = vsel %vm653_vm3, %v3870_v36, %v3875_v19  ;;  %v1967_v23 = vsel %vm653_vm3, %v3875_v19, %v3865_v4  ;;  %v1958_v15 = vsel %vm653_vm3, %v3869_v29, %v3874_v61  ;;  %v1966_v34 = vsel %vm653_vm3, %v3874_v61, %v3864_v16  ;;  %v3174_v19 = vld [vmem:[#allocation2 + $0x150] sm:$0xf]  ;;  %v3337_v61 = vld [vmem:[#allocation2 + $0x158] sm:$0xf0] }
 0x48d   : > { %v1974_v31 = vpack.c.bf16 %v1959_v21, %v1963_v20  ;;  %v1975_v35 = vpack.c.bf16 %v1967_v23, %v1967_v23  ;;  %v1972_v27 = vpack.c.bf16 %v1958_v15, %v1962_v3  ;;  %v1973_v0 = vpack.c.bf16 %v1966_v34, %v1966_v34 }
 0x48e   : > { %v3316_v30 = vld [vmem:[#allocation2 + $0xb0] sm:$0xf0]  ;;  %v3092_v37 = vld [vmem:[#allocation2 + $0xb4] sm:$0xf0]  ;;  %v1739_v55 = vsel %vm425_vm4, %v3880_v38, %v3885_v6  ;;  %v1738_v52 = vsel %vm425_vm4, %v3879_v13, %v3884_v49  ;;  %v3900_v4 = vunpack.i.h.bf16 %v5205_v10  ;;  %v3899_v20 = vunpack.i.l.bf16 %v5205_v10 }
 0x48f   : > { %1982 = vst [vmem:[#allocation2 + $0x174] sm:$0xff] %v1974_v31  ;;  %v3175_v31 = vor.u32 %v3337_v61, %v3174_v19 }
 0x490   : > { %1983 = vst [vmem:[#allocation2 + $0x17c] sm:$0xf] %v1975_v35  ;;  %v3090_v33 = vld [vmem:[#allocation2 + $0xa8] sm:$0xf]  ;;  %v3315_v5 = vld [vmem:[#allocation2 + $0xac] sm:$0xf] }
 0x491   : > { %1980 = vst [vmem:[#allocation2 + $0x168] sm:$0xff] %v1972_v27  ;;  %v3888_v24 = vpop.permute.xlu0 %3887  ;;  %v3091_v26 = vor.u32 %v3316_v30, %v3090_v33  ;;  %v3095_v60 = vor.u32 %v3315_v5, %v3092_v37  ;;  %v5236_v36 = vpop.permute.xlu2 %3927  ;;  %v3307_v33 = vld [vmem:[#allocation2 + $0x68] sm:$0xf0] }
 0x492   : > { %1981 = vst [vmem:[#allocation2 + $0x170] sm:$0xf] %v1973_v0  ;;  %v3893_v45 = vpop.permute.xlu1 %3892  ;;  %v3890_v7 = vunpack.i.h.bf16 %v3888_v24  ;;  %v3889_v53 = vunpack.i.l.bf16 %v3888_v24  ;;  %v3930_v19 = vunpack.i.h.bf16 %v5236_v36 }
 0x493   : > { %2464 = vmatpush.bf16.msra.mxu0 %v3091_v26  ;;  %2521 = vmatpush.bf16.msrb.mxu2 %v3095_v60  ;;  %v3895_v63 = vunpack.i.h.bf16 %v3893_v45  ;;  %v3894_v16 = vunpack.i.l.bf16 %v3893_v45  ;;  %v3914_v45 = vunpack.i.l.bf16 %v5219_v32 }
 0x494   : > { %v1735_v57 = vsel %vm425_vm4, %v3885_v6, %v3890_v7  ;;  %v1743_v14 = vsel %vm425_vm4, %v3890_v7, %v3880_v38  ;;  %v1734_v18 = vsel %vm425_vm4, %v3884_v49, %v3889_v53  ;;  %v1742_v8 = vsel %vm425_vm4, %v3889_v53, %v3879_v13 }
 0x495   : > { %v1750_v11 = vpack.c.bf16 %v1739_v55, %v1743_v14  ;;  %v1751_v59 = vpack.c.bf16 %v1735_v57, %v1735_v57  ;;  %v1748_v9 = vpack.c.bf16 %v1738_v52, %v1742_v8  ;;  %v1749_v12 = vpack.c.bf16 %v1734_v18, %v1734_v18  ;;  %v3056_v55 = vld [vmem:[#allocation2 + $0x6c] sm:$0xf0] }
 0x496   : > { %v3340_v62 = vld [vmem:[#allocation2 + $0x170] sm:$0xf0]  ;;  %v1911_v21 = vsel %vm600_vm5, %v3895_v63, %v3900_v4  ;;  %v1910_v35 = vsel %vm600_vm5, %v3894_v16, %v3899_v20  ;;  %v3915_v13 = vunpack.i.h.bf16 %v5219_v32  ;;  %v3055_v57 = vor.u32 %v3307_v33, %v3054_v42 }
 0x497   : > { %1758 = vst [vmem:[#allocation2 + $0x84] sm:$0xff] %v1750_v11  ;;  %2465 = vmatpush.bf16.msra.mxu0 %v3079_v56  ;;  %2522 = vmatpush.bf16.msrb.mxu2 %v3083_v2  ;;  %v3829_v42 = vunpack.i.l.bf16 %v5172_v39 }
 0x498   : > { %1759 = vst [vmem:[#allocation2 + $0x8c] sm:$0xf] %v1751_v59  ;;  %v3186_v50 = vld [vmem:[#allocation2 + $0x168] sm:$0xf] }
 0x499   : > { %1756 = vst [vmem:[#allocation2 + $0x78] sm:$0xff] %v1748_v9  ;;  %v3903_v51 = vpop.permute.xlu0 %3902  ;;  %v3187_v1 = vor.u32 %v3340_v62, %v3186_v50  ;;  %v5257_v14 = vpop.permute.xlu2 %3932  ;;  %v3059_v9 = vor.u32 %v3306_v54, %v3056_v55  ;;  %v3150_v50 = vld [vmem:[#allocation2 + $0x120] sm:$0xf] }
 0x49a   : > { %1757 = vst [vmem:[#allocation2 + $0x80] sm:$0xf] %v1749_v12  ;;  %v3908_v28 = vpop.permute.xlu1 %3907  ;;  %v3905_v29 = vunpack.i.h.bf16 %v3903_v51  ;;  %v3904_v58 = vunpack.i.l.bf16 %v3903_v51  ;;  %v3331_v51 = vld [vmem:[#allocation2 + $0x128] sm:$0xf0] }
 0x49b   : > { %2483 = vmatpush.bf16.msra.mxu1 %v3187_v1  ;;  %v3910_v37 = vunpack.i.h.bf16 %v3908_v28  ;;  %v3909_v24 = vunpack.i.l.bf16 %v3908_v28  ;;  %v3840_v1 = vunpack.i.h.bf16 %v5182_v17 }
 0x49c   : > { %v1907_v23 = vsel %vm600_vm5, %v3900_v4, %v3905_v29  ;;  %v1915_v15 = vsel %vm600_vm5, %v3905_v29, %v3895_v63  ;;  %v1906_v27 = vsel %vm600_vm5, %v3899_v20, %v3904_v58  ;;  %v1914_v10 = vsel %vm600_vm5, %v3904_v58, %v3894_v16 }
 0x49d   : > { %v1922_v34 = vpack.c.bf16 %v1907_v23, %v1911_v21  ;;  %v1923_v3 = vpack.c.bf16 %v1915_v15, %v1915_v15  ;;  %v1920_v38 = vpack.c.bf16 %v1906_v27, %v1910_v35  ;;  %v1921_v41 = vpack.c.bf16 %v1914_v10, %v1914_v10 }
 0x49e   : > { %v3310_v0 = vld [vmem:[#allocation2 + $0x80] sm:$0xf0]  ;;  %v3068_v30 = vld [vmem:[#allocation2 + $0x84] sm:$0xf0]  ;;  %v1687_v56 = vsel %vm372_vm7, %v3910_v37, %v3915_v13  ;;  %v1686_v11 = vsel %vm372_vm7, %v3909_v24, %v3914_v45  ;;  %v3845_v16 = vunpack.i.h.bf16 %v5137_v47  ;;  %v3830_v58 = vunpack.i.h.bf16 %v5172_v39 }
 0x49f   : > { %1930 = vst [vmem:[#allocation2 + $0x144] sm:$0xff] %v1922_v34  ;;  %2484 = vmatpush.bf16.msra.mxu1 %v3175_v31  ;;  %v3151_v21 = vor.u32 %v3331_v51, %v3150_v50 }
 0x4a0   : > { %1931 = vst [vmem:[#allocation2 + $0x14c] sm:$0xf] %v1923_v3  ;;  %v3066_v5 = vld [vmem:[#allocation2 + $0x78] sm:$0xf]  ;;  %v3309_v6 = vld [vmem:[#allocation2 + $0x7c] sm:$0xf]  ;;  %v1635_v47 = vsel %vm319_vm0, %v3840_v1, %v3845_v16  ;;  %v3929_v3 = vunpack.i.l.bf16 %v5236_v36 }
 0x4a1   : > { %1928 = vst [vmem:[#allocation2 + $0x138] sm:$0xff] %v1920_v38  ;;  %v3918_v26 = vpop.permute.xlu0 %3917  ;;  %v3067_v60 = vor.u32 %v3310_v0, %v3066_v5  ;;  %v3071_v49 = vor.u32 %v3309_v6, %v3068_v30  ;;  %v5292_v30 = vpop.permute.xlu2 %3952  ;;  %v3301_v6 = vld [vmem:[#allocation2 + $0x38] sm:$0xf0] }
 0x4a2   : > { %1929 = vst [vmem:[#allocation2 + $0x140] sm:$0xf] %v1921_v41  ;;  %v5253_v7 = vpop.permute.xlu1 %3922  ;;  %v3920_v53 = vunpack.i.h.bf16 %v3918_v26  ;;  %v3919_v40 = vunpack.i.l.bf16 %v3918_v26 }
 0x4a3   : > { %2466 = vmatpush.bf16.msra.mxu0 %v3067_v60  ;;  %2523 = vmatpush.bf16.msrb.mxu2 %v3071_v49  ;;  %v3925_v23 = vunpack.i.h.bf16 %v5253_v7  ;;  %v3924_v31 = vunpack.i.l.bf16 %v5253_v7 }
 0x4a4   : > { %v1683_v18 = vsel %vm372_vm7, %v3915_v13, %v3920_v53  ;;  %v1691_v32 = vsel %vm372_vm7, %v3920_v53, %v3910_v37  ;;  %v1682_v8 = vsel %vm372_vm7, %v3914_v45, %v3919_v40  ;;  %v1690_v52 = vsel %vm372_vm7, %v3919_v40, %v3909_v24  ;;  %v3032_v13 = vld [vmem:[#allocation2 + $0x3c] sm:$0xf0] }
 0x4a5   : > { %v1698_v59 = vpack.c.bf16 %v1687_v56, %v1691_v32  ;;  %v1699_v2 = vpack.c.bf16 %v1683_v18, %v1683_v18  ;;  %v1696_v12 = vpack.c.bf16 %v1686_v11, %v1690_v52  ;;  %v1697_v62 = vpack.c.bf16 %v1682_v8, %v1682_v8  ;;  %v3030_v56 = vld [vmem:[#allocation2 + $0x30] sm:$0xf] }
 0x4a6   : > { %v3334_v63 = vld [vmem:[#allocation2 + $0x140] sm:$0xf0]  ;;  %v3934_v24 = vunpack.i.l.bf16 %v5257_v14  ;;  %v1858_v7 = vsel %vm547_vm8, %v3924_v31, %v3929_v3  ;;  %v3955_v18 = vunpack.i.h.bf16 %v5292_v30  ;;  %v3954_v11 = vunpack.i.l.bf16 %v5292_v30 }
 0x4a7   : > { %1706 = vst [vmem:[#allocation2 + $0x54] sm:$0xff] %v1698_v59  ;;  %2467 = vmatpush.bf16.msra.mxu0 %v3055_v57  ;;  %2524 = vmatpush.bf16.msrb.mxu2 %v3059_v9  ;;  %v3300_v57 = vld [vmem:[#allocation2 + $0x34] sm:$0xf] }
 0x4a8   : > { %1707 = vst [vmem:[#allocation2 + $0x5c] sm:$0xf] %v1699_v2  ;;  %v3162_v4 = vld [vmem:[#allocation2 + $0x138] sm:$0xf]  ;;  %v3035_v50 = vor.u32 %v3300_v57, %v3032_v13  ;;  %v3294_v57 = vld [vmem:[#allocation2 + $0x4] sm:$0xf] }
 0x4a9   : > { %1704 = vst [vmem:[#allocation2 + $0x48] sm:$0xff] %v1696_v12  ;;  %v3938_v28 = vpop.permute.xlu0 %3937  ;;  %v3163_v29 = vor.u32 %v3334_v63, %v3162_v4  ;;  %v3031_v63 = vor.u32 %v3301_v6, %v3030_v56  ;;  %v3341_v6 = vld [vmem:[#allocation2 + $0x178] sm:$0xf0]  ;;  %v3006_v56 = vld [vmem:[#allocation2] sm:$0xf] }
 0x4aa   : > { %1705 = vst [vmem:[#allocation2 + $0x50] sm:$0xf] %v1697_v62  ;;  %v3948_v61 = vpop.permute.xlu1 %3947  ;;  %v3940_v20 = vunpack.i.h.bf16 %v3938_v28  ;;  %v3939_v17 = vunpack.i.l.bf16 %v3938_v28 }
 0x4ab   : > { %v3950_v15 = vunpack.i.h.bf16 %v3948_v61  ;;  %v3949_v34 = vunpack.i.l.bf16 %v3948_v61  ;;  %2485 = vmatpush.bf16.msra.mxu1 %v3163_v29 }
 0x4ac   : > { %v1855_v35 = vsel %vm547_vm8, %v3930_v19, %v3940_v20  ;;  %v1854_v5 = vsel %vm547_vm8, %v3929_v3, %v3939_v17  ;;  %v1862_v60 = vsel %vm547_vm8, %v3939_v17, %v3924_v31 }
 0x4ad   : > { %v1637_v27 = vsel %vm319_vm0, %v3950_v15, %v3745_v44  ;;  %v1629_v10 = vsel %vm319_vm0, %v3750_v46, %v3950_v15  ;;  %v1631_v0 = vsel %vm319_vm0, %v3845_v16, %v3949_v34  ;;  %v1639_v36 = vsel %vm319_vm0, %v3949_v34, %v3840_v1  ;;  %v3297_v15 = vld [vmem:[#allocation2 + $0x1c] sm:$0xf] }
 0x4ae   : > { %v1642_v37 = vpack.c.bf16 %v5070_v48, %v1637_v27  ;;  %v1643_v38 = vpack.c.bf16 %v1629_v10, %v1629_v10  ;;  %v1646_v43 = vpack.c.bf16 %v1635_v47, %v1639_v36  ;;  %v1863_v44 = vsel %vm547_vm8, %v3940_v20, %v3925_v23  ;;  %v3304_v41 = vld [vmem:[#allocation2 + $0x50] sm:$0xf0]  ;;  %v3044_v25 = vld [vmem:[#allocation2 + $0x54] sm:$0xf0]  ;;  %v5330_v20 = vpop.permute.xlu2 %3957 }
 0x4af   : > { %v1859_v46 = vsel %vm547_vm8, %v3925_v23, %v3930_v19  ;;  %v1647_v33 = vpack.c.bf16 %v1631_v0, %v1631_v0  ;;  %2486 = vmatpush.bf16.msra.mxu1 %v3151_v21  ;;  %v3935_v48 = vunpack.i.h.bf16 %v5257_v14  ;;  %v1871_v53 = vpack.c.bf16 %v1863_v44, %v1863_v44  ;;  %v3018_v23 = vld [vmem:[#allocation2 + $0x18] sm:$0xf] }
 0x4b0   : > { %1650 = vst [vmem:[#allocation2 + $0xc] sm:$0xff] %v1642_v37  ;;  %v1870_v26 = vpack.c.bf16 %v1855_v35, %v1859_v46  ;;  %v3042_v49 = vld [vmem:[#allocation2 + $0x48] sm:$0xf]  ;;  %v3303_v45 = vld [vmem:[#allocation2 + $0x4c] sm:$0xf]  ;;  %v1868_v14 = vpack.c.bf16 %v1854_v5, %v1858_v7  ;;  %v1869_v59 = vpack.c.bf16 %v1862_v60, %v1862_v60  ;;  %v3960_v36 = vunpack.i.h.bf16 %v5330_v20 }
 0x4b1   : > { %1651 = vst [vmem:[#allocation2 + $0x14] sm:$0xf] %v1643_v38  ;;  %v3943_v40 = vpop.permute.xlu0 %3942  ;;  %v3043_v54 = vor.u32 %v3304_v41, %v3042_v49  ;;  %v3047_v55 = vor.u32 %v3303_v45, %v3044_v25  ;;  %v1857_v51 = vsel %vm547_vm8, %v3830_v58, %v3935_v48  ;;  %v3959_v30 = vunpack.i.l.bf16 %v5330_v20  ;;  %v3188_v5 = vld [vmem:[#allocation2 + $0x174] sm:$0xf0]  ;;  %v3322_v20 = vld [vmem:[#allocation2 + $0xe0] sm:$0xf0] }
 0x4b2   : > { %1654 = vst [vmem:[#allocation2 + $0x24] sm:$0xff] %v1646_v43  ;;  %v3973_v32 = vpop.permute.xlu1 %3972  ;;  %v3945_v8 = vunpack.i.h.bf16 %v3943_v40  ;;  %v3944_v52 = vunpack.i.l.bf16 %v3943_v40  ;;  %v3194_v40 = vld [vmem:[#allocation2 + $0x170] sm:$0xf] }
 0x4b3   : > { %1655 = vst [vmem:[#allocation2 + $0x2c] sm:$0xf] %v1647_v33  ;;  %v3975_v2 = vunpack.i.h.bf16 %v3973_v32  ;;  %v3974_v9 = vunpack.i.l.bf16 %v3973_v32  ;;  %2468 = vmatpush.bf16.msra.mxu0 %v3043_v54  ;;  %2525 = vmatpush.bf16.msrb.mxu2 %v3047_v55  ;;  %v3339_v33 = vld [vmem:[#allocation2 + $0x16c] sm:$0xf]  ;;  %v2982_v54 = vld [vmem:[%s5485_s3] sm:$0xf] }
 0x4b4   : > { %1878 = vst [vmem:[#allocation2 + $0x114] sm:$0xff] %v1870_v26  ;;  %v1853_v12 = vsel %vm547_vm8, %v3935_v48, %v3945_v8  ;;  %v1861_v62 = vsel %vm547_vm8, %v3945_v8, %v3830_v58  ;;  %v1852_v16 = vsel %vm547_vm8, %v3934_v24, %v3944_v52  ;;  %v1860_v39 = vsel %vm547_vm8, %v3944_v52, %v3829_v42  ;;  %v3289_v55 = vld [vmem:[%s5485_s3 + $0x8] sm:$0xf0]  ;;  %v3336_v32 = vld [vmem:[#allocation2 + $0x154] sm:$0xf] }
 0x4b5   : > { %1879 = vst [vmem:[#allocation2 + $0x11c] sm:$0xf] %v1871_v53  ;;  %v2019_v1 = vsel %vm706_vm1, %v3975_v2, %v3955_v18  ;;  %v2018_v4 = vsel %vm706_vm1, %v3974_v9, %v3954_v11  ;;  %v1866_v19 = vpack.c.bf16 %v1853_v12, %v1857_v51  ;;  %v1856_v58 = vsel %vm547_vm8, %v3829_v42, %v3934_v24  ;;  %v3176_v8 = vld [vmem:[#allocation2 + $0x15c] sm:$0xf0]  ;;  %v3182_v51 = vld [vmem:[#allocation2 + $0x158] sm:$0xf] }
 0x4b6   : > { %1876 = vst [vmem:[#allocation2 + $0x108] sm:$0xff] %v1868_v14  ;;  %v2027_v28 = vpack.c.bf16 %v2019_v1, %v2019_v1  ;;  %v2025_v29 = vpack.c.bf16 %v2018_v4, %v2018_v4  ;;  %v1867_v61 = vpack.c.bf16 %v1861_v62, %v1861_v62  ;;  %v1864_v21 = vpack.c.bf16 %v1852_v16, %v1856_v58  ;;  %v3338_v1 = vld [vmem:[#allocation2 + $0x160] sm:$0xf0] }
 0x4b7   : > { %1877 = vst [vmem:[#allocation2 + $0x110] sm:$0xf] %v1869_v59  ;;  %2469 = vmatpush.bf16.msra.mxu0 %v3031_v63  ;;  %2526 = vmatpush.bf16.msrb.mxu2 %v3035_v50  ;;  %v1865_v34 = vpack.c.bf16 %v1860_v39, %v1860_v39  ;;  %v3295_v46 = vld [vmem:[#allocation2 + $0x8] sm:$0xf0]  ;;  %v3008_v49 = vld [vmem:[#allocation2 + $0xc] sm:$0xf0]  ;;  %v5356_v52 = vor.u32 %v3339_v33, %v3188_v5 }
 0x4b8   : > { %2035 = vst [vmem:[#allocation2 + $0x1ac] sm:$0xf] %v2027_v28  ;;  %v3011_v14 = vor.u32 %v3294_v57, %v3008_v49  ;;  %v5358_v59 = vor.u32 %v3289_v55, %v2982_v54  ;;  %v5361_v50 = vor.u32 %v3336_v32, %v3176_v8  ;;  %v3292_v5 = vld [vmem:[%s5485_s3 + $0x20] sm:$0xf0] }
 0x4b9   : > { %2033 = vst [vmem:[#allocation2 + $0x1a0] sm:$0xf] %v2025_v29  ;;  %v3963_v17 = vpop.permute.xlu0 %3962  ;;  %v3298_v47 = vld [vmem:[#allocation2 + $0x20] sm:$0xf0]  ;;  %v3020_v3 = vld [vmem:[#allocation2 + $0x24] sm:$0xf0] }
 0x4ba   : > { %1874 = vst [vmem:[#allocation2 + $0xfc] sm:$0xff] %v1866_v19  ;;  %v5332_v31 = vpop.permute.xlu1 %3977  ;;  %v3965_v35 = vunpack.i.h.bf16 %v3963_v17  ;;  %v3964_v27 = vunpack.i.l.bf16 %v3963_v17  ;;  %v3019_v10 = vor.u32 %v3298_v47, %v3018_v23  ;;  %v3023_v0 = vor.u32 %v3297_v15, %v3020_v3  ;;  %v3333_v23 = vld [vmem:[#allocation2 + $0x13c] sm:$0xf]  ;;  %v3164_v15 = vld [vmem:[#allocation2 + $0x144] sm:$0xf0] }
 0x4bb   : > { %1875 = vst [vmem:[#allocation2 + $0x104] sm:$0xf] %v1867_v61  ;;  %v3980_v37 = vunpack.i.h.bf16 %v5332_v31  ;;  %v3979_v38 = vunpack.i.l.bf16 %v5332_v31  ;;  %v3328_v43 = vld [vmem:[#allocation2 + $0x110] sm:$0xf0]  ;;  %v3114_v61 = vld [vmem:[#allocation2 + $0xd8] sm:$0xf]  ;;  %v5374_v3 = vor.u32 %v3333_v23, %v3164_v15 }
 0x4bc   : > { %1872 = vst [vmem:[#allocation2 + $0xf0] sm:$0xff] %v1864_v21  ;;  %v2011_v44 = vsel %vm706_vm1, %v3965_v35, %v3975_v2  ;;  %v2015_v41 = vsel %vm706_vm1, %v3955_v18, %v3965_v35  ;;  %v2010_v25 = vsel %vm706_vm1, %v3964_v27, %v3974_v9  ;;  %v2014_v42 = vsel %vm706_vm1, %v3954_v11, %v3964_v27  ;;  %v3170_v17 = vld [vmem:[#allocation2 + $0x140] sm:$0xf]  ;;  %v3319_v35 = vld [vmem:[#allocation2 + $0xc8] sm:$0xf0] }
 0x4bd   : > { %1873 = vst [vmem:[#allocation2 + $0xf8] sm:$0xf] %v1865_v34  ;;  %v2017_v13 = vsel %vm706_vm1, %v3980_v37, %v3960_v36  ;;  %v2016_v48 = vsel %vm706_vm1, %v3979_v38, %v3959_v30  ;;  %v2026_v24 = vpack.c.bf16 %v2011_v44, %v2015_v41  ;;  %v2024_v26 = vpack.c.bf16 %v2010_v25, %v2014_v42  ;;  %v3138_v60 = vld [vmem:[#allocation2 + $0x108] sm:$0xf]  ;;  %v3335_v34 = vld [vmem:[#allocation2 + $0x148] sm:$0xf0] }
 0x4be   : > { %v2023_v45 = vpack.c.bf16 %v2017_v13, %v2017_v13  ;;  %v2021_v7 = vpack.c.bf16 %v2016_v48, %v2016_v48  ;;  %2470 = vmatpush.bf16.msra.mxu0 %v3019_v10  ;;  %v3139_v53 = vor.u32 %v3328_v43, %v3138_v60  ;;  %2527 = vmatpush.bf16.msrb.mxu2 %v3023_v0  ;;  %v3102_v31 = vld [vmem:[#allocation2 + $0xc0] sm:$0xf]  ;;  %v3288_v43 = vld [vmem:[%s5485_s3 + $0x4] sm:$0xf]  ;;  %v2984_v44 = vld [vmem:[%s5485_s3 + $0xc] sm:$0xf0] }
 0x4bf   : > { %2034 = vst [vmem:[#allocation2 + $0x1a4] sm:$0xff] %v2026_v24  ;;  %v3007_v18 = vor.u32 %v3295_v46, %v3006_v56  ;;  %v3195_v11 = vor.u32 %v3341_v6, %v3194_v40  ;;  %v3183_v21 = vor.u32 %v3338_v1, %v3182_v51  ;;  %v3115_v47 = vor.u32 %v3322_v20, %v3114_v61  ;;  %v2994_v41 = vld [vmem:[%s5485_s3 + $0x18] sm:$0xf]  ;;  %v3098_v25 = vld [vmem:[#allocation2 + $0xb0] sm:$0xf] }
 0x4c0   : > { %2031 = vst [vmem:[#allocation2 + $0x194] sm:$0xf] %v2023_v45  ;;  %2487 = vmatpush.bf16.msra.mxu1 %v3139_v53  ;;  %v3171_v10 = vor.u32 %v3335_v34, %v3170_v17  ;;  %v3317_v42 = vld [vmem:[#allocation2 + $0xb8] sm:$0xf0]  ;;  %v3103_v46 = vor.u32 %v3319_v35, %v3102_v31  ;;  %v2990_v6 = vld [vmem:[%s5485_s3 + $0x8] sm:$0xf]  ;;  %v5395_v24 = vor.u32 %v3288_v43, %v2984_v44 }
 0x4c1   : > { %2029 = vst [vmem:[#allocation2 + $0x188] sm:$0xf] %v2021_v7  ;;  %v3968_v2 = vpop.permute.xlu0 %3967  ;;  %v3325_v62 = vld [vmem:[#allocation2 + $0xf8] sm:$0xf0]  ;;  %v3290_v13 = vld [vmem:[%s5485_s3 + $0x10] sm:$0xf0]  ;;  %v5398_v55 = vor.u32 %v3292_v5, %v2994_v41  ;;  %v3099_v56 = vor.u32 %v3317_v42, %v3098_v25 }
 0x4c2   : > { %2032 = vst [vmem:[#allocation2 + $0x198] sm:$0xff] %v2024_v26  ;;  %2471 = vmatpush.bf16.msra.mxu0 %v3007_v18  ;;  %2528 = vmatpush.bf16.msrb.mxu2 %v3011_v14  ;;  %v3970_v9 = vunpack.i.h.bf16 %v3968_v2  ;;  %v3969_v12 = vunpack.i.l.bf16 %v3968_v2  ;;  %v3327_v26 = vld [vmem:[#allocation2 + $0x10c] sm:$0xf]  ;;  %v3140_v60 = vld [vmem:[#allocation2 + $0x114] sm:$0xf0]  ;;  %v5401_v8 = vor.u32 %v3290_v13, %v2990_v6 }
 0x4c3   : > { %v3126_v63 = vld [vmem:[#allocation2 + $0xf0] sm:$0xf]  ;;  %v3329_v7 = vld [vmem:[#allocation2 + $0x118] sm:$0xf0]  ;;  %v3143_v54 = vor.u32 %v3327_v26, %v3140_v60  ;;  %v3314_v57 = vld [vmem:[#allocation2 + $0xa0] sm:$0xf0] }
 0x4c4   : > { %v2009_v4 = vsel %vm706_vm1, %v3970_v9, %v3980_v37  ;;  %v2013_v16 = vsel %vm706_vm1, %v3960_v36, %v3970_v9  ;;  %v2008_v28 = vsel %vm706_vm1, %v3969_v12, %v3979_v38  ;;  %v2012_v29 = vsel %vm706_vm1, %v3959_v30, %v3969_v12  ;;  %v3330_v36 = vld [vmem:[#allocation2 + $0x124] sm:$0xf]  ;;  %v3152_v30 = vld [vmem:[#allocation2 + $0x12c] sm:$0xf0]  ;;  %v3332_v37 = vld [vmem:[#allocation2 + $0x130] sm:$0xf0] }
 0x4c5   : > { %2472 = vmatmul.bf16.vlgmr.msra.gmra.mxu0 %v5358_v59  ;;  %2529 = vmatmul.bf16.vlgmr.msrb.gmra.mxu2 %v5358_v59  ;;  %v2022_v19 = vpack.c.bf16 %v2009_v4, %v2013_v16  ;;  %v2020_v39 = vpack.c.bf16 %v2008_v28, %v2012_v29  ;;  %v3127_v58 = vor.u32 %v3325_v62, %v3126_v63  ;;  %v3158_v38 = vld [vmem:[#allocation2 + $0x128] sm:$0xf]  ;;  %v3146_v45 = vld [vmem:[#allocation2 + $0x110] sm:$0xf]  ;;  %v3324_v14 = vld [vmem:[#allocation2 + $0xf4] sm:$0xf] }
 0x4c6   : > { %2540 = vmatpush.bf16.msrb.mxu0 %v5356_v52  ;;  %2597 = vmatpush.bf16.msra.mxu2 %v3195_v11  ;;  %v3346_v22 = vld [vmem:[#allocation2 + $0x1a0] sm:$0xf0]  ;;  %v3155_v33 = vor.u32 %v3330_v36, %v3152_v30  ;;  %v3159_v48 = vor.u32 %v3332_v37, %v3158_v38  ;;  %v3147_v18 = vor.u32 %v3329_v7, %v3146_v45  ;;  %v3128_v32 = vld [vmem:[#allocation2 + $0xfc] sm:$0xf0]  ;;  %v3086_v11 = vld [vmem:[#allocation2 + $0x98] sm:$0xf] }
 0x4c7   : > { %2030 = vst [vmem:[#allocation2 + $0x18c] sm:$0xff] %v2022_v19  ;;  %2488 = vmatpush.bf16.msra.mxu1 %v3127_v58  ;;  %v3134_v2 = vld [vmem:[#allocation2 + $0xf8] sm:$0xf]  ;;  %v3131_v9 = vor.u32 %v3324_v14, %v3128_v32  ;;  %v3321_v12 = vld [vmem:[#allocation2 + $0xdc] sm:$0xf]  ;;  %v3087_v62 = vor.u32 %v3314_v57, %v3086_v11 }
 0x4c8   : > { %2028 = vst [vmem:[#allocation2 + $0x180] sm:$0xff] %v2020_v39  ;;  %v3116_v51 = vld [vmem:[#allocation2 + $0xe4] sm:$0xf0]  ;;  %v3074_v1 = vld [vmem:[#allocation2 + $0x80] sm:$0xf] }
 0x4c9   : > { %v3210_v27 = vld [vmem:[#allocation2 + $0x198] sm:$0xf]  ;;  %v3311_v4 = vld [vmem:[#allocation2 + $0x88] sm:$0xf0]  ;;  %v3122_v16 = vld [vmem:[#allocation2 + $0xe0] sm:$0xf] }
 0x4ca   : > { %2541 = vmatpush.bf16.msrb.mxu0 %v5361_v50  ;;  %2598 = vmatpush.bf16.msra.mxu2 %v3183_v21  ;;  %v3211_v0 = vor.u32 %v3346_v22, %v3210_v27  ;;  %v3323_v28 = vld [vmem:[#allocation2 + $0xe8] sm:$0xf0]  ;;  %v3318_v29 = vld [vmem:[#allocation2 + $0xc4] sm:$0xf]  ;;  %v3075_v19 = vor.u32 %v3311_v4, %v3074_v1  ;;  %v3110_v39 = vld [vmem:[#allocation2 + $0xc8] sm:$0xf] }
 0x4cb   : > { %2489 = vmatpush.bf16.msra.mxu1 %v3115_v47  ;;  %v3123_v58 = vor.u32 %v3323_v28, %v3122_v16  ;;  %v3104_v61 = vld [vmem:[#allocation2 + $0xcc] sm:$0xf0]  ;;  %v3062_v20 = vld [vmem:[#allocation2 + $0x68] sm:$0xf]  ;;  %v3308_v21 = vld [vmem:[#allocation2 + $0x70] sm:$0xf0] }
 0x4cc   : > { %2508 = vmatpush.bf16.msra.mxu3 %v3211_v0  ;;  %v3320_v23 = vld [vmem:[#allocation2 + $0xd0] sm:$0xf0]  ;;  %v3291_v15 = vld [vmem:[%s5485_s3 + $0x1c] sm:$0xf]  ;;  %v2996_v34 = vld [vmem:[%s5485_s3 + $0x24] sm:$0xf0]  ;;  %v3107_v47 = vor.u32 %v3318_v29, %v3104_v61 }
 0x4cd   : > { %v3218_v17 = vld [vmem:[#allocation2 + $0x1a0] sm:$0xf]  ;;  %v3347_v22 = vld [vmem:[#allocation2 + $0x1a8] sm:$0xf0]  ;;  %v3111_v31 = vor.u32 %v3320_v23, %v3110_v39  ;;  %v2999_v35 = vor.u32 %v3291_v15, %v2996_v34  ;;  %v3050_v27 = vld [vmem:[#allocation2 + $0x50] sm:$0xf] }
 0x4ce   : > { %2542 = vmatpush.bf16.msrb.mxu0 %v5374_v3  ;;  %2599 = vmatpush.bf16.msra.mxu2 %v3171_v10  ;;  %v3343_v49 = vld [vmem:[#allocation2 + $0x188] sm:$0xf0]  ;;  %v3305_v10 = vld [vmem:[#allocation2 + $0x58] sm:$0xf0]  ;;  %v3219_v0 = vor.u32 %v3347_v22, %v3218_v17  ;;  %v3002_v36 = vld [vmem:[%s5485_s3 + $0x20] sm:$0xf] }
 0x4cf   : > { %2490 = vmatpush.bf16.msra.mxu1 %v3103_v46  ;;  %v3198_v53 = vld [vmem:[#allocation2 + $0x180] sm:$0xf]  ;;  %v3293_v30 = vld [vmem:[%s5485_s3 + $0x28] sm:$0xf0]  ;;  %v3206_v37 = vld [vmem:[#allocation2 + $0x188] sm:$0xf]  ;;  %v3051_v43 = vor.u32 %v3305_v10, %v3050_v27 }
 0x4d0   : > { %v3199_v40 = vor.u32 %v3343_v49, %v3198_v53  ;;  %v3344_v38 = vld [vmem:[#allocation2 + $0x190] sm:$0xf0]  ;;  %v3003_v44 = vor.u32 %v3293_v30, %v3002_v36  ;;  %v3038_v41 = vld [vmem:[#allocation2 + $0x38] sm:$0xf]  ;;  %v3302_v25 = vld [vmem:[#allocation2 + $0x40] sm:$0xf0] }
 0x4d1   : > { %v3207_v42 = vor.u32 %v3344_v38, %v3206_v37  ;;  %v3039_v46 = vor.u32 %v3302_v25, %v3038_v41  ;;  %v3345_v5 = vld [vmem:[#allocation2 + $0x19c] sm:$0xf]  ;;  %v3212_v6 = vld [vmem:[#allocation2 + $0x1a4] sm:$0xf0]  ;;  %v3026_v13 = vld [vmem:[#allocation2 + $0x20] sm:$0xf] }
 0x4d2   : > { %2543 = vmatpush.bf16.msrb.mxu0 %v3155_v33  ;;  %2600 = vmatpush.bf16.msra.mxu2 %v3159_v48  ;;  %v3296_v26 = vld [vmem:[#allocation2 + $0x10] sm:$0xf0]  ;;  %v3215_v60 = vor.u32 %v3345_v5, %v3212_v6  ;;  %v3342_v49 = vld [vmem:[#allocation2 + $0x184] sm:$0xf]  ;;  %v3200_v45 = vld [vmem:[#allocation2 + $0x18c] sm:$0xf0] }
 0x4d3   : > { %3348 = vmatpush.bf16.msrb.mxu1 %v5356_v52  ;;  %2509 = vmatpush.bf16.msra.mxu3 %v3199_v40  ;;  %v3326_v52 = vld [vmem:[#allocation2 + $0x100] sm:$0xf0]  ;;  %v3014_v7 = vld [vmem:[#allocation2 + $0x8] sm:$0xf]  ;;  %v3203_v40 = vor.u32 %v3342_v49, %v3200_v45  ;;  %v3986_v61 = vld [vmem:[%s4077_s30 + $0x18] sm:$0xff] }
 0x4d4   : > { %2491 = vmatmul.bf16.vlgmr.msra.gmra.mxu1 %v5395_v24  ;;  %v3135_v63 = vor.u32 %v3326_v52, %v3134_v2  ;;  %v3015_v53 = vor.u32 %v3296_v26, %v3014_v7 }
 0x4d5   : > { %2477 = vmatmul.bf16.gmra.mxu0 %v5398_v55  ;;  %2534 = vmatmul.bf16.gmra.mxu2 %v5398_v55 }
 0x4d6   : > { %2544 = vmatpush.bf16.msrb.mxu0 %v3143_v54  ;;  %2601 = vmatpush.bf16.msra.mxu2 %v3147_v18 }
 0x4d7   : > { %2578 = vmatpush.bf16.msrb.mxu3 %v3099_v56  ;;  %3349 = vmatpush.bf16.msrb.mxu1 %v5361_v50  ;;  %v3119_v50 = vor.u32 %v3321_v12, %v3116_v51  ;;  %v2128_v12 = vpop.permute.xlu0 %2127 }
 0x4d8   : > { %3220 = vmatmul.msk.bf16.vlgmr.msra.gmra.mxu3 %vm1157_vm6, %v5401_v8 }
 0x4da   : > { %2545 = vmatpush.bf16.msrb.mxu0 %v3131_v9  ;;  %2602 = vmatpush.bf16.msra.mxu2 %v3135_v63  ;;  %v3985_v63 = vld [vmem:[%s4077_s30] sm:$0xff] }
 0x4db   : > { %2579 = vmatpush.bf16.msrb.mxu3 %v3087_v62  ;;  %3350 = vmatpush.bf16.msrb.mxu1 %v5374_v3  ;;  %v3063_v3 = vor.u32 %v3308_v21, %v3062_v20 }
 0x4de   : > { %2546 = vmatpush.bf16.msrb.mxu0 %v3119_v50  ;;  %2603 = vmatpush.bf16.msra.mxu2 %v3123_v58 }
 0x4df   : > { %2580 = vmatpush.bf16.msrb.mxu3 %v3075_v19  ;;  %3351 = vmatpush.bf16.msrb.mxu1 %v3155_v33  ;;  %v3299_v33 = vld [vmem:[#allocation2 + $0x28] sm:$0xf0]  ;;  %v5443_v19 = vpop.permute.xlu1 %2132 }
 0x4e0   : > { %v3027_v48 = vor.u32 %v3299_v33, %v3026_v13 }
 0x4e2   : > { %2547 = vmatpush.bf16.msrb.mxu0 %v3107_v47  ;;  %2604 = vmatpush.bf16.msra.mxu2 %v3111_v31  ;;  %v3987_v31 = vld [vmem:[%s4077_s30 + $0x30] sm:$0xff] }
 0x4e3   : > { %2581 = vmatpush.bf16.msrb.mxu3 %v3063_v3  ;;  %3352 = vmatpush.bf16.msrb.mxu1 %v3143_v54 }
 0x4e4   : > { %2496 = vmatmul.bf16.gmra.mxu1 %v2999_v35 }
 0x4e5   : > { %2605 = vmatmul.bf16.vlgmr.msra.gmra.mxu2 %v5395_v24  ;;  %2548 = vmatmul.bf16.vlgmr.msrb.gmra.mxu0 %v5395_v24 }
 0x4e6   : > { %2622 = vmatpush.bf16.msra.mxu0 %v3219_v0 }
 0x4e7   : > { %2582 = vmatpush.bf16.msrb.mxu3 %v3051_v43  ;;  %3353 = vmatpush.bf16.msrb.mxu1 %v3131_v9  ;;  %v3988_v43 = vld [vmem:[%s4077_s30 + $0x48] sm:$0xff] }
 0x4e8   : > { %3221 = vmatmul.msk.bf16.gmra.mxu3 %vm1157_vm6, %v3003_v44 }
 0x4ea   : > { %2623 = vmatpush.bf16.msra.mxu0 %v3207_v42 }
 0x4eb   : > { %2583 = vmatpush.bf16.msrb.mxu3 %v3039_v46  ;;  %3354 = vmatpush.bf16.msrb.mxu1 %v3119_v50 }
 0x4ef   : > { %2584 = vmatpush.bf16.msrb.mxu3 %v3027_v48  ;;  %3355 = vmatpush.bf16.msrb.mxu1 %v3107_v47 }
 0x4f3   : > { %2565 = vmatpush.bf16.msra.mxu1 %v3215_v60  ;;  %2585 = vmatpush.bf16.msrb.mxu3 %v3015_v53 }
 0x4f4   : > { %2553 = vmatmul.bf16.vlgmr.msrb.gmra.mxu1 %v2999_v35 }
 0x4f5   : > { %2610 = vmatmul.bf16.gmra.mxu2 %v2999_v35  ;;  %3224 = vmatmul.msk.bf16.vlgmr.msra.gmra.mxu0 %vm1157_vm6, %v5401_v8 }
 0x4f7   : > { %2566 = vmatpush.bf16.msra.mxu1 %v3203_v40  ;;  %v3989_v40 = vld [vmem:[%s4077_s30 + $0x10] sm:$0xff] }
 0x4f8   : > { %2586 = vmatmul.bf16.vlgmr.msrb.gmra.mxu3 %v5358_v59  ;;  %v2123_v59 = vpop.permute.xlu2 %2122 }
 0x500   : > { %v5448_v22 = vpop.permute.xlu2 %2137 }
 0x504   : > { %3222 = vmatmul.msk.bf16.vlgmr.msra.gmra.mxu1 %vm1157_vm6, %v5401_v8 }
 0x505   : > { %3225 = vmatmul.msk.bf16.gmra.mxu0 %vm1157_vm6, %v3003_v44 }
 0x508   : > { %2591 = vmatmul.bf16.gmra.mxu3 %v5398_v55 }
 0x514   : > { %3223 = vmatmul.msk.bf16.gmra.mxu1 %vm1157_vm6, %v3003_v44 }
 0x542   : > { %v2473_v24 = vpop.f32.mrf.mxu0 }
 0x543   : > { %v2474_v14 = vadd.f32 %v2473_v24, %v2123_v59 }
 0x548   : > { %v2530_v56 = vpop.f32.mrf.mxu2 }
 0x549   : > { %v2531_v33 = vadd.f32 %v2530_v56, %v2123_v59 }
 0x54a   : > { %v2475_v54 = vpop.f32.mrf.mxu0 }
 0x54b   : > { %v2476_v62 = vadd.f32 %v2475_v54, %v2128_v12 }
 0x550   : > { %v2532_v2 = vpop.f32.mrf.mxu2 }
 0x551   : > { %v2492_v57 = vpop.f32.mrf.mxu1 }
 0x552   : > { %v2478_v18 = vpop.f32.mrf.mxu0  ;;  %v2493_v11 = vadd.f32 %v2492_v57, %v2474_v14  ;;  %v2533_v57 = vadd.f32 %v2532_v2, %v2128_v12 }
 0x553   : > { %v2479_v58 = vadd.f32 %v2478_v18, %v5443_v19  ;;  %v3990_v18 = vld [vmem:[%s4077_s30 + $0x8] sm:$0xff] }
 0x558   : > { %v5441_v50 = vpop.f32.mrf.mxu2 }
 0x559   : > { %v2494_v32 = vpop.f32.mrf.mxu1 }
 0x55a   : > { %v2480_v9 = vpop.f32.mrf.mxu0  ;;  %v2495_v4 = vadd.f32 %v2494_v32, %v2476_v62 }
 0x55b   : > { %v2511_v52 = vpop.f32.mrf.mxu3  ;;  %v2481_v3 = vadd.f32 %v2480_v9, %v5448_v22 }
 0x55c   : > { %v2512_v8 = vadd.f32 %v2511_v52, %v2493_v11 }
 0x55e   : > { %v2635_v55 = vmul.f32 0.1, %v2512_v8 }
 0x560   : > { %v2647_v51 = vadd.f32 %v3985_v63, %v2635_v55  ;;  %v5450_v47 = vpop.f32.mrf.mxu2  ;;  %v3991_v63 = vld [vmem:[%s4077_s30 + $0x28] sm:$0xff] }
 0x561   : > { %v2497_v1 = vpop.f32.mrf.mxu1 }
 0x562   : > { %2659 = vst [vmem:[%s5437_s29] sm:$0xff] %v2647_v51  ;;  %v2549_v39 = vpop.f32.mrf.mxu0  ;;  %v2498_v23 = vadd.f32 %v2497_v1, %v2479_v58  ;;  %v2536_v1 = vadd.f32 %v5441_v50, %v5443_v19 }
 0x563   : > { %v2513_v16 = vpop.f32.mrf.mxu3  ;;  %v2550_v6 = vadd.f32 %v2549_v39, %v2531_v33 }
 0x564   : > { %v2514_v28 = vadd.f32 %v2513_v16, %v2495_v4  ;;  %v3992_v4 = vld [vmem:[%s4077_s30 + $0x20] sm:$0xff] }
 0x566   : > { %v2638_v29 = vmul.f32 0.1, %v2514_v28 }
 0x568   : > { %v2650_v20 = vadd.f32 %v3986_v61, %v2638_v29  ;;  %v2606_v38 = vpop.f32.mrf.mxu2 }
 0x569   : > { %v2499_v21 = vpop.f32.mrf.mxu1 }
 0x56a   : > { %2662 = vst [vmem:[%s5437_s29 + $0x18] sm:$0xff] %v2650_v20  ;;  %v2551_v27 = vpop.f32.mrf.mxu0  ;;  %v2500_v0 = vadd.f32 %v2499_v21, %v2481_v3  ;;  %v3994_v3 = vld [vmem:[%s4077_s30 + $0x38] sm:$0xff] }
 0x56b   : > { %v2516_v15 = vpop.f32.mrf.mxu3 }
 0x56c   : > { %v2517_v34 = vadd.f32 %v2516_v15, %v2498_v23  ;;  %v3993_v15 = vld [vmem:[%s4077_s30 + $0x40] sm:$0xff] }
 0x56e   : > { %v2641_v17 = vmul.f32 0.1, %v2517_v34 }
 0x570   : > { %v2653_v35 = vadd.f32 %v3987_v31, %v2641_v17  ;;  %v2608_v26 = vpop.f32.mrf.mxu2  ;;  %v2538_v17 = vadd.f32 %v5450_v47, %v5448_v22 }
 0x571   : > { %v2554_v10 = vpop.f32.mrf.mxu1 }
 0x572   : > { %2665 = vst [vmem:[%s5437_s29 + $0x30] sm:$0xff] %v2653_v35  ;;  %v2625_v25 = vpop.f32.mrf.mxu0  ;;  %v2555_v29 = vadd.f32 %v2554_v10, %v2536_v1 }
 0x573   : > { %v2518_v36 = vpop.f32.mrf.mxu3 }
 0x574   : > { %v2519_v30 = vadd.f32 %v2518_v36, %v2500_v0 }
 0x576   : > { %v2644_v37 = vmul.f32 0.1, %v2519_v30 }
 0x578   : > { %v2656_v44 = vadd.f32 %v3988_v43, %v2644_v37  ;;  %v2611_v55 = vpop.f32.mrf.mxu2  ;;  %v3995_v43 = vld [vmem:[%s4077_s30 + $0x58] sm:$0xff] }
 0x579   : > { %v2556_v41 = vpop.f32.mrf.mxu1 }
 0x57a   : > { %2668 = vst [vmem:[%s5437_s29 + $0x48] sm:$0xff] %v2656_v44  ;;  %v2627_v7 = vpop.f32.mrf.mxu0  ;;  %v2557_v10 = vadd.f32 %v2556_v41, %v2538_v17 }
 0x57b   : > { %v2587_v42 = vpop.f32.mrf.mxu3 }
 0x57c   : > { %v2588_v46 = vadd.f32 %v2587_v42, %v2123_v59  ;;  %v2552_v59 = vadd.f32 %v2551_v27, %v2533_v57 }
 0x57e   : > { %v2607_v5 = vadd.f32 %v2606_v38, %v2588_v46 }
 0x580   : > { %v2626_v13 = vadd.f32 %v2625_v25, %v2607_v5  ;;  %v3996_v25 = vld [vmem:[%s4077_s30 + $0x50] sm:$0xff] }
 0x581   : > { %v2568_v48 = vpop.f32.mrf.mxu1 }
 0x582   : > { %v2569_v60 = vadd.f32 %v2568_v48, %v2550_v6  ;;  %v2637_v49 = vmul.f32 0.1, %v2626_v13 }
 0x583   : > { %v2589_v45 = vpop.f32.mrf.mxu3 }
 0x584   : > { %v2636_v53 = vmul.f32 0.1, %v2569_v60  ;;  %v2649_v24 = vadd.f32 %v3989_v40, %v2637_v49  ;;  %v2590_v54 = vadd.f32 %v2589_v45, %v2128_v12  ;;  %v2630_v12 = vpop.f32.mrf.mxu0 }
 0x586   : > { %v2648_v14 = vadd.f32 %v3990_v18, %v2636_v53  ;;  %2661 = vst [vmem:[%s5437_s29 + $0x10] sm:$0xff] %v2649_v24  ;;  %v2609_v56 = vadd.f32 %v2608_v26, %v2590_v54 }
 0x588   : > { %2660 = vst [vmem:[%s5437_s29 + $0x8] sm:$0xff] %v2648_v14  ;;  %v2628_v32 = vadd.f32 %v2627_v7, %v2609_v56 }
 0x589   : > { %v2570_v11 = vpop.f32.mrf.mxu1 }
 0x58a   : > { %v2571_v52 = vadd.f32 %v2570_v11, %v2552_v59  ;;  %v2640_v8 = vmul.f32 0.1, %v2628_v32 }
 0x58b   : > { %v2592_v9 = vpop.f32.mrf.mxu3 }
 0x58c   : > { %v2639_v62 = vmul.f32 0.1, %v2571_v52  ;;  %v2652_v51 = vadd.f32 %v3991_v63, %v2640_v8  ;;  %v2593_v2 = vadd.f32 %v2592_v9, %v5443_v19  ;;  %v2613_v19 = vpop.f32.mrf.mxu2  ;;  %v2632_v27 = vpop.f32.mrf.mxu0 }
 0x58e   : > { %v2651_v16 = vadd.f32 %v3992_v4, %v2639_v62  ;;  %2664 = vst [vmem:[%s5437_s29 + $0x28] sm:$0xff] %v2652_v51  ;;  %v2612_v28 = vadd.f32 %v2611_v55, %v2593_v2 }
 0x590   : > { %2663 = vst [vmem:[%s5437_s29 + $0x20] sm:$0xff] %v2651_v16  ;;  %v2631_v39 = vadd.f32 %v2630_v12, %v2612_v28 }
 0x591   : > { %v2573_v58 = vpop.f32.mrf.mxu1 }
 0x592   : > { %v2574_v61 = vadd.f32 %v2573_v58, %v2555_v29  ;;  %v2643_v20 = vmul.f32 0.1, %v2631_v39 }
 0x593   : > { %v2594_v21 = vpop.f32.mrf.mxu3 }
 0x594   : > { %v2642_v23 = vmul.f32 0.1, %v2574_v61  ;;  %v2655_v34 = vadd.f32 %v3993_v15, %v2643_v20  ;;  %v2595_v50 = vadd.f32 %v2594_v21, %v5448_v22 }
 0x596   : > { %v2654_v31 = vadd.f32 %v3994_v3, %v2642_v23  ;;  %2667 = vst [vmem:[%s5437_s29 + $0x40] sm:$0xff] %v2655_v34  ;;  %v2614_v35 = vadd.f32 %v2613_v19, %v2595_v50 }
 0x598   : > { %2666 = vst [vmem:[%s5437_s29 + $0x38] sm:$0xff] %v2654_v31  ;;  %v2633_v0 = vadd.f32 %v2632_v27, %v2614_v35 }
 0x599   : > { %v2575_v36 = vpop.f32.mrf.mxu1 }
 0x59a   : > { %v2576_v30 = vadd.f32 %v2575_v36, %v2557_v10  ;;  %v2646_v37 = vmul.f32 0.1, %v2633_v0 }
 0x59c   : > { %v2645_v38 = vmul.f32 0.1, %v2576_v30  ;;  %v2658_v44 = vadd.f32 %v3995_v43, %v2646_v37 }
 0x59e   : > { %v2657_v42 = vadd.f32 %v3996_v25, %v2645_v38  ;;  %2670 = vst [vmem:[%s5437_s29 + $0x58] sm:$0xff] %v2658_v44 }
 0x5a0   : > { %2669 = vst [vmem:[%s5437_s29 + $0x50] sm:$0xff] %v2657_v42 }
 0x5a1 PF: > { %s18_s26 = sadd.s32 1, %s4003_s26  }
 0x5a2   : > { %p15_p4 = scmp.ge.s32.totalorder %s18_s26, 4  }
 0x5a4   :  { %17 = sbr.rel (!%p15_p4) target bundleno = 2 (0x2), region = 79 }

</bundles_post_ra>
